<compile_context>
chip_gen: v7x
topology: tpu7x:2x2x1
jax: 0.10.0
libtpu: 0.0.40
codegen_flags: <defaults>
</compile_context>

<pallas_src>
import functools

import jax
import jax.numpy as jnp
from jax import lax
from jax.experimental import pallas as pl
from jax.experimental.pallas import tpu as pltpu

F32 = jnp.float32
BF16 = jnp.bfloat16


def _mm(a, b):
    # bf16 MXU operands, f32 accumulation
    return jnp.dot(a.astype(BF16), b, preferred_element_type=F32)


def _make_gh_fn(w_hh_ref, H):
    """Per-step hidden->gates matmul. Fused [Bt,H]@[H,3H] with 128-aligned result slices when H is
    lane-aligned; otherwise split the weight ONCE (hoisted out of the loop) into per-gate blocks so
    no intra-vreg lane slicing happens per timestep."""
    if H % 128 == 0:
        w = w_hh_ref[...]

        def gh(h):
            g = _mm(h, w)
            return g[:, 0:H], g[:, H:2 * H], g[:, 2 * H:3 * H]
    else:
        wr = w_hh_ref[:, 0:H]
        wz = w_hh_ref[:, H:2 * H]
        wn = w_hh_ref[:, 2 * H:3 * H]

        def gh(h):
            return _mm(h, wr), _mm(h, wz), _mm(h, wn)

    return gh


def smiles_vae_kernel(
    # batch-tiled tensors
    x_enc_ref, x_dec_ref, cond_ref, eps_ref,
    # encoder GRU (r/z hidden-hidden biases already folded into be_ih on the host)
    we_ih_ref, be_ih_ref, we_hh_ref, be_hh_n_ref,
    # mu / logvar heads
    wmu_ref, bmu_ref, wlv_ref, blv_ref,
    # decoder i2h (latent / condition row blocks)
    wi2h_lat_ref, wi2h_c_ref, bi2h_ref,
    # decoder GRU input path (token / latent / condition row blocks; r/z hh biases folded in bd_ih)
    wd_ih_x_ref, wd_ih_lat_ref, wd_ih_c_ref, bd_ih_ref,
    wd_hh_ref, bd_hh_n_ref,
    # output projection (1/temperature folded in, padded to lane-dense Vp columns)
    wout_ref, bout_ref,
    # outputs
    z_ref, dec_ref,
    # persistent scratch (tiny; the big phase scratch is pl.run_scoped so encoder/decoder reuse it)
    henc_scr,
    *, act_dtype,
):
    T, Bt, E = x_enc_ref.shape
    He = we_hh_ref.shape[0]
    Hd = wd_hh_ref.shape[0]
    Vp = wout_ref.shape[1]
    unroll = min(T, 8)   # bounded unroll: LLO visibility without blowing regalloc at real T

    gh_enc = _make_gh_fn(we_hh_ref, He)
    gh_dec = _make_gh_fn(wd_hh_ref, Hd)

    # ---------------- encoder phase (scoped bf16 gate scratch; VMEM reused by the decoder) -------
    def enc_phase(gi_r, gi_z, gi_n):
        x_flat = x_enc_ref[...].reshape(T * Bt, E)
        gi = _mm(x_flat, we_ih_ref[...]) + be_ih_ref[...]          # [T*Bt, 3He]; r/z hh-bias folded
        gi_r[...] = gi[:, 0:He].reshape(T, Bt, He).astype(BF16)
        gi_z[...] = gi[:, He:2 * He].reshape(T, Bt, He).astype(BF16)
        gi_n[...] = gi[:, 2 * He:3 * He].reshape(T, Bt, He).astype(BF16)
        b_hh_n = be_hh_n_ref[...]

        def step(t, h):
            gr, gz, gn = gh_enc(h)
            r = jax.nn.sigmoid((gi_r[t] + gr).astype(act_dtype))
            u = jax.nn.sigmoid((gi_z[t] + gz).astype(act_dtype))
            n = jnp.tanh((gi_n[t] + r * (gn + b_hh_n)).astype(act_dtype))
            return ((1.0 - u) * n + u * h).astype(F32)

        henc_scr[...] = lax.fori_loop(0, T, step, jnp.zeros((Bt, He), F32), unroll=unroll)

    pl.run_scoped(enc_phase,
                  pltpu.VMEM((T, Bt, He), BF16),
                  pltpu.VMEM((T, Bt, He), BF16),
                  pltpu.VMEM((T, Bt, He), BF16))

    # ---------------- latent heads + reparameterisation ----------------
    h_enc = henc_scr[...]
    mu = _mm(h_enc, wmu_ref[...]) + bmu_ref[...]
    logvar = _mm(h_enc, wlv_ref[...]) + blv_ref[...]
    z = mu + eps_ref[...] * jnp.exp(0.5 * logvar)
    z_ref[...] = z
    cond = cond_ref[...]

    # ---------------- decoder phase (scoped bf16 gate + hidden scratch) ----------------
    def dec_phase(gi_r, gi_z, gi_n, h_all):
        h0 = _mm(z, wi2h_lat_ref[...]) + _mm(cond, wi2h_c_ref[...]) + bi2h_ref[...]
        ctx = _mm(z, wd_ih_lat_ref[...]) + _mm(cond, wd_ih_c_ref[...]) + bd_ih_ref[...]  # [Bt,3Hd]
        x_flat = x_dec_ref[...].reshape(T * Bt, E)
        tok = _mm(x_flat, wd_ih_x_ref[...])                                              # [T*Bt,3Hd]
        gi_r[...] = (tok[:, 0:Hd].reshape(T, Bt, Hd) + ctx[:, 0:Hd][None]).astype(BF16)
        gi_z[...] = (tok[:, Hd:2 * Hd].reshape(T, Bt, Hd) + ctx[:, Hd:2 * Hd][None]).astype(BF16)
        gi_n[...] = (tok[:, 2 * Hd:3 * Hd].reshape(T, Bt, Hd) + ctx[:, 2 * Hd:3 * Hd][None]).astype(BF16)
        b_hh_n = bd_hh_n_ref[...]

        def step(t, h):
            gr, gz, gn = gh_dec(h)
            r = jax.nn.sigmoid((gi_r[t] + gr).astype(act_dtype))
            u = jax.nn.sigmoid((gi_z[t] + gz).astype(act_dtype))
            n = jnp.tanh((gi_n[t] + r * (gn + b_hh_n)).astype(act_dtype))
            h_new = ((1.0 - u) * n + u * h).astype(F32)
            h_all[t] = h_new.astype(BF16)
            return h_new

        lax.fori_loop(0, T, step, h0, unroll=unroll)

        # output projection + log-softmax once, off the serial path; single lane-dense store.
        logits = _mm(h_all[...].reshape(T * Bt, Hd), wout_ref[...]) + bout_ref[...]
        m = jnp.max(logits, axis=-1, keepdims=True)
        lse = m + jnp.log(jnp.sum(jnp.exp(logits - m), axis=-1, keepdims=True))
        dec_ref[...] = (logits - lse).reshape(T, Bt, Vp)

    pl.run_scoped(dec_phase,
                  pltpu.VMEM((T, Bt, Hd), BF16),
                  pltpu.VMEM((T, Bt, Hd), BF16),
                  pltpu.VMEM((T, Bt, Hd), BF16),
                  pltpu.VMEM((T, Bt, Hd), BF16))


def _split_gate_cols(w):
    """[in, 3H] -> (r, z, n) column blocks, PyTorch GRU gate order."""
    H = w.shape[1] // 3
    return w[:, 0:H], w[:, H:2 * H], w[:, 2 * H:3 * H]


def _pick_batch_tile(B):
    # >= 2 grid steps (megacore split on v7x, DMA/compute overlap everywhere),
    # batch tile a multiple of 16 (dense bf16 sublane packing), capped at 128.
    for bt in range(min(128, B // 2), 15, -1):
        if bt % 16 == 0 and B % bt == 0:
            return bt
    return B     # tiny batch: single full-batch tile


def smiles_vae_forward(params, inputs, condition, temperature, eps, *,
                       batch_tile=None, bf16_activations=False):
    """inputs: [B, T] int32 tokens; condition: [B, C] f32; eps: [B, L] f32.
    bf16_activations=True runs the sigmoid/tanh gate math in bf16 (v6e/v7x EUP has a bf16 path;
    keep False on v5e)."""
    B, T = inputs.shape
    E = params["emb_enc"].shape[1]
    He = params["we_hh"].shape[0]
    Hd = params["wd_hh"].shape[0]
    L = params["w_mu"].shape[1]
    C = condition.shape[1]
    V = params["w_out"].shape[1]
    Vp = ((V + 127) // 128) * 128          # lane-dense padded vocab for the big output store

    if batch_tile is None:
        batch_tile = _pick_batch_tile(B)
    Bt = batch_tile
    assert B % Bt == 0, "batch must be divisible by the batch tile"
    assert Bt == B or Bt % 8 == 0, "batch tile must be a multiple of 8 (prefer 16)"
    nb = B // Bt

    # embedding gather + time-major layout on the wrapper side
    x_enc = jnp.take(params["emb_enc"], inputs, axis=0)           # [B, T, E]
    x_dec = jnp.take(params["emb_dec"], inputs, axis=0)
    x_enc_tm = jnp.transpose(x_enc, (1, 0, 2)).astype(BF16)       # [T, B, E]
    x_dec_tm = jnp.transpose(x_dec, (1, 0, 2)).astype(BF16)

    # ---- encoder weights: fold b_hh_{r,z} into the hoisted input-gate bias; keep b_hh_n apart ----
    be_hh = params["be_hh"].astype(F32)
    be_ih_eff = (params["be_ih"].astype(F32)
                 + jnp.concatenate([be_hh[:, :2 * He], jnp.zeros((1, He), F32)], axis=1))
    be_hh_n = be_hh[:, 2 * He:]
    we_ih = params["we_ih"].astype(BF16)
    we_hh = params["we_hh"].astype(BF16)                          # fused [He, 3He]

    # ---- decoder weights ----
    bd_hh = params["bd_hh"].astype(F32)
    bd_ih_eff = (params["bd_ih"].astype(F32)
                 + jnp.concatenate([bd_hh[:, :2 * Hd], jnp.zeros((1, Hd), F32)], axis=1))
    bd_hh_n = bd_hh[:, 2 * Hd:]
    wd_hh = params["wd_hh"].astype(BF16)                          # fused [Hd, 3Hd]
    wd_ih = params["wd_ih"]
    wd_ih_x = wd_ih[0:E].astype(BF16)
    wd_ih_lat = wd_ih[E:E + L].astype(BF16)
    wd_ih_c = wd_ih[E + L:E + L + C].astype(BF16)

    wi2h = params["w_i2h"]
    wi2h_lat = wi2h[0:L].astype(BF16)
    wi2h_c = wi2h[L:L + C].astype(BF16)
    bi2h = params["b_i2h"].astype(F32)

    wmu = params["w_mu"].astype(BF16)
    bmu = params["b_mu"].astype(F32)
    wlv = params["w_lv"].astype(BF16)
    blv = params["b_lv"].astype(F32)

    # fold 1/temperature into the output projection; pad to lane-dense Vp (pad bias = -1e9 so the
    # padded columns never affect the log-softmax max/LSE)
    inv_temp = jnp.float32(1.0 / temperature)
    wout = jnp.pad((params["w_out"] * inv_temp).astype(BF16), ((0, 0), (0, Vp - V)))
    bout = jnp.pad((params["b_out"] * inv_temp).astype(F32), ((0, 0), (0, Vp - V)),
                   constant_values=-1e9)

    weight_args = (
        we_ih, be_ih_eff, we_hh, be_hh_n,
        wmu, bmu, wlv, blv,
        wi2h_lat, wi2h_c, bi2h,
        wd_ih_x, wd_ih_lat, wd_ih_c, bd_ih_eff,
        wd_hh, bd_hh_n,
        wout, bout,
    )
    args = (x_enc_tm, x_dec_tm, condition.astype(F32), eps.astype(F32)) + weight_args

    # grid-invariant weights: whole-array VMEM-resident refs (single buffer, no per-step DMA)
    vmem_res = pl.BlockSpec(memory_space=pltpu.MemorySpace.VMEM)
    seq_spec = pl.BlockSpec((T, Bt, E), lambda b: (0, b, 0))
    in_specs = [
        seq_spec, seq_spec,
        pl.BlockSpec((Bt, C), lambda b: (b, 0)),
        pl.BlockSpec((Bt, L), lambda b: (b, 0)),
    ] + [vmem_res] * len(weight_args)

    out_specs = (
        pl.BlockSpec((Bt, L), lambda b: (b, 0)),
        pl.BlockSpec((T, Bt, Vp), lambda b: (0, b, 0)),
    )

    # ---- size the scoped-VMEM limit from the actual buffers (+ headroom), no hardcoded 64 MiB ----
    def _nbytes(a):
        return int(a.size) * a.dtype.itemsize

    weight_bytes = sum(_nbytes(a) for a in weight_args)
    io_bytes = 2 * (2 * T * Bt * E * 2                 # x_enc + x_dec tiles (bf16), double-buffered
                    + Bt * C * 4 + Bt * L * 4          # cond, eps
                    + Bt * L * 4 + T * Bt * Vp * 4)    # z, dec outputs
    scratch_bytes = Bt * He * 4 + max(3 * T * Bt * He * 2, 4 * T * Bt * Hd * 2)  # run_scoped = max
    est = weight_bytes + io_bytes + scratch_bytes
    vmem_limit = int(min(96 * 2**20, int(1.5 * est) + (16 << 20)))   # v6e can go higher; v7x cannot

    kernel = functools.partial(smiles_vae_kernel,
                               act_dtype=BF16 if bf16_activations else F32)

    grid_spec = pltpu.PrefetchScalarGridSpec(
        num_scalar_prefetch=0,
        grid=(nb,),                                    # batch tiles; "parallel" => megacore-splittable
        in_specs=in_specs,
        out_specs=out_specs,
        scratch_shapes=[pltpu.VMEM((Bt, He), F32)],    # tiny persistent h_enc hand-off buffer
    )

    z, dec_tm = pl.pallas_call(
        kernel,
        out_shape=(jax.ShapeDtypeStruct((B, L), F32),
                   jax.ShapeDtypeStruct((T, B, Vp), F32)),
        grid_spec=grid_spec,
        compiler_params=pltpu.CompilerParams(
            dimension_semantics=("parallel",),
            vmem_limit_bytes=vmem_limit,
        ),
    )(*args)

    decoded = jnp.transpose(dec_tm[..., :V], (1, 0, 2))   # strip vocab padding -> [B, T, V]
    return z, decoded


# ---------------- pure-JAX reference (f32, same math) for a sanity check ----------------
def _ref_gru_seq(x_tm, w_ih, w_hh, b_ih, b_hh, h0):
    H = w_hh.shape[0]

    def step(h, xt):
        gi = xt @ w_ih + b_ih
        gh = h @ w_hh + b_hh
        r = jax.nn.sigmoid(gi[:, :H] + gh[:, :H])
        zg = jax.nn.sigmoid(gi[:, H:2 * H] + gh[:, H:2 * H])
        n = jnp.tanh(gi[:, 2 * H:] + r * gh[:, 2 * H:])
        h = (1 - zg) * n + zg * h
        return h, h

    h_last, hs = lax.scan(step, h0, x_tm)
    return h_last, hs


def reference_forward(params, inputs, condition, temperature, eps):
    B, T = inputs.shape
    He = params["we_hh"].shape[0]

    x_enc = jnp.transpose(jnp.take(params["emb_enc"], inputs, axis=0), (1, 0, 2)).astype(jnp.float32)
    x_dec = jnp.transpose(jnp.take(params["emb_dec"], inputs, axis=0), (1, 0, 2)).astype(jnp.float32)

    h_enc, _ = _ref_gru_seq(x_enc, params["we_ih"], params["we_hh"], params["be_ih"],
                            params["be_hh"], jnp.zeros((B, He), jnp.float32))
    mu = h_enc @ params["w_mu"] + params["b_mu"]
    logvar = h_enc @ params["w_lv"] + params["b_lv"]
    z = mu + eps * jnp.exp(0.5 * logvar)

    dec_embed = jnp.concatenate([z, condition.astype(jnp.float32)], axis=1)
    h0 = dec_embed @ params["w_i2h"] + params["b_i2h"]
    x_dec_full = jnp.concatenate(
        [x_dec, jnp.broadcast_to(dec_embed[None], (T, B, dec_embed.shape[1]))], axis=-1)
    _, hs = _ref_gru_seq(x_dec_full, params["wd_ih"], params["wd_hh"], params["bd_ih"],
                         params["bd_hh"], h0)
    logits = (hs @ params["w_out"] + params["b_out"]) / temperature
    logp = jax.nn.log_softmax(logits, axis=-1)
    return z, jnp.transpose(logp, (1, 0, 2))


def init_params(key, vocab, emb, h_enc, h_dec, latent, cond):
    ks = jax.random.split(key, 20)
    s = 0.1
    return {
        "emb_enc": s * jax.random.normal(ks[0], (vocab, emb), jnp.float32),
        "emb_dec": s * jax.random.normal(ks[1], (vocab, emb), jnp.float32),
        "we_ih": s * jax.random.normal(ks[2], (emb, 3 * h_enc), jnp.float32),
        "we_hh": s * jax.random.normal(ks[3], (h_enc, 3 * h_enc), jnp.float32),
        "be_ih": s * jax.random.normal(ks[4], (1, 3 * h_enc), jnp.float32),
        "be_hh": s * jax.random.normal(ks[5], (1, 3 * h_enc), jnp.float32),
        "w_mu": s * jax.random.normal(ks[6], (h_enc, latent), jnp.float32),
        "b_mu": s * jax.random.normal(ks[7], (1, latent), jnp.float32),
        "w_lv": s * jax.random.normal(ks[8], (h_enc, latent), jnp.float32),
        "b_lv": s * jax.random.normal(ks[9], (1, latent), jnp.float32),
        "w_i2h": s * jax.random.normal(ks[10], (latent + cond, h_dec), jnp.float32),
        "b_i2h": s * jax.random.normal(ks[11], (1, h_dec), jnp.float32),
        "wd_ih": s * jax.random.normal(ks[12], (emb + latent + cond, 3 * h_dec), jnp.float32),
        "wd_hh": s * jax.random.normal(ks[13], (h_dec, 3 * h_dec), jnp.float32),
        "bd_ih": s * jax.random.normal(ks[14], (1, 3 * h_dec), jnp.float32),
        "bd_hh": s * jax.random.normal(ks[15], (1, 3 * h_dec), jnp.float32),
        "w_out": s * jax.random.normal(ks[16], (h_dec, vocab), jnp.float32),
        "b_out": s * jax.random.normal(ks[17], (1, vocab), jnp.float32),
    }


if __name__ == "__main__":
    B, T = 32, 8            # B=32 -> batch tile 16 -> 2 grid steps (megacore / pipeline overlap)
    VOCAB, EMB = 32, 16
    H_ENC, H_DEC = 32, 32
    LATENT, COND = 16, 8
    TEMPERATURE = 0.8

    key = jax.random.PRNGKey(0)
    k_tok, k_cond, k_eps, k_par = jax.random.split(key, 4)

    inputs = jax.random.randint(k_tok, (B, T), 0, VOCAB, dtype=jnp.int32)   # [B, seq_len]
    condition = jax.random.normal(k_cond, (B, COND), jnp.float32)           # [B, condition_size]
    eps = jax.random.normal(k_eps, (B, LATENT), jnp.float32)                # randn_like(std)
    params = init_params(k_par, VOCAB, EMB, H_ENC, H_DEC, LATENT, COND)

    z, decoded = smiles_vae_forward(params, inputs, condition, TEMPERATURE, eps)
    z, decoded = jax.block_until_ready((z, decoded))

    assert z.shape == (B, LATENT) and decoded.shape == (B, T, VOCAB)
    assert bool(jnp.all(jnp.isfinite(z))) and bool(jnp.all(jnp.isfinite(decoded)))

    z_ref, dec_ref = reference_forward(params, inputs, condition, TEMPERATURE, eps)
    assert jnp.allclose(z, z_ref, rtol=5e-2, atol=5e-2)
    assert jnp.allclose(decoded, dec_ref, rtol=5e-2, atol=5e-2)

    print("KERNEL_OK")
</pallas_src>

<mosaic_0001>
module attributes {stable_mosaic.version = 11 : i64} {
  func.func @smiles_vae_kernel(%arg0: i32, %arg1: memref<8x16x16xbf16, #tpu.memory_space<vmem>>, %arg2: memref<8x16x16xbf16, #tpu.memory_space<vmem>>, %arg3: memref<16x8xf32, #tpu.memory_space<vmem>>, %arg4: memref<16x16xf32, #tpu.memory_space<vmem>>, %arg5: memref<16x96xbf16, #tpu.memory_space<vmem>>, %arg6: memref<1x96xf32, #tpu.memory_space<vmem>>, %arg7: memref<32x96xbf16, #tpu.memory_space<vmem>>, %arg8: memref<1x32xf32, #tpu.memory_space<vmem>>, %arg9: memref<32x16xbf16, #tpu.memory_space<vmem>>, %arg10: memref<1x16xf32, #tpu.memory_space<vmem>>, %arg11: memref<32x16xbf16, #tpu.memory_space<vmem>>, %arg12: memref<1x16xf32, #tpu.memory_space<vmem>>, %arg13: memref<16x32xbf16, #tpu.memory_space<vmem>>, %arg14: memref<8x32xbf16, #tpu.memory_space<vmem>>, %arg15: memref<1x32xf32, #tpu.memory_space<vmem>>, %arg16: memref<16x96xbf16, #tpu.memory_space<vmem>>, %arg17: memref<16x96xbf16, #tpu.memory_space<vmem>>, %arg18: memref<8x96xbf16, #tpu.memory_space<vmem>>, %arg19: memref<1x96xf32, #tpu.memory_space<vmem>>, %arg20: memref<32x96xbf16, #tpu.memory_space<vmem>>, %arg21: memref<1x32xf32, #tpu.memory_space<vmem>>, %arg22: memref<32x128xbf16, #tpu.memory_space<vmem>>, %arg23: memref<1x128xf32, #tpu.memory_space<vmem>>, %arg24: memref<16x16xf32, #tpu.memory_space<vmem>>, %arg25: memref<8x16x128xf32, #tpu.memory_space<vmem>>, %arg26: memref<16x32xf32, #tpu.memory_space<vmem>>) attributes {dimension_semantics = [#tpu.dimension_semantics<parallel>], iteration_bounds = array<i64: 2>, scalar_prefetch = 0 : i64, scratch_operands = 1 : i64, tpu.core_type = #tpu.core_type<tc>, window_params = [{transform_indices = @transform_0, window_bounds = array<i64: 8, 16, 16>}, {transform_indices = @transform_1, window_bounds = array<i64: 8, 16, 16>}, {transform_indices = @transform_2, window_bounds = array<i64: 16, 8>}, {transform_indices = @transform_3, window_bounds = array<i64: 16, 16>}, {pipeline_mode = #tpu.pipeline_mode<synchronous>, transform_indices = @transform_4, window_bounds = array<i64: 16, 96>}, {pipeline_mode = #tpu.pipeline_mode<synchronous>, transform_indices = @transform_5, window_bounds = array<i64: 1, 96>}, {pipeline_mode = #tpu.pipeline_mode<synchronous>, transform_indices = @transform_6, window_bounds = array<i64: 32, 96>}, {pipeline_mode = #tpu.pipeline_mode<synchronous>, transform_indices = @transform_7, window_bounds = array<i64: 1, 32>}, {pipeline_mode = #tpu.pipeline_mode<synchronous>, transform_indices = @transform_8, window_bounds = array<i64: 32, 16>}, {pipeline_mode = #tpu.pipeline_mode<synchronous>, transform_indices = @transform_9, window_bounds = array<i64: 1, 16>}, {pipeline_mode = #tpu.pipeline_mode<synchronous>, transform_indices = @transform_10, window_bounds = array<i64: 32, 16>}, {pipeline_mode = #tpu.pipeline_mode<synchronous>, transform_indices = @transform_11, window_bounds = array<i64: 1, 16>}, {pipeline_mode = #tpu.pipeline_mode<synchronous>, transform_indices = @transform_12, window_bounds = array<i64: 16, 32>}, {pipeline_mode = #tpu.pipeline_mode<synchronous>, transform_indices = @transform_13, window_bounds = array<i64: 8, 32>}, {pipeline_mode = #tpu.pipeline_mode<synchronous>, transform_indices = @transform_14, window_bounds = array<i64: 1, 32>}, {pipeline_mode = #tpu.pipeline_mode<synchronous>, transform_indices = @transform_15, window_bounds = array<i64: 16, 96>}, {pipeline_mode = #tpu.pipeline_mode<synchronous>, transform_indices = @transform_16, window_bounds = array<i64: 16, 96>}, {pipeline_mode = #tpu.pipeline_mode<synchronous>, transform_indices = @transform_17, window_bounds = array<i64: 8, 96>}, {pipeline_mode = #tpu.pipeline_mode<synchronous>, transform_indices = @transform_18, window_bounds = array<i64: 1, 96>}, {pipeline_mode = #tpu.pipeline_mode<synchronous>, transform_indices = @transform_19, window_bounds = array<i64: 32, 96>}, {pipeline_mode = #tpu.pipeline_mode<synchronous>, transform_indices = @transform_20, window_bounds = array<i64: 1, 32>}, {pipeline_mode = #tpu.pipeline_mode<synchronous>, transform_indices = @transform_21, window_bounds = array<i64: 32, 128>}, {pipeline_mode = #tpu.pipeline_mode<synchronous>, transform_indices = @transform_22, window_bounds = array<i64: 1, 128>}, {transform_indices = @transform_23, window_bounds = array<i64: 16, 16>}, {transform_indices = @transform_24, window_bounds = array<i64: 8, 16, 128>}]} {
    %c0 = arith.constant 0 : index
    %c0_0 = arith.constant 0 : index
    %0 = vector.load %arg7[%c0, %c0_0] : memref<32x96xbf16, #tpu.memory_space<vmem>>, vector<32x32xbf16>
    %c0_1 = arith.constant 0 : index
    %c32 = arith.constant 32 : index
    %1 = vector.load %arg7[%c0_1, %c32] : memref<32x96xbf16, #tpu.memory_space<vmem>>, vector<32x32xbf16>
    %c0_2 = arith.constant 0 : index
    %c64 = arith.constant 64 : index
    %2 = vector.load %arg7[%c0_2, %c64] : memref<32x96xbf16, #tpu.memory_space<vmem>>, vector<32x32xbf16>
    %c0_3 = arith.constant 0 : index
    %c0_4 = arith.constant 0 : index
    %3 = vector.load %arg20[%c0_3, %c0_4] : memref<32x96xbf16, #tpu.memory_space<vmem>>, vector<32x32xbf16>
    %c0_5 = arith.constant 0 : index
    %c32_6 = arith.constant 32 : index
    %4 = vector.load %arg20[%c0_5, %c32_6] : memref<32x96xbf16, #tpu.memory_space<vmem>>, vector<32x32xbf16>
    %c0_7 = arith.constant 0 : index
    %c64_8 = arith.constant 64 : index
    %5 = vector.load %arg20[%c0_7, %c64_8] : memref<32x96xbf16, #tpu.memory_space<vmem>>, vector<32x32xbf16>
    "tpu.region"() ({
      %alloca = memref.alloca() : memref<8x16x32xbf16, #tpu.memory_space<vmem>>
      %alloca_27 = memref.alloca() : memref<8x16x32xbf16, #tpu.memory_space<vmem>>
      %alloca_28 = memref.alloca() : memref<8x16x32xbf16, #tpu.memory_space<vmem>>
      %c0_29 = arith.constant 0 : index
      %c0_30 = arith.constant 0 : index
      %c0_31 = arith.constant 0 : index
      %27 = vector.load %arg1[%c0_29, %c0_30, %c0_31] : memref<8x16x16xbf16, #tpu.memory_space<vmem>>, vector<8x16x16xbf16>
      %28 = vector.shape_cast %27 : vector<8x16x16xbf16> to vector<128x16xbf16>
      %c0_32 = arith.constant 0 : index
      %c0_33 = arith.constant 0 : index
      %29 = vector.load %arg5[%c0_32, %c0_33] : memref<16x96xbf16, #tpu.memory_space<vmem>>, vector<16x96xbf16>
      %cst_34 = arith.constant dense<0.000000e+00> : vector<128x96xf32>
      %30 = tpu.matmul %28, %29, %cst_34 {dimension_numbers = #tpu.dot_dimension_numbers<[1], [0], [0], [1], [0, 0, 1, 1], [], []>} : vector<128x16xbf16>, vector<16x96xbf16>, vector<128x96xf32> -> vector<128x96xf32>
      %c0_35 = arith.constant 0 : index
      %c0_36 = arith.constant 0 : index
      %31 = vector.load %arg6[%c0_35, %c0_36] : memref<1x96xf32, #tpu.memory_space<vmem>>, vector<1x96xf32>
      %32 = vector.broadcast %31 : vector<1x96xf32> to vector<128x96xf32>
      %33 = arith.addf %30, %32 : vector<128x96xf32>
      %34 = vector.extract_strided_slice %33 {offsets = [0, 0], sizes = [128, 32], strides = [1, 1]} : vector<128x96xf32> to vector<128x32xf32>
      %35 = vector.shape_cast %34 : vector<128x32xf32> to vector<8x16x32xf32>
      %36 = arith.truncf %35 : vector<8x16x32xf32> to vector<8x16x32xbf16>
      %c0_37 = arith.constant 0 : index
      %c0_38 = arith.constant 0 : index
      %c0_39 = arith.constant 0 : index
      %37 = vector.load %alloca[%c0_37, %c0_38, %c0_39] : memref<8x16x32xbf16, #tpu.memory_space<vmem>>, vector<8x16x32xbf16>
      tpu.vector_store %alloca[%c0_37, %c0_38, %c0_39], %36 {strides = array<i32>} : memref<8x16x32xbf16, #tpu.memory_space<vmem>>, vector<8x16x32xbf16>,
      %38 = vector.extract_strided_slice %33 {offsets = [0, 32], sizes = [128, 32], strides = [1, 1]} : vector<128x96xf32> to vector<128x32xf32>
      %39 = vector.shape_cast %38 : vector<128x32xf32> to vector<8x16x32xf32>
      %40 = arith.truncf %39 : vector<8x16x32xf32> to vector<8x16x32xbf16>
      %c0_40 = arith.constant 0 : index
      %c0_41 = arith.constant 0 : index
      %c0_42 = arith.constant 0 : index
      %41 = vector.load %alloca_27[%c0_40, %c0_41, %c0_42] : memref<8x16x32xbf16, #tpu.memory_space<vmem>>, vector<8x16x32xbf16>
      tpu.vector_store %alloca_27[%c0_40, %c0_41, %c0_42], %40 {strides = array<i32>} : memref<8x16x32xbf16, #tpu.memory_space<vmem>>, vector<8x16x32xbf16>,
      %42 = vector.extract_strided_slice %33 {offsets = [0, 64], sizes = [128, 32], strides = [1, 1]} : vector<128x96xf32> to vector<128x32xf32>
      %43 = vector.shape_cast %42 : vector<128x32xf32> to vector<8x16x32xf32>
      %44 = arith.truncf %43 : vector<8x16x32xf32> to vector<8x16x32xbf16>
      %c0_43 = arith.constant 0 : index
      %c0_44 = arith.constant 0 : index
      %c0_45 = arith.constant 0 : index
      %45 = vector.load %alloca_28[%c0_43, %c0_44, %c0_45] : memref<8x16x32xbf16, #tpu.memory_space<vmem>>, vector<8x16x32xbf16>
      tpu.vector_store %alloca_28[%c0_43, %c0_44, %c0_45], %44 {strides = array<i32>} : memref<8x16x32xbf16, #tpu.memory_space<vmem>>, vector<8x16x32xbf16>,
      %c0_46 = arith.constant 0 : index
      %c0_47 = arith.constant 0 : index
      %46 = vector.load %arg8[%c0_46, %c0_47] : memref<1x32xf32, #tpu.memory_space<vmem>>, vector<1x32xf32>
      %cst_48 = arith.constant 0.000000e+00 : f32
      %47 = vector.broadcast %cst_48 : f32 to vector<16x32xf32>
      %c0_i32 = arith.constant 0 : i32
      %48 = arith.truncf %47 : vector<16x32xf32> to vector<16x32xbf16>
      %cst_49 = arith.constant dense<0.000000e+00> : vector<16x32xf32>
      %49 = tpu.matmul %48, %0, %cst_49 {dimension_numbers = #tpu.dot_dimension_numbers<[1], [0], [0], [1], [0, 0, 1, 1], [], []>} : vector<16x32xbf16>, vector<32x32xbf16>, vector<16x32xf32> -> vector<16x32xf32>
      %50 = arith.truncf %47 : vector<16x32xf32> to vector<16x32xbf16>
      %cst_50 = arith.constant dense<0.000000e+00> : vector<16x32xf32>
      %51 = tpu.matmul %50, %1, %cst_50 {dimension_numbers = #tpu.dot_dimension_numbers<[1], [0], [0], [1], [0, 0, 1, 1], [], []>} : vector<16x32xbf16>, vector<32x32xbf16>, vector<16x32xf32> -> vector<16x32xf32>
      %52 = arith.truncf %47 : vector<16x32xf32> to vector<16x32xbf16>
      %cst_51 = arith.constant dense<0.000000e+00> : vector<16x32xf32>
      %53 = tpu.matmul %52, %2, %cst_51 {dimension_numbers = #tpu.dot_dimension_numbers<[1], [0], [0], [1], [0, 0, 1, 1], [], []>} : vector<16x32xbf16>, vector<32x32xbf16>, vector<16x32xf32> -> vector<16x32xf32>
      %54 = arith.index_cast %c0_i32 : i32 to index
      %c0_52 = arith.constant 0 : index
      %c0_53 = arith.constant 0 : index
      %55 = vector.load %alloca[%54, %c0_52, %c0_53] : memref<8x16x32xbf16, #tpu.memory_space<vmem>>, vector<1x16x32xbf16>
      %56 = vector.shape_cast %55 : vector<1x16x32xbf16> to vector<16x32xbf16>
      %57 = arith.extf %56 : vector<16x32xbf16> to vector<16x32xf32>
      %58 = arith.addf %57, %49 : vector<16x32xf32>
      %59 = arith.negf %58 : vector<16x32xf32>
      %60 = math.exp %59 : vector<16x32xf32>
      %cst_54 = arith.constant 1.000000e+00 : f32
      %61 = vector.broadcast %cst_54 : f32 to vector<16x32xf32>
      %62 = arith.addf %61, %60 : vector<16x32xf32>
      %63 = arith.divf %61, %62 : vector<16x32xf32>
      %64 = arith.index_cast %c0_i32 : i32 to index
      %c0_55 = arith.constant 0 : index
      %c0_56 = arith.constant 0 : index
      %65 = vector.load %alloca_27[%64, %c0_55, %c0_56] : memref<8x16x32xbf16, #tpu.memory_space<vmem>>, vector<1x16x32xbf16>
      %66 = vector.shape_cast %65 : vector<1x16x32xbf16> to vector<16x32xbf16>
      %67 = arith.extf %66 : vector<16x32xbf16> to vector<16x32xf32>
      %68 = arith.addf %67, %51 : vector<16x32xf32>
      %69 = arith.negf %68 : vector<16x32xf32>
      %70 = math.exp %69 : vector<16x32xf32>
      %cst_57 = arith.constant 1.000000e+00 : f32
      %71 = vector.broadcast %cst_57 : f32 to vector<16x32xf32>
      %72 = arith.addf %71, %70 : vector<16x32xf32>
      %73 = arith.divf %71, %72 : vector<16x32xf32>
      %74 = arith.index_cast %c0_i32 : i32 to index
      %c0_58 = arith.constant 0 : index
      %c0_59 = arith.constant 0 : index
      %75 = vector.load %alloca_28[%74, %c0_58, %c0_59] : memref<8x16x32xbf16, #tpu.memory_space<vmem>>, vector<1x16x32xbf16>
      %76 = vector.shape_cast %75 : vector<1x16x32xbf16> to vector<16x32xbf16>
      %77 = vector.broadcast %46 : vector<1x32xf32> to vector<16x32xf32>
      %78 = arith.addf %53, %77 : vector<16x32xf32>
      %79 = arith.mulf %63, %78 : vector<16x32xf32>
      %80 = arith.extf %76 : vector<16x32xbf16> to vector<16x32xf32>
      %81 = arith.addf %80, %79 : vector<16x32xf32>
      %82 = math.tanh %81 : vector<16x32xf32>
      %cst_60 = arith.constant 1.000000e+00 : f32
      %83 = vector.broadcast %cst_60 : f32 to vector<16x32xf32>
      %84 = arith.subf %83, %73 : vector<16x32xf32>
      %85 = arith.mulf %84, %82 : vector<16x32xf32>
      %86 = arith.mulf %73, %47 : vector<16x32xf32>
      %87 = arith.addf %85, %86 : vector<16x32xf32>
      %c1_i32 = arith.constant 1 : i32
      %88 = arith.truncf %87 : vector<16x32xf32> to vector<16x32xbf16>
      %cst_61 = arith.constant dense<0.000000e+00> : vector<16x32xf32>
      %89 = tpu.matmul %88, %0, %cst_61 {dimension_numbers = #tpu.dot_dimension_numbers<[1], [0], [0], [1], [0, 0, 1, 1], [], []>} : vector<16x32xbf16>, vector<32x32xbf16>, vector<16x32xf32> -> vector<16x32xf32>
      %90 = arith.truncf %87 : vector<16x32xf32> to vector<16x32xbf16>
      %cst_62 = arith.constant dense<0.000000e+00> : vector<16x32xf32>
      %91 = tpu.matmul %90, %1, %cst_62 {dimension_numbers = #tpu.dot_dimension_numbers<[1], [0], [0], [1], [0, 0, 1, 1], [], []>} : vector<16x32xbf16>, vector<32x32xbf16>, vector<16x32xf32> -> vector<16x32xf32>
      %92 = arith.truncf %87 : vector<16x32xf32> to vector<16x32xbf16>
      %cst_63 = arith.constant dense<0.000000e+00> : vector<16x32xf32>
      %93 = tpu.matmul %92, %2, %cst_63 {dimension_numbers = #tpu.dot_dimension_numbers<[1], [0], [0], [1], [0, 0, 1, 1], [], []>} : vector<16x32xbf16>, vector<32x32xbf16>, vector<16x32xf32> -> vector<16x32xf32>
      %94 = arith.index_cast %c1_i32 : i32 to index
      %c0_64 = arith.constant 0 : index
      %c0_65 = arith.constant 0 : index
      %95 = vector.load %alloca[%94, %c0_64, %c0_65] : memref<8x16x32xbf16, #tpu.memory_space<vmem>>, vector<1x16x32xbf16>
      %96 = vector.shape_cast %95 : vector<1x16x32xbf16> to vector<16x32xbf16>
      %97 = arith.extf %96 : vector<16x32xbf16> to vector<16x32xf32>
      %98 = arith.addf %97, %89 : vector<16x32xf32>
      %99 = arith.negf %98 : vector<16x32xf32>
      %100 = math.exp %99 : vector<16x32xf32>
      %cst_66 = arith.constant 1.000000e+00 : f32
      %101 = vector.broadcast %cst_66 : f32 to vector<16x32xf32>
      %102 = arith.addf %101, %100 : vector<16x32xf32>
      %103 = arith.divf %101, %102 : vector<16x32xf32>
      %104 = arith.index_cast %c1_i32 : i32 to index
      %c0_67 = arith.constant 0 : index
      %c0_68 = arith.constant 0 : index
      %105 = vector.load %alloca_27[%104, %c0_67, %c0_68] : memref<8x16x32xbf16, #tpu.memory_space<vmem>>, vector<1x16x32xbf16>
      %106 = vector.shape_cast %105 : vector<1x16x32xbf16> to vector<16x32xbf16>
      %107 = arith.extf %106 : vector<16x32xbf16> to vector<16x32xf32>
      %108 = arith.addf %107, %91 : vector<16x32xf32>
      %109 = arith.negf %108 : vector<16x32xf32>
      %110 = math.exp %109 : vector<16x32xf32>
      %cst_69 = arith.constant 1.000000e+00 : f32
      %111 = vector.broadcast %cst_69 : f32 to vector<16x32xf32>
      %112 = arith.addf %111, %110 : vector<16x32xf32>
      %113 = arith.divf %111, %112 : vector<16x32xf32>
      %114 = arith.index_cast %c1_i32 : i32 to index
      %c0_70 = arith.constant 0 : index
      %c0_71 = arith.constant 0 : index
      %115 = vector.load %alloca_28[%114, %c0_70, %c0_71] : memref<8x16x32xbf16, #tpu.memory_space<vmem>>, vector<1x16x32xbf16>
      %116 = vector.shape_cast %115 : vector<1x16x32xbf16> to vector<16x32xbf16>
      %117 = vector.broadcast %46 : vector<1x32xf32> to vector<16x32xf32>
      %118 = arith.addf %93, %117 : vector<16x32xf32>
      %119 = arith.mulf %103, %118 : vector<16x32xf32>
      %120 = arith.extf %116 : vector<16x32xbf16> to vector<16x32xf32>
      %121 = arith.addf %120, %119 : vector<16x32xf32>
      %122 = math.tanh %121 : vector<16x32xf32>
      %cst_72 = arith.constant 1.000000e+00 : f32
      %123 = vector.broadcast %cst_72 : f32 to vector<16x32xf32>
      %124 = arith.subf %123, %113 : vector<16x32xf32>
      %125 = arith.mulf %124, %122 : vector<16x32xf32>
      %126 = arith.mulf %113, %87 : vector<16x32xf32>
      %127 = arith.addf %125, %126 : vector<16x32xf32>
      %c2_i32 = arith.constant 2 : i32
      %128 = arith.truncf %127 : vector<16x32xf32> to vector<16x32xbf16>
      %cst_73 = arith.constant dense<0.000000e+00> : vector<16x32xf32>
      %129 = tpu.matmul %128, %0, %cst_73 {dimension_numbers = #tpu.dot_dimension_numbers<[1], [0], [0], [1], [0, 0, 1, 1], [], []>} : vector<16x32xbf16>, vector<32x32xbf16>, vector<16x32xf32> -> vector<16x32xf32>
      %130 = arith.truncf %127 : vector<16x32xf32> to vector<16x32xbf16>
      %cst_74 = arith.constant dense<0.000000e+00> : vector<16x32xf32>
      %131 = tpu.matmul %130, %1, %cst_74 {dimension_numbers = #tpu.dot_dimension_numbers<[1], [0], [0], [1], [0, 0, 1, 1], [], []>} : vector<16x32xbf16>, vector<32x32xbf16>, vector<16x32xf32> -> vector<16x32xf32>
      %132 = arith.truncf %127 : vector<16x32xf32> to vector<16x32xbf16>
      %cst_75 = arith.constant dense<0.000000e+00> : vector<16x32xf32>
      %133 = tpu.matmul %132, %2, %cst_75 {dimension_numbers = #tpu.dot_dimension_numbers<[1], [0], [0], [1], [0, 0, 1, 1], [], []>} : vector<16x32xbf16>, vector<32x32xbf16>, vector<16x32xf32> -> vector<16x32xf32>
      %134 = arith.index_cast %c2_i32 : i32 to index
      %c0_76 = arith.constant 0 : index
      %c0_77 = arith.constant 0 : index
      %135 = vector.load %alloca[%134, %c0_76, %c0_77] : memref<8x16x32xbf16, #tpu.memory_space<vmem>>, vector<1x16x32xbf16>
      %136 = vector.shape_cast %135 : vector<1x16x32xbf16> to vector<16x32xbf16>
      %137 = arith.extf %136 : vector<16x32xbf16> to vector<16x32xf32>
      %138 = arith.addf %137, %129 : vector<16x32xf32>
      %139 = arith.negf %138 : vector<16x32xf32>
      %140 = math.exp %139 : vector<16x32xf32>
      %cst_78 = arith.constant 1.000000e+00 : f32
      %141 = vector.broadcast %cst_78 : f32 to vector<16x32xf32>
      %142 = arith.addf %141, %140 : vector<16x32xf32>
      %143 = arith.divf %141, %142 : vector<16x32xf32>
      %144 = arith.index_cast %c2_i32 : i32 to index
      %c0_79 = arith.constant 0 : index
      %c0_80 = arith.constant 0 : index
      %145 = vector.load %alloca_27[%144, %c0_79, %c0_80] : memref<8x16x32xbf16, #tpu.memory_space<vmem>>, vector<1x16x32xbf16>
      %146 = vector.shape_cast %145 : vector<1x16x32xbf16> to vector<16x32xbf16>
      %147 = arith.extf %146 : vector<16x32xbf16> to vector<16x32xf32>
      %148 = arith.addf %147, %131 : vector<16x32xf32>
      %149 = arith.negf %148 : vector<16x32xf32>
      %150 = math.exp %149 : vector<16x32xf32>
      %cst_81 = arith.constant 1.000000e+00 : f32
      %151 = vector.broadcast %cst_81 : f32 to vector<16x32xf32>
      %152 = arith.addf %151, %150 : vector<16x32xf32>
      %153 = arith.divf %151, %152 : vector<16x32xf32>
      %154 = arith.index_cast %c2_i32 : i32 to index
      %c0_82 = arith.constant 0 : index
      %c0_83 = arith.constant 0 : index
      %155 = vector.load %alloca_28[%154, %c0_82, %c0_83] : memref<8x16x32xbf16, #tpu.memory_space<vmem>>, vector<1x16x32xbf16>
      %156 = vector.shape_cast %155 : vector<1x16x32xbf16> to vector<16x32xbf16>
      %157 = vector.broadcast %46 : vector<1x32xf32> to vector<16x32xf32>
      %158 = arith.addf %133, %157 : vector<16x32xf32>
      %159 = arith.mulf %143, %158 : vector<16x32xf32>
      %160 = arith.extf %156 : vector<16x32xbf16> to vector<16x32xf32>
      %161 = arith.addf %160, %159 : vector<16x32xf32>
      %162 = math.tanh %161 : vector<16x32xf32>
      %cst_84 = arith.constant 1.000000e+00 : f32
      %163 = vector.broadcast %cst_84 : f32 to vector<16x32xf32>
      %164 = arith.subf %163, %153 : vector<16x32xf32>
      %165 = arith.mulf %164, %162 : vector<16x32xf32>
      %166 = arith.mulf %153, %127 : vector<16x32xf32>
      %167 = arith.addf %165, %166 : vector<16x32xf32>
      %c3_i32 = arith.constant 3 : i32
      %168 = arith.truncf %167 : vector<16x32xf32> to vector<16x32xbf16>
      %cst_85 = arith.constant dense<0.000000e+00> : vector<16x32xf32>
      %169 = tpu.matmul %168, %0, %cst_85 {dimension_numbers = #tpu.dot_dimension_numbers<[1], [0], [0], [1], [0, 0, 1, 1], [], []>} : vector<16x32xbf16>, vector<32x32xbf16>, vector<16x32xf32> -> vector<16x32xf32>
      %170 = arith.truncf %167 : vector<16x32xf32> to vector<16x32xbf16>
      %cst_86 = arith.constant dense<0.000000e+00> : vector<16x32xf32>
      %171 = tpu.matmul %170, %1, %cst_86 {dimension_numbers = #tpu.dot_dimension_numbers<[1], [0], [0], [1], [0, 0, 1, 1], [], []>} : vector<16x32xbf16>, vector<32x32xbf16>, vector<16x32xf32> -> vector<16x32xf32>
      %172 = arith.truncf %167 : vector<16x32xf32> to vector<16x32xbf16>
      %cst_87 = arith.constant dense<0.000000e+00> : vector<16x32xf32>
      %173 = tpu.matmul %172, %2, %cst_87 {dimension_numbers = #tpu.dot_dimension_numbers<[1], [0], [0], [1], [0, 0, 1, 1], [], []>} : vector<16x32xbf16>, vector<32x32xbf16>, vector<16x32xf32> -> vector<16x32xf32>
      %174 = arith.index_cast %c3_i32 : i32 to index
      %c0_88 = arith.constant 0 : index
      %c0_89 = arith.constant 0 : index
      %175 = vector.load %alloca[%174, %c0_88, %c0_89] : memref<8x16x32xbf16, #tpu.memory_space<vmem>>, vector<1x16x32xbf16>
      %176 = vector.shape_cast %175 : vector<1x16x32xbf16> to vector<16x32xbf16>
      %177 = arith.extf %176 : vector<16x32xbf16> to vector<16x32xf32>
      %178 = arith.addf %177, %169 : vector<16x32xf32>
      %179 = arith.negf %178 : vector<16x32xf32>
      %180 = math.exp %179 : vector<16x32xf32>
      %cst_90 = arith.constant 1.000000e+00 : f32
      %181 = vector.broadcast %cst_90 : f32 to vector<16x32xf32>
      %182 = arith.addf %181, %180 : vector<16x32xf32>
      %183 = arith.divf %181, %182 : vector<16x32xf32>
      %184 = arith.index_cast %c3_i32 : i32 to index
      %c0_91 = arith.constant 0 : index
      %c0_92 = arith.constant 0 : index
      %185 = vector.load %alloca_27[%184, %c0_91, %c0_92] : memref<8x16x32xbf16, #tpu.memory_space<vmem>>, vector<1x16x32xbf16>
      %186 = vector.shape_cast %185 : vector<1x16x32xbf16> to vector<16x32xbf16>
      %187 = arith.extf %186 : vector<16x32xbf16> to vector<16x32xf32>
      %188 = arith.addf %187, %171 : vector<16x32xf32>
      %189 = arith.negf %188 : vector<16x32xf32>
      %190 = math.exp %189 : vector<16x32xf32>
      %cst_93 = arith.constant 1.000000e+00 : f32
      %191 = vector.broadcast %cst_93 : f32 to vector<16x32xf32>
      %192 = arith.addf %191, %190 : vector<16x32xf32>
      %193 = arith.divf %191, %192 : vector<16x32xf32>
      %194 = arith.index_cast %c3_i32 : i32 to index
      %c0_94 = arith.constant 0 : index
      %c0_95 = arith.constant 0 : index
      %195 = vector.load %alloca_28[%194, %c0_94, %c0_95] : memref<8x16x32xbf16, #tpu.memory_space<vmem>>, vector<1x16x32xbf16>
      %196 = vector.shape_cast %195 : vector<1x16x32xbf16> to vector<16x32xbf16>
      %197 = vector.broadcast %46 : vector<1x32xf32> to vector<16x32xf32>
      %198 = arith.addf %173, %197 : vector<16x32xf32>
      %199 = arith.mulf %183, %198 : vector<16x32xf32>
      %200 = arith.extf %196 : vector<16x32xbf16> to vector<16x32xf32>
      %201 = arith.addf %200, %199 : vector<16x32xf32>
      %202 = math.tanh %201 : vector<16x32xf32>
      %cst_96 = arith.constant 1.000000e+00 : f32
      %203 = vector.broadcast %cst_96 : f32 to vector<16x32xf32>
      %204 = arith.subf %203, %193 : vector<16x32xf32>
      %205 = arith.mulf %204, %202 : vector<16x32xf32>
      %206 = arith.mulf %193, %167 : vector<16x32xf32>
      %207 = arith.addf %205, %206 : vector<16x32xf32>
      %c4_i32 = arith.constant 4 : i32
      %208 = arith.truncf %207 : vector<16x32xf32> to vector<16x32xbf16>
      %cst_97 = arith.constant dense<0.000000e+00> : vector<16x32xf32>
      %209 = tpu.matmul %208, %0, %cst_97 {dimension_numbers = #tpu.dot_dimension_numbers<[1], [0], [0], [1], [0, 0, 1, 1], [], []>} : vector<16x32xbf16>, vector<32x32xbf16>, vector<16x32xf32> -> vector<16x32xf32>
      %210 = arith.truncf %207 : vector<16x32xf32> to vector<16x32xbf16>
      %cst_98 = arith.constant dense<0.000000e+00> : vector<16x32xf32>
      %211 = tpu.matmul %210, %1, %cst_98 {dimension_numbers = #tpu.dot_dimension_numbers<[1], [0], [0], [1], [0, 0, 1, 1], [], []>} : vector<16x32xbf16>, vector<32x32xbf16>, vector<16x32xf32> -> vector<16x32xf32>
      %212 = arith.truncf %207 : vector<16x32xf32> to vector<16x32xbf16>
      %cst_99 = arith.constant dense<0.000000e+00> : vector<16x32xf32>
      %213 = tpu.matmul %212, %2, %cst_99 {dimension_numbers = #tpu.dot_dimension_numbers<[1], [0], [0], [1], [0, 0, 1, 1], [], []>} : vector<16x32xbf16>, vector<32x32xbf16>, vector<16x32xf32> -> vector<16x32xf32>
      %214 = arith.index_cast %c4_i32 : i32 to index
      %c0_100 = arith.constant 0 : index
      %c0_101 = arith.constant 0 : index
      %215 = vector.load %alloca[%214, %c0_100, %c0_101] : memref<8x16x32xbf16, #tpu.memory_space<vmem>>, vector<1x16x32xbf16>
      %216 = vector.shape_cast %215 : vector<1x16x32xbf16> to vector<16x32xbf16>
      %217 = arith.extf %216 : vector<16x32xbf16> to vector<16x32xf32>
      %218 = arith.addf %217, %209 : vector<16x32xf32>
      %219 = arith.negf %218 : vector<16x32xf32>
      %220 = math.exp %219 : vector<16x32xf32>
      %cst_102 = arith.constant 1.000000e+00 : f32
      %221 = vector.broadcast %cst_102 : f32 to vector<16x32xf32>
      %222 = arith.addf %221, %220 : vector<16x32xf32>
      %223 = arith.divf %221, %222 : vector<16x32xf32>
      %224 = arith.index_cast %c4_i32 : i32 to index
      %c0_103 = arith.constant 0 : index
      %c0_104 = arith.constant 0 : index
      %225 = vector.load %alloca_27[%224, %c0_103, %c0_104] : memref<8x16x32xbf16, #tpu.memory_space<vmem>>, vector<1x16x32xbf16>
      %226 = vector.shape_cast %225 : vector<1x16x32xbf16> to vector<16x32xbf16>
      %227 = arith.extf %226 : vector<16x32xbf16> to vector<16x32xf32>
      %228 = arith.addf %227, %211 : vector<16x32xf32>
      %229 = arith.negf %228 : vector<16x32xf32>
      %230 = math.exp %229 : vector<16x32xf32>
      %cst_105 = arith.constant 1.000000e+00 : f32
      %231 = vector.broadcast %cst_105 : f32 to vector<16x32xf32>
      %232 = arith.addf %231, %230 : vector<16x32xf32>
      %233 = arith.divf %231, %232 : vector<16x32xf32>
      %234 = arith.index_cast %c4_i32 : i32 to index
      %c0_106 = arith.constant 0 : index
      %c0_107 = arith.constant 0 : index
      %235 = vector.load %alloca_28[%234, %c0_106, %c0_107] : memref<8x16x32xbf16, #tpu.memory_space<vmem>>, vector<1x16x32xbf16>
      %236 = vector.shape_cast %235 : vector<1x16x32xbf16> to vector<16x32xbf16>
      %237 = vector.broadcast %46 : vector<1x32xf32> to vector<16x32xf32>
      %238 = arith.addf %213, %237 : vector<16x32xf32>
      %239 = arith.mulf %223, %238 : vector<16x32xf32>
      %240 = arith.extf %236 : vector<16x32xbf16> to vector<16x32xf32>
      %241 = arith.addf %240, %239 : vector<16x32xf32>
      %242 = math.tanh %241 : vector<16x32xf32>
      %cst_108 = arith.constant 1.000000e+00 : f32
      %243 = vector.broadcast %cst_108 : f32 to vector<16x32xf32>
      %244 = arith.subf %243, %233 : vector<16x32xf32>
      %245 = arith.mulf %244, %242 : vector<16x32xf32>
      %246 = arith.mulf %233, %207 : vector<16x32xf32>
      %247 = arith.addf %245, %246 : vector<16x32xf32>
      %c5_i32 = arith.constant 5 : i32
      %248 = arith.truncf %247 : vector<16x32xf32> to vector<16x32xbf16>
      %cst_109 = arith.constant dense<0.000000e+00> : vector<16x32xf32>
      %249 = tpu.matmul %248, %0, %cst_109 {dimension_numbers = #tpu.dot_dimension_numbers<[1], [0], [0], [1], [0, 0, 1, 1], [], []>} : vector<16x32xbf16>, vector<32x32xbf16>, vector<16x32xf32> -> vector<16x32xf32>
      %250 = arith.truncf %247 : vector<16x32xf32> to vector<16x32xbf16>
      %cst_110 = arith.constant dense<0.000000e+00> : vector<16x32xf32>
      %251 = tpu.matmul %250, %1, %cst_110 {dimension_numbers = #tpu.dot_dimension_numbers<[1], [0], [0], [1], [0, 0, 1, 1], [], []>} : vector<16x32xbf16>, vector<32x32xbf16>, vector<16x32xf32> -> vector<16x32xf32>
      %252 = arith.truncf %247 : vector<16x32xf32> to vector<16x32xbf16>
      %cst_111 = arith.constant dense<0.000000e+00> : vector<16x32xf32>
      %253 = tpu.matmul %252, %2, %cst_111 {dimension_numbers = #tpu.dot_dimension_numbers<[1], [0], [0], [1], [0, 0, 1, 1], [], []>} : vector<16x32xbf16>, vector<32x32xbf16>, vector<16x32xf32> -> vector<16x32xf32>
      %254 = arith.index_cast %c5_i32 : i32 to index
      %c0_112 = arith.constant 0 : index
      %c0_113 = arith.constant 0 : index
      %255 = vector.load %alloca[%254, %c0_112, %c0_113] : memref<8x16x32xbf16, #tpu.memory_space<vmem>>, vector<1x16x32xbf16>
      %256 = vector.shape_cast %255 : vector<1x16x32xbf16> to vector<16x32xbf16>
      %257 = arith.extf %256 : vector<16x32xbf16> to vector<16x32xf32>
      %258 = arith.addf %257, %249 : vector<16x32xf32>
      %259 = arith.negf %258 : vector<16x32xf32>
      %260 = math.exp %259 : vector<16x32xf32>
      %cst_114 = arith.constant 1.000000e+00 : f32
      %261 = vector.broadcast %cst_114 : f32 to vector<16x32xf32>
      %262 = arith.addf %261, %260 : vector<16x32xf32>
      %263 = arith.divf %261, %262 : vector<16x32xf32>
      %264 = arith.index_cast %c5_i32 : i32 to index
      %c0_115 = arith.constant 0 : index
      %c0_116 = arith.constant 0 : index
      %265 = vector.load %alloca_27[%264, %c0_115, %c0_116] : memref<8x16x32xbf16, #tpu.memory_space<vmem>>, vector<1x16x32xbf16>
      %266 = vector.shape_cast %265 : vector<1x16x32xbf16> to vector<16x32xbf16>
      %267 = arith.extf %266 : vector<16x32xbf16> to vector<16x32xf32>
      %268 = arith.addf %267, %251 : vector<16x32xf32>
      %269 = arith.negf %268 : vector<16x32xf32>
      %270 = math.exp %269 : vector<16x32xf32>
      %cst_117 = arith.constant 1.000000e+00 : f32
      %271 = vector.broadcast %cst_117 : f32 to vector<16x32xf32>
      %272 = arith.addf %271, %270 : vector<16x32xf32>
      %273 = arith.divf %271, %272 : vector<16x32xf32>
      %274 = arith.index_cast %c5_i32 : i32 to index
      %c0_118 = arith.constant 0 : index
      %c0_119 = arith.constant 0 : index
      %275 = vector.load %alloca_28[%274, %c0_118, %c0_119] : memref<8x16x32xbf16, #tpu.memory_space<vmem>>, vector<1x16x32xbf16>
      %276 = vector.shape_cast %275 : vector<1x16x32xbf16> to vector<16x32xbf16>
      %277 = vector.broadcast %46 : vector<1x32xf32> to vector<16x32xf32>
      %278 = arith.addf %253, %277 : vector<16x32xf32>
      %279 = arith.mulf %263, %278 : vector<16x32xf32>
      %280 = arith.extf %276 : vector<16x32xbf16> to vector<16x32xf32>
      %281 = arith.addf %280, %279 : vector<16x32xf32>
      %282 = math.tanh %281 : vector<16x32xf32>
      %cst_120 = arith.constant 1.000000e+00 : f32
      %283 = vector.broadcast %cst_120 : f32 to vector<16x32xf32>
      %284 = arith.subf %283, %273 : vector<16x32xf32>
      %285 = arith.mulf %284, %282 : vector<16x32xf32>
      %286 = arith.mulf %273, %247 : vector<16x32xf32>
      %287 = arith.addf %285, %286 : vector<16x32xf32>
      %c6_i32 = arith.constant 6 : i32
      %288 = arith.truncf %287 : vector<16x32xf32> to vector<16x32xbf16>
      %cst_121 = arith.constant dense<0.000000e+00> : vector<16x32xf32>
      %289 = tpu.matmul %288, %0, %cst_121 {dimension_numbers = #tpu.dot_dimension_numbers<[1], [0], [0], [1], [0, 0, 1, 1], [], []>} : vector<16x32xbf16>, vector<32x32xbf16>, vector<16x32xf32> -> vector<16x32xf32>
      %290 = arith.truncf %287 : vector<16x32xf32> to vector<16x32xbf16>
      %cst_122 = arith.constant dense<0.000000e+00> : vector<16x32xf32>
      %291 = tpu.matmul %290, %1, %cst_122 {dimension_numbers = #tpu.dot_dimension_numbers<[1], [0], [0], [1], [0, 0, 1, 1], [], []>} : vector<16x32xbf16>, vector<32x32xbf16>, vector<16x32xf32> -> vector<16x32xf32>
      %292 = arith.truncf %287 : vector<16x32xf32> to vector<16x32xbf16>
      %cst_123 = arith.constant dense<0.000000e+00> : vector<16x32xf32>
      %293 = tpu.matmul %292, %2, %cst_123 {dimension_numbers = #tpu.dot_dimension_numbers<[1], [0], [0], [1], [0, 0, 1, 1], [], []>} : vector<16x32xbf16>, vector<32x32xbf16>, vector<16x32xf32> -> vector<16x32xf32>
      %294 = arith.index_cast %c6_i32 : i32 to index
      %c0_124 = arith.constant 0 : index
      %c0_125 = arith.constant 0 : index
      %295 = vector.load %alloca[%294, %c0_124, %c0_125] : memref<8x16x32xbf16, #tpu.memory_space<vmem>>, vector<1x16x32xbf16>
      %296 = vector.shape_cast %295 : vector<1x16x32xbf16> to vector<16x32xbf16>
      %297 = arith.extf %296 : vector<16x32xbf16> to vector<16x32xf32>
      %298 = arith.addf %297, %289 : vector<16x32xf32>
      %299 = arith.negf %298 : vector<16x32xf32>
      %300 = math.exp %299 : vector<16x32xf32>
      %cst_126 = arith.constant 1.000000e+00 : f32
      %301 = vector.broadcast %cst_126 : f32 to vector<16x32xf32>
      %302 = arith.addf %301, %300 : vector<16x32xf32>
      %303 = arith.divf %301, %302 : vector<16x32xf32>
      %304 = arith.index_cast %c6_i32 : i32 to index
      %c0_127 = arith.constant 0 : index
      %c0_128 = arith.constant 0 : index
      %305 = vector.load %alloca_27[%304, %c0_127, %c0_128] : memref<8x16x32xbf16, #tpu.memory_space<vmem>>, vector<1x16x32xbf16>
      %306 = vector.shape_cast %305 : vector<1x16x32xbf16> to vector<16x32xbf16>
      %307 = arith.extf %306 : vector<16x32xbf16> to vector<16x32xf32>
      %308 = arith.addf %307, %291 : vector<16x32xf32>
      %309 = arith.negf %308 : vector<16x32xf32>
      %310 = math.exp %309 : vector<16x32xf32>
      %cst_129 = arith.constant 1.000000e+00 : f32
      %311 = vector.broadcast %cst_129 : f32 to vector<16x32xf32>
      %312 = arith.addf %311, %310 : vector<16x32xf32>
      %313 = arith.divf %311, %312 : vector<16x32xf32>
      %314 = arith.index_cast %c6_i32 : i32 to index
      %c0_130 = arith.constant 0 : index
      %c0_131 = arith.constant 0 : index
      %315 = vector.load %alloca_28[%314, %c0_130, %c0_131] : memref<8x16x32xbf16, #tpu.memory_space<vmem>>, vector<1x16x32xbf16>
      %316 = vector.shape_cast %315 : vector<1x16x32xbf16> to vector<16x32xbf16>
      %317 = vector.broadcast %46 : vector<1x32xf32> to vector<16x32xf32>
      %318 = arith.addf %293, %317 : vector<16x32xf32>
      %319 = arith.mulf %303, %318 : vector<16x32xf32>
      %320 = arith.extf %316 : vector<16x32xbf16> to vector<16x32xf32>
      %321 = arith.addf %320, %319 : vector<16x32xf32>
      %322 = math.tanh %321 : vector<16x32xf32>
      %cst_132 = arith.constant 1.000000e+00 : f32
      %323 = vector.broadcast %cst_132 : f32 to vector<16x32xf32>
      %324 = arith.subf %323, %313 : vector<16x32xf32>
      %325 = arith.mulf %324, %322 : vector<16x32xf32>
      %326 = arith.mulf %313, %287 : vector<16x32xf32>
      %327 = arith.addf %325, %326 : vector<16x32xf32>
      %c7_i32 = arith.constant 7 : i32
      %328 = arith.truncf %327 : vector<16x32xf32> to vector<16x32xbf16>
      %cst_133 = arith.constant dense<0.000000e+00> : vector<16x32xf32>
      %329 = tpu.matmul %328, %0, %cst_133 {dimension_numbers = #tpu.dot_dimension_numbers<[1], [0], [0], [1], [0, 0, 1, 1], [], []>} : vector<16x32xbf16>, vector<32x32xbf16>, vector<16x32xf32> -> vector<16x32xf32>
      %330 = arith.truncf %327 : vector<16x32xf32> to vector<16x32xbf16>
      %cst_134 = arith.constant dense<0.000000e+00> : vector<16x32xf32>
      %331 = tpu.matmul %330, %1, %cst_134 {dimension_numbers = #tpu.dot_dimension_numbers<[1], [0], [0], [1], [0, 0, 1, 1], [], []>} : vector<16x32xbf16>, vector<32x32xbf16>, vector<16x32xf32> -> vector<16x32xf32>
      %332 = arith.truncf %327 : vector<16x32xf32> to vector<16x32xbf16>
      %cst_135 = arith.constant dense<0.000000e+00> : vector<16x32xf32>
      %333 = tpu.matmul %332, %2, %cst_135 {dimension_numbers = #tpu.dot_dimension_numbers<[1], [0], [0], [1], [0, 0, 1, 1], [], []>} : vector<16x32xbf16>, vector<32x32xbf16>, vector<16x32xf32> -> vector<16x32xf32>
      %334 = arith.index_cast %c7_i32 : i32 to index
      %c0_136 = arith.constant 0 : index
      %c0_137 = arith.constant 0 : index
      %335 = vector.load %alloca[%334, %c0_136, %c0_137] : memref<8x16x32xbf16, #tpu.memory_space<vmem>>, vector<1x16x32xbf16>
      %336 = vector.shape_cast %335 : vector<1x16x32xbf16> to vector<16x32xbf16>
      %337 = arith.extf %336 : vector<16x32xbf16> to vector<16x32xf32>
      %338 = arith.addf %337, %329 : vector<16x32xf32>
      %339 = arith.negf %338 : vector<16x32xf32>
      %340 = math.exp %339 : vector<16x32xf32>
      %cst_138 = arith.constant 1.000000e+00 : f32
      %341 = vector.broadcast %cst_138 : f32 to vector<16x32xf32>
      %342 = arith.addf %341, %340 : vector<16x32xf32>
      %343 = arith.divf %341, %342 : vector<16x32xf32>
      %344 = arith.index_cast %c7_i32 : i32 to index
      %c0_139 = arith.constant 0 : index
      %c0_140 = arith.constant 0 : index
      %345 = vector.load %alloca_27[%344, %c0_139, %c0_140] : memref<8x16x32xbf16, #tpu.memory_space<vmem>>, vector<1x16x32xbf16>
      %346 = vector.shape_cast %345 : vector<1x16x32xbf16> to vector<16x32xbf16>
      %347 = arith.extf %346 : vector<16x32xbf16> to vector<16x32xf32>
      %348 = arith.addf %347, %331 : vector<16x32xf32>
      %349 = arith.negf %348 : vector<16x32xf32>
      %350 = math.exp %349 : vector<16x32xf32>
      %cst_141 = arith.constant 1.000000e+00 : f32
      %351 = vector.broadcast %cst_141 : f32 to vector<16x32xf32>
      %352 = arith.addf %351, %350 : vector<16x32xf32>
      %353 = arith.divf %351, %352 : vector<16x32xf32>
      %354 = arith.index_cast %c7_i32 : i32 to index
      %c0_142 = arith.constant 0 : index
      %c0_143 = arith.constant 0 : index
      %355 = vector.load %alloca_28[%354, %c0_142, %c0_143] : memref<8x16x32xbf16, #tpu.memory_space<vmem>>, vector<1x16x32xbf16>
      %356 = vector.shape_cast %355 : vector<1x16x32xbf16> to vector<16x32xbf16>
      %357 = vector.broadcast %46 : vector<1x32xf32> to vector<16x32xf32>
      %358 = arith.addf %333, %357 : vector<16x32xf32>
      %359 = arith.mulf %343, %358 : vector<16x32xf32>
      %360 = arith.extf %356 : vector<16x32xbf16> to vector<16x32xf32>
      %361 = arith.addf %360, %359 : vector<16x32xf32>
      %362 = math.tanh %361 : vector<16x32xf32>
      %cst_144 = arith.constant 1.000000e+00 : f32
      %363 = vector.broadcast %cst_144 : f32 to vector<16x32xf32>
      %364 = arith.subf %363, %353 : vector<16x32xf32>
      %365 = arith.mulf %364, %362 : vector<16x32xf32>
      %366 = arith.mulf %353, %327 : vector<16x32xf32>
      %367 = arith.addf %365, %366 : vector<16x32xf32>
      %c8_i32 = arith.constant 8 : i32
      %c0_145 = arith.constant 0 : index
      %c0_146 = arith.constant 0 : index
      %368 = vector.load %arg26[%c0_145, %c0_146] : memref<16x32xf32, #tpu.memory_space<vmem>>, vector<16x32xf32>
      tpu.vector_store %arg26[%c0_145, %c0_146], %367 {strides = array<i32>} : memref<16x32xf32, #tpu.memory_space<vmem>>, vector<16x32xf32>,
      tpu.yield
    }) : () -> ()
    %c0_9 = arith.constant 0 : index
    %c0_10 = arith.constant 0 : index
    %6 = vector.load %arg26[%c0_9, %c0_10] : memref<16x32xf32, #tpu.memory_space<vmem>>, vector<16x32xf32>
    %c0_11 = arith.constant 0 : index
    %c0_12 = arith.constant 0 : index
    %7 = vector.load %arg9[%c0_11, %c0_12] : memref<32x16xbf16, #tpu.memory_space<vmem>>, vector<32x16xbf16>
    %8 = arith.truncf %6 : vector<16x32xf32> to vector<16x32xbf16>
    %cst = arith.constant dense<0.000000e+00> : vector<16x16xf32>
    %9 = tpu.matmul %8, %7, %cst {dimension_numbers = #tpu.dot_dimension_numbers<[1], [0], [0], [1], [0, 0, 1, 1], [], []>} : vector<16x32xbf16>, vector<32x16xbf16>, vector<16x16xf32> -> vector<16x16xf32>
    %c0_13 = arith.constant 0 : index
    %c0_14 = arith.constant 0 : index
    %10 = vector.load %arg10[%c0_13, %c0_14] : memref<1x16xf32, #tpu.memory_space<vmem>>, vector<1x16xf32>
    %11 = vector.broadcast %10 : vector<1x16xf32> to vector<16x16xf32>
    %12 = arith.addf %9, %11 : vector<16x16xf32>
    %c0_15 = arith.constant 0 : index
    %c0_16 = arith.constant 0 : index
    %13 = vector.load %arg11[%c0_15, %c0_16] : memref<32x16xbf16, #tpu.memory_space<vmem>>, vector<32x16xbf16>
    %14 = arith.truncf %6 : vector<16x32xf32> to vector<16x32xbf16>
    %cst_17 = arith.constant dense<0.000000e+00> : vector<16x16xf32>
    %15 = tpu.matmul %14, %13, %cst_17 {dimension_numbers = #tpu.dot_dimension_numbers<[1], [0], [0], [1], [0, 0, 1, 1], [], []>} : vector<16x32xbf16>, vector<32x16xbf16>, vector<16x16xf32> -> vector<16x16xf32>
    %c0_18 = arith.constant 0 : index
    %c0_19 = arith.constant 0 : index
    %16 = vector.load %arg12[%c0_18, %c0_19] : memref<1x16xf32, #tpu.memory_space<vmem>>, vector<1x16xf32>
    %17 = vector.broadcast %16 : vector<1x16xf32> to vector<16x16xf32>
    %18 = arith.addf %15, %17 : vector<16x16xf32>
    %c0_20 = arith.constant 0 : index
    %c0_21 = arith.constant 0 : index
    %19 = vector.load %arg4[%c0_20, %c0_21] : memref<16x16xf32, #tpu.memory_space<vmem>>, vector<16x16xf32>
    %cst_22 = arith.constant 5.000000e-01 : f32
    %20 = vector.broadcast %cst_22 : f32 to vector<16x16xf32>
    %21 = arith.mulf %20, %18 : vector<16x16xf32>
    %22 = math.exp %21 : vector<16x16xf32>
    %23 = arith.mulf %19, %22 : vector<16x16xf32>
    %24 = arith.addf %12, %23 : vector<16x16xf32>
    %c0_23 = arith.constant 0 : index
    %c0_24 = arith.constant 0 : index
    %25 = vector.load %arg24[%c0_23, %c0_24] : memref<16x16xf32, #tpu.memory_space<vmem>>, vector<16x16xf32>
    tpu.vector_store %arg24[%c0_23, %c0_24], %24 {strides = array<i32>} : memref<16x16xf32, #tpu.memory_space<vmem>>, vector<16x16xf32>,
    %c0_25 = arith.constant 0 : index
    %c0_26 = arith.constant 0 : index
    %26 = vector.load %arg3[%c0_25, %c0_26] : memref<16x8xf32, #tpu.memory_space<vmem>>, vector<16x8xf32>
    "tpu.region"() ({
      %alloca = memref.alloca() : memref<8x16x32xbf16, #tpu.memory_space<vmem>>
      %alloca_27 = memref.alloca() : memref<8x16x32xbf16, #tpu.memory_space<vmem>>
      %alloca_28 = memref.alloca() : memref<8x16x32xbf16, #tpu.memory_space<vmem>>
      %alloca_29 = memref.alloca() : memref<8x16x32xbf16, #tpu.memory_space<vmem>>
      %c0_30 = arith.constant 0 : index
      %c0_31 = arith.constant 0 : index
      %27 = vector.load %arg13[%c0_30, %c0_31] : memref<16x32xbf16, #tpu.memory_space<vmem>>, vector<16x32xbf16>
      %28 = arith.truncf %24 : vector<16x16xf32> to vector<16x16xbf16>
      %cst_32 = arith.constant dense<0.000000e+00> : vector<16x32xf32>
      %29 = tpu.matmul %28, %27, %cst_32 {dimension_numbers = #tpu.dot_dimension_numbers<[1], [0], [0], [1], [0, 0, 1, 1], [], []>} : vector<16x16xbf16>, vector<16x32xbf16>, vector<16x32xf32> -> vector<16x32xf32>
      %c0_33 = arith.constant 0 : index
      %c0_34 = arith.constant 0 : index
      %30 = vector.load %arg14[%c0_33, %c0_34] : memref<8x32xbf16, #tpu.memory_space<vmem>>, vector<8x32xbf16>
      %31 = arith.truncf %26 : vector<16x8xf32> to vector<16x8xbf16>
      %cst_35 = arith.constant dense<0.000000e+00> : vector<16x32xf32>
      %32 = tpu.matmul %31, %30, %cst_35 {dimension_numbers = #tpu.dot_dimension_numbers<[1], [0], [0], [1], [0, 0, 1, 1], [], []>} : vector<16x8xbf16>, vector<8x32xbf16>, vector<16x32xf32> -> vector<16x32xf32>
      %33 = arith.addf %29, %32 : vector<16x32xf32>
      %c0_36 = arith.constant 0 : index
      %c0_37 = arith.constant 0 : index
      %34 = vector.load %arg15[%c0_36, %c0_37] : memref<1x32xf32, #tpu.memory_space<vmem>>, vector<1x32xf32>
      %35 = vector.broadcast %34 : vector<1x32xf32> to vector<16x32xf32>
      %36 = arith.addf %33, %35 : vector<16x32xf32>
      %c0_38 = arith.constant 0 : index
      %c0_39 = arith.constant 0 : index
      %37 = vector.load %arg17[%c0_38, %c0_39] : memref<16x96xbf16, #tpu.memory_space<vmem>>, vector<16x96xbf16>
      %38 = arith.truncf %24 : vector<16x16xf32> to vector<16x16xbf16>
      %cst_40 = arith.constant dense<0.000000e+00> : vector<16x96xf32>
      %39 = tpu.matmul %38, %37, %cst_40 {dimension_numbers = #tpu.dot_dimension_numbers<[1], [0], [0], [1], [0, 0, 1, 1], [], []>} : vector<16x16xbf16>, vector<16x96xbf16>, vector<16x96xf32> -> vector<16x96xf32>
      %c0_41 = arith.constant 0 : index
      %c0_42 = arith.constant 0 : index
      %40 = vector.load %arg18[%c0_41, %c0_42] : memref<8x96xbf16, #tpu.memory_space<vmem>>, vector<8x96xbf16>
      %41 = arith.truncf %26 : vector<16x8xf32> to vector<16x8xbf16>
      %cst_43 = arith.constant dense<0.000000e+00> : vector<16x96xf32>
      %42 = tpu.matmul %41, %40, %cst_43 {dimension_numbers = #tpu.dot_dimension_numbers<[1], [0], [0], [1], [0, 0, 1, 1], [], []>} : vector<16x8xbf16>, vector<8x96xbf16>, vector<16x96xf32> -> vector<16x96xf32>
      %43 = arith.addf %39, %42 : vector<16x96xf32>
      %c0_44 = arith.constant 0 : index
      %c0_45 = arith.constant 0 : index
      %44 = vector.load %arg19[%c0_44, %c0_45] : memref<1x96xf32, #tpu.memory_space<vmem>>, vector<1x96xf32>
      %45 = vector.broadcast %44 : vector<1x96xf32> to vector<16x96xf32>
      %46 = arith.addf %43, %45 : vector<16x96xf32>
      %c0_46 = arith.constant 0 : index
      %c0_47 = arith.constant 0 : index
      %c0_48 = arith.constant 0 : index
      %47 = vector.load %arg2[%c0_46, %c0_47, %c0_48] : memref<8x16x16xbf16, #tpu.memory_space<vmem>>, vector<8x16x16xbf16>
      %48 = vector.shape_cast %47 : vector<8x16x16xbf16> to vector<128x16xbf16>
      %c0_49 = arith.constant 0 : index
      %c0_50 = arith.constant 0 : index
      %49 = vector.load %arg16[%c0_49, %c0_50] : memref<16x96xbf16, #tpu.memory_space<vmem>>, vector<16x96xbf16>
      %cst_51 = arith.constant dense<0.000000e+00> : vector<128x96xf32>
      %50 = tpu.matmul %48, %49, %cst_51 {dimension_numbers = #tpu.dot_dimension_numbers<[1], [0], [0], [1], [0, 0, 1, 1], [], []>} : vector<128x16xbf16>, vector<16x96xbf16>, vector<128x96xf32> -> vector<128x96xf32>
      %51 = vector.extract_strided_slice %50 {offsets = [0, 0], sizes = [128, 32], strides = [1, 1]} : vector<128x96xf32> to vector<128x32xf32>
      %52 = vector.shape_cast %51 : vector<128x32xf32> to vector<8x16x32xf32>
      %53 = vector.extract_strided_slice %46 {offsets = [0, 0], sizes = [16, 32], strides = [1, 1]} : vector<16x96xf32> to vector<16x32xf32>
      %54 = vector.shape_cast %53 : vector<16x32xf32> to vector<1x16x32xf32>
      %55 = vector.broadcast %54 : vector<1x16x32xf32> to vector<8x16x32xf32>
      %56 = arith.addf %52, %55 : vector<8x16x32xf32>
      %57 = arith.truncf %56 : vector<8x16x32xf32> to vector<8x16x32xbf16>
      %c0_52 = arith.constant 0 : index
      %c0_53 = arith.constant 0 : index
      %c0_54 = arith.constant 0 : index
      %58 = vector.load %alloca[%c0_52, %c0_53, %c0_54] : memref<8x16x32xbf16, #tpu.memory_space<vmem>>, vector<8x16x32xbf16>
      tpu.vector_store %alloca[%c0_52, %c0_53, %c0_54], %57 {strides = array<i32>} : memref<8x16x32xbf16, #tpu.memory_space<vmem>>, vector<8x16x32xbf16>,
      %59 = vector.extract_strided_slice %50 {offsets = [0, 32], sizes = [128, 32], strides = [1, 1]} : vector<128x96xf32> to vector<128x32xf32>
      %60 = vector.shape_cast %59 : vector<128x32xf32> to vector<8x16x32xf32>
      %61 = vector.extract_strided_slice %46 {offsets = [0, 32], sizes = [16, 32], strides = [1, 1]} : vector<16x96xf32> to vector<16x32xf32>
      %62 = vector.shape_cast %61 : vector<16x32xf32> to vector<1x16x32xf32>
      %63 = vector.broadcast %62 : vector<1x16x32xf32> to vector<8x16x32xf32>
      %64 = arith.addf %60, %63 : vector<8x16x32xf32>
      %65 = arith.truncf %64 : vector<8x16x32xf32> to vector<8x16x32xbf16>
      %c0_55 = arith.constant 0 : index
      %c0_56 = arith.constant 0 : index
      %c0_57 = arith.constant 0 : index
      %66 = vector.load %alloca_27[%c0_55, %c0_56, %c0_57] : memref<8x16x32xbf16, #tpu.memory_space<vmem>>, vector<8x16x32xbf16>
      tpu.vector_store %alloca_27[%c0_55, %c0_56, %c0_57], %65 {strides = array<i32>} : memref<8x16x32xbf16, #tpu.memory_space<vmem>>, vector<8x16x32xbf16>,
      %67 = vector.extract_strided_slice %50 {offsets = [0, 64], sizes = [128, 32], strides = [1, 1]} : vector<128x96xf32> to vector<128x32xf32>
      %68 = vector.shape_cast %67 : vector<128x32xf32> to vector<8x16x32xf32>
      %69 = vector.extract_strided_slice %46 {offsets = [0, 64], sizes = [16, 32], strides = [1, 1]} : vector<16x96xf32> to vector<16x32xf32>
      %70 = vector.shape_cast %69 : vector<16x32xf32> to vector<1x16x32xf32>
      %71 = vector.broadcast %70 : vector<1x16x32xf32> to vector<8x16x32xf32>
      %72 = arith.addf %68, %71 : vector<8x16x32xf32>
      %73 = arith.truncf %72 : vector<8x16x32xf32> to vector<8x16x32xbf16>
      %c0_58 = arith.constant 0 : index
      %c0_59 = arith.constant 0 : index
      %c0_60 = arith.constant 0 : index
      %74 = vector.load %alloca_28[%c0_58, %c0_59, %c0_60] : memref<8x16x32xbf16, #tpu.memory_space<vmem>>, vector<8x16x32xbf16>
      tpu.vector_store %alloca_28[%c0_58, %c0_59, %c0_60], %73 {strides = array<i32>} : memref<8x16x32xbf16, #tpu.memory_space<vmem>>, vector<8x16x32xbf16>,
      %c0_61 = arith.constant 0 : index
      %c0_62 = arith.constant 0 : index
      %75 = vector.load %arg21[%c0_61, %c0_62] : memref<1x32xf32, #tpu.memory_space<vmem>>, vector<1x32xf32>
      %c0_i32 = arith.constant 0 : i32
      %76 = arith.truncf %36 : vector<16x32xf32> to vector<16x32xbf16>
      %cst_63 = arith.constant dense<0.000000e+00> : vector<16x32xf32>
      %77 = tpu.matmul %76, %3, %cst_63 {dimension_numbers = #tpu.dot_dimension_numbers<[1], [0], [0], [1], [0, 0, 1, 1], [], []>} : vector<16x32xbf16>, vector<32x32xbf16>, vector<16x32xf32> -> vector<16x32xf32>
      %78 = arith.truncf %36 : vector<16x32xf32> to vector<16x32xbf16>
      %cst_64 = arith.constant dense<0.000000e+00> : vector<16x32xf32>
      %79 = tpu.matmul %78, %4, %cst_64 {dimension_numbers = #tpu.dot_dimension_numbers<[1], [0], [0], [1], [0, 0, 1, 1], [], []>} : vector<16x32xbf16>, vector<32x32xbf16>, vector<16x32xf32> -> vector<16x32xf32>
      %80 = arith.truncf %36 : vector<16x32xf32> to vector<16x32xbf16>
      %cst_65 = arith.constant dense<0.000000e+00> : vector<16x32xf32>
      %81 = tpu.matmul %80, %5, %cst_65 {dimension_numbers = #tpu.dot_dimension_numbers<[1], [0], [0], [1], [0, 0, 1, 1], [], []>} : vector<16x32xbf16>, vector<32x32xbf16>, vector<16x32xf32> -> vector<16x32xf32>
      %82 = arith.index_cast %c0_i32 : i32 to index
      %c0_66 = arith.constant 0 : index
      %c0_67 = arith.constant 0 : index
      %83 = vector.load %alloca[%82, %c0_66, %c0_67] : memref<8x16x32xbf16, #tpu.memory_space<vmem>>, vector<1x16x32xbf16>
      %84 = vector.shape_cast %83 : vector<1x16x32xbf16> to vector<16x32xbf16>
      %85 = arith.extf %84 : vector<16x32xbf16> to vector<16x32xf32>
      %86 = arith.addf %85, %77 : vector<16x32xf32>
      %87 = arith.negf %86 : vector<16x32xf32>
      %88 = math.exp %87 : vector<16x32xf32>
      %cst_68 = arith.constant 1.000000e+00 : f32
      %89 = vector.broadcast %cst_68 : f32 to vector<16x32xf32>
      %90 = arith.addf %89, %88 : vector<16x32xf32>
      %91 = arith.divf %89, %90 : vector<16x32xf32>
      %92 = arith.index_cast %c0_i32 : i32 to index
      %c0_69 = arith.constant 0 : index
      %c0_70 = arith.constant 0 : index
      %93 = vector.load %alloca_27[%92, %c0_69, %c0_70] : memref<8x16x32xbf16, #tpu.memory_space<vmem>>, vector<1x16x32xbf16>
      %94 = vector.shape_cast %93 : vector<1x16x32xbf16> to vector<16x32xbf16>
      %95 = arith.extf %94 : vector<16x32xbf16> to vector<16x32xf32>
      %96 = arith.addf %95, %79 : vector<16x32xf32>
      %97 = arith.negf %96 : vector<16x32xf32>
      %98 = math.exp %97 : vector<16x32xf32>
      %cst_71 = arith.constant 1.000000e+00 : f32
      %99 = vector.broadcast %cst_71 : f32 to vector<16x32xf32>
      %100 = arith.addf %99, %98 : vector<16x32xf32>
      %101 = arith.divf %99, %100 : vector<16x32xf32>
      %102 = arith.index_cast %c0_i32 : i32 to index
      %c0_72 = arith.constant 0 : index
      %c0_73 = arith.constant 0 : index
      %103 = vector.load %alloca_28[%102, %c0_72, %c0_73] : memref<8x16x32xbf16, #tpu.memory_space<vmem>>, vector<1x16x32xbf16>
      %104 = vector.shape_cast %103 : vector<1x16x32xbf16> to vector<16x32xbf16>
      %105 = vector.broadcast %75 : vector<1x32xf32> to vector<16x32xf32>
      %106 = arith.addf %81, %105 : vector<16x32xf32>
      %107 = arith.mulf %91, %106 : vector<16x32xf32>
      %108 = arith.extf %104 : vector<16x32xbf16> to vector<16x32xf32>
      %109 = arith.addf %108, %107 : vector<16x32xf32>
      %110 = math.tanh %109 : vector<16x32xf32>
      %cst_74 = arith.constant 1.000000e+00 : f32
      %111 = vector.broadcast %cst_74 : f32 to vector<16x32xf32>
      %112 = arith.subf %111, %101 : vector<16x32xf32>
      %113 = arith.mulf %112, %110 : vector<16x32xf32>
      %114 = arith.mulf %101, %36 : vector<16x32xf32>
      %115 = arith.addf %113, %114 : vector<16x32xf32>
      %116 = arith.truncf %115 : vector<16x32xf32> to vector<16x32xbf16>
      %117 = arith.index_cast %c0_i32 : i32 to index
      %c0_75 = arith.constant 0 : index
      %c0_76 = arith.constant 0 : index
      %118 = vector.load %alloca_29[%117, %c0_75, %c0_76] : memref<8x16x32xbf16, #tpu.memory_space<vmem>>, vector<1x16x32xbf16>
      %119 = vector.shape_cast %118 : vector<1x16x32xbf16> to vector<16x32xbf16>
      %120 = vector.shape_cast %116 : vector<16x32xbf16> to vector<1x16x32xbf16>
      tpu.vector_store %alloca_29[%117, %c0_75, %c0_76], %120 {strides = array<i32>} : memref<8x16x32xbf16, #tpu.memory_space<vmem>>, vector<1x16x32xbf16>,
      %c1_i32 = arith.constant 1 : i32
      %121 = arith.truncf %115 : vector<16x32xf32> to vector<16x32xbf16>
      %cst_77 = arith.constant dense<0.000000e+00> : vector<16x32xf32>
      %122 = tpu.matmul %121, %3, %cst_77 {dimension_numbers = #tpu.dot_dimension_numbers<[1], [0], [0], [1], [0, 0, 1, 1], [], []>} : vector<16x32xbf16>, vector<32x32xbf16>, vector<16x32xf32> -> vector<16x32xf32>
      %123 = arith.truncf %115 : vector<16x32xf32> to vector<16x32xbf16>
      %cst_78 = arith.constant dense<0.000000e+00> : vector<16x32xf32>
      %124 = tpu.matmul %123, %4, %cst_78 {dimension_numbers = #tpu.dot_dimension_numbers<[1], [0], [0], [1], [0, 0, 1, 1], [], []>} : vector<16x32xbf16>, vector<32x32xbf16>, vector<16x32xf32> -> vector<16x32xf32>
      %125 = arith.truncf %115 : vector<16x32xf32> to vector<16x32xbf16>
      %cst_79 = arith.constant dense<0.000000e+00> : vector<16x32xf32>
      %126 = tpu.matmul %125, %5, %cst_79 {dimension_numbers = #tpu.dot_dimension_numbers<[1], [0], [0], [1], [0, 0, 1, 1], [], []>} : vector<16x32xbf16>, vector<32x32xbf16>, vector<16x32xf32> -> vector<16x32xf32>
      %127 = arith.index_cast %c1_i32 : i32 to index
      %c0_80 = arith.constant 0 : index
      %c0_81 = arith.constant 0 : index
      %128 = vector.load %alloca[%127, %c0_80, %c0_81] : memref<8x16x32xbf16, #tpu.memory_space<vmem>>, vector<1x16x32xbf16>
      %129 = vector.shape_cast %128 : vector<1x16x32xbf16> to vector<16x32xbf16>
      %130 = arith.extf %129 : vector<16x32xbf16> to vector<16x32xf32>
      %131 = arith.addf %130, %122 : vector<16x32xf32>
      %132 = arith.negf %131 : vector<16x32xf32>
      %133 = math.exp %132 : vector<16x32xf32>
      %cst_82 = arith.constant 1.000000e+00 : f32
      %134 = vector.broadcast %cst_82 : f32 to vector<16x32xf32>
      %135 = arith.addf %134, %133 : vector<16x32xf32>
      %136 = arith.divf %134, %135 : vector<16x32xf32>
      %137 = arith.index_cast %c1_i32 : i32 to index
      %c0_83 = arith.constant 0 : index
      %c0_84 = arith.constant 0 : index
      %138 = vector.load %alloca_27[%137, %c0_83, %c0_84] : memref<8x16x32xbf16, #tpu.memory_space<vmem>>, vector<1x16x32xbf16>
      %139 = vector.shape_cast %138 : vector<1x16x32xbf16> to vector<16x32xbf16>
      %140 = arith.extf %139 : vector<16x32xbf16> to vector<16x32xf32>
      %141 = arith.addf %140, %124 : vector<16x32xf32>
      %142 = arith.negf %141 : vector<16x32xf32>
      %143 = math.exp %142 : vector<16x32xf32>
      %cst_85 = arith.constant 1.000000e+00 : f32
      %144 = vector.broadcast %cst_85 : f32 to vector<16x32xf32>
      %145 = arith.addf %144, %143 : vector<16x32xf32>
      %146 = arith.divf %144, %145 : vector<16x32xf32>
      %147 = arith.index_cast %c1_i32 : i32 to index
      %c0_86 = arith.constant 0 : index
      %c0_87 = arith.constant 0 : index
      %148 = vector.load %alloca_28[%147, %c0_86, %c0_87] : memref<8x16x32xbf16, #tpu.memory_space<vmem>>, vector<1x16x32xbf16>
      %149 = vector.shape_cast %148 : vector<1x16x32xbf16> to vector<16x32xbf16>
      %150 = vector.broadcast %75 : vector<1x32xf32> to vector<16x32xf32>
      %151 = arith.addf %126, %150 : vector<16x32xf32>
      %152 = arith.mulf %136, %151 : vector<16x32xf32>
      %153 = arith.extf %149 : vector<16x32xbf16> to vector<16x32xf32>
      %154 = arith.addf %153, %152 : vector<16x32xf32>
      %155 = math.tanh %154 : vector<16x32xf32>
      %cst_88 = arith.constant 1.000000e+00 : f32
      %156 = vector.broadcast %cst_88 : f32 to vector<16x32xf32>
      %157 = arith.subf %156, %146 : vector<16x32xf32>
      %158 = arith.mulf %157, %155 : vector<16x32xf32>
      %159 = arith.mulf %146, %115 : vector<16x32xf32>
      %160 = arith.addf %158, %159 : vector<16x32xf32>
      %161 = arith.truncf %160 : vector<16x32xf32> to vector<16x32xbf16>
      %162 = arith.index_cast %c1_i32 : i32 to index
      %c0_89 = arith.constant 0 : index
      %c0_90 = arith.constant 0 : index
      %163 = vector.load %alloca_29[%162, %c0_89, %c0_90] : memref<8x16x32xbf16, #tpu.memory_space<vmem>>, vector<1x16x32xbf16>
      %164 = vector.shape_cast %163 : vector<1x16x32xbf16> to vector<16x32xbf16>
      %165 = vector.shape_cast %161 : vector<16x32xbf16> to vector<1x16x32xbf16>
      tpu.vector_store %alloca_29[%162, %c0_89, %c0_90], %165 {strides = array<i32>} : memref<8x16x32xbf16, #tpu.memory_space<vmem>>, vector<1x16x32xbf16>,
      %c2_i32 = arith.constant 2 : i32
      %166 = arith.truncf %160 : vector<16x32xf32> to vector<16x32xbf16>
      %cst_91 = arith.constant dense<0.000000e+00> : vector<16x32xf32>
      %167 = tpu.matmul %166, %3, %cst_91 {dimension_numbers = #tpu.dot_dimension_numbers<[1], [0], [0], [1], [0, 0, 1, 1], [], []>} : vector<16x32xbf16>, vector<32x32xbf16>, vector<16x32xf32> -> vector<16x32xf32>
      %168 = arith.truncf %160 : vector<16x32xf32> to vector<16x32xbf16>
      %cst_92 = arith.constant dense<0.000000e+00> : vector<16x32xf32>
      %169 = tpu.matmul %168, %4, %cst_92 {dimension_numbers = #tpu.dot_dimension_numbers<[1], [0], [0], [1], [0, 0, 1, 1], [], []>} : vector<16x32xbf16>, vector<32x32xbf16>, vector<16x32xf32> -> vector<16x32xf32>
      %170 = arith.truncf %160 : vector<16x32xf32> to vector<16x32xbf16>
      %cst_93 = arith.constant dense<0.000000e+00> : vector<16x32xf32>
      %171 = tpu.matmul %170, %5, %cst_93 {dimension_numbers = #tpu.dot_dimension_numbers<[1], [0], [0], [1], [0, 0, 1, 1], [], []>} : vector<16x32xbf16>, vector<32x32xbf16>, vector<16x32xf32> -> vector<16x32xf32>
      %172 = arith.index_cast %c2_i32 : i32 to index
      %c0_94 = arith.constant 0 : index
      %c0_95 = arith.constant 0 : index
      %173 = vector.load %alloca[%172, %c0_94, %c0_95] : memref<8x16x32xbf16, #tpu.memory_space<vmem>>, vector<1x16x32xbf16>
      %174 = vector.shape_cast %173 : vector<1x16x32xbf16> to vector<16x32xbf16>
      %175 = arith.extf %174 : vector<16x32xbf16> to vector<16x32xf32>
      %176 = arith.addf %175, %167 : vector<16x32xf32>
      %177 = arith.negf %176 : vector<16x32xf32>
      %178 = math.exp %177 : vector<16x32xf32>
      %cst_96 = arith.constant 1.000000e+00 : f32
      %179 = vector.broadcast %cst_96 : f32 to vector<16x32xf32>
      %180 = arith.addf %179, %178 : vector<16x32xf32>
      %181 = arith.divf %179, %180 : vector<16x32xf32>
      %182 = arith.index_cast %c2_i32 : i32 to index
      %c0_97 = arith.constant 0 : index
      %c0_98 = arith.constant 0 : index
      %183 = vector.load %alloca_27[%182, %c0_97, %c0_98] : memref<8x16x32xbf16, #tpu.memory_space<vmem>>, vector<1x16x32xbf16>
      %184 = vector.shape_cast %183 : vector<1x16x32xbf16> to vector<16x32xbf16>
      %185 = arith.extf %184 : vector<16x32xbf16> to vector<16x32xf32>
      %186 = arith.addf %185, %169 : vector<16x32xf32>
      %187 = arith.negf %186 : vector<16x32xf32>
      %188 = math.exp %187 : vector<16x32xf32>
      %cst_99 = arith.constant 1.000000e+00 : f32
      %189 = vector.broadcast %cst_99 : f32 to vector<16x32xf32>
      %190 = arith.addf %189, %188 : vector<16x32xf32>
      %191 = arith.divf %189, %190 : vector<16x32xf32>
      %192 = arith.index_cast %c2_i32 : i32 to index
      %c0_100 = arith.constant 0 : index
      %c0_101 = arith.constant 0 : index
      %193 = vector.load %alloca_28[%192, %c0_100, %c0_101] : memref<8x16x32xbf16, #tpu.memory_space<vmem>>, vector<1x16x32xbf16>
      %194 = vector.shape_cast %193 : vector<1x16x32xbf16> to vector<16x32xbf16>
      %195 = vector.broadcast %75 : vector<1x32xf32> to vector<16x32xf32>
      %196 = arith.addf %171, %195 : vector<16x32xf32>
      %197 = arith.mulf %181, %196 : vector<16x32xf32>
      %198 = arith.extf %194 : vector<16x32xbf16> to vector<16x32xf32>
      %199 = arith.addf %198, %197 : vector<16x32xf32>
      %200 = math.tanh %199 : vector<16x32xf32>
      %cst_102 = arith.constant 1.000000e+00 : f32
      %201 = vector.broadcast %cst_102 : f32 to vector<16x32xf32>
      %202 = arith.subf %201, %191 : vector<16x32xf32>
      %203 = arith.mulf %202, %200 : vector<16x32xf32>
      %204 = arith.mulf %191, %160 : vector<16x32xf32>
      %205 = arith.addf %203, %204 : vector<16x32xf32>
      %206 = arith.truncf %205 : vector<16x32xf32> to vector<16x32xbf16>
      %207 = arith.index_cast %c2_i32 : i32 to index
      %c0_103 = arith.constant 0 : index
      %c0_104 = arith.constant 0 : index
      %208 = vector.load %alloca_29[%207, %c0_103, %c0_104] : memref<8x16x32xbf16, #tpu.memory_space<vmem>>, vector<1x16x32xbf16>
      %209 = vector.shape_cast %208 : vector<1x16x32xbf16> to vector<16x32xbf16>
      %210 = vector.shape_cast %206 : vector<16x32xbf16> to vector<1x16x32xbf16>
      tpu.vector_store %alloca_29[%207, %c0_103, %c0_104], %210 {strides = array<i32>} : memref<8x16x32xbf16, #tpu.memory_space<vmem>>, vector<1x16x32xbf16>,
      %c3_i32 = arith.constant 3 : i32
      %211 = arith.truncf %205 : vector<16x32xf32> to vector<16x32xbf16>
      %cst_105 = arith.constant dense<0.000000e+00> : vector<16x32xf32>
      %212 = tpu.matmul %211, %3, %cst_105 {dimension_numbers = #tpu.dot_dimension_numbers<[1], [0], [0], [1], [0, 0, 1, 1], [], []>} : vector<16x32xbf16>, vector<32x32xbf16>, vector<16x32xf32> -> vector<16x32xf32>
      %213 = arith.truncf %205 : vector<16x32xf32> to vector<16x32xbf16>
      %cst_106 = arith.constant dense<0.000000e+00> : vector<16x32xf32>
      %214 = tpu.matmul %213, %4, %cst_106 {dimension_numbers = #tpu.dot_dimension_numbers<[1], [0], [0], [1], [0, 0, 1, 1], [], []>} : vector<16x32xbf16>, vector<32x32xbf16>, vector<16x32xf32> -> vector<16x32xf32>
      %215 = arith.truncf %205 : vector<16x32xf32> to vector<16x32xbf16>
      %cst_107 = arith.constant dense<0.000000e+00> : vector<16x32xf32>
      %216 = tpu.matmul %215, %5, %cst_107 {dimension_numbers = #tpu.dot_dimension_numbers<[1], [0], [0], [1], [0, 0, 1, 1], [], []>} : vector<16x32xbf16>, vector<32x32xbf16>, vector<16x32xf32> -> vector<16x32xf32>
      %217 = arith.index_cast %c3_i32 : i32 to index
      %c0_108 = arith.constant 0 : index
      %c0_109 = arith.constant 0 : index
      %218 = vector.load %alloca[%217, %c0_108, %c0_109] : memref<8x16x32xbf16, #tpu.memory_space<vmem>>, vector<1x16x32xbf16>
      %219 = vector.shape_cast %218 : vector<1x16x32xbf16> to vector<16x32xbf16>
      %220 = arith.extf %219 : vector<16x32xbf16> to vector<16x32xf32>
      %221 = arith.addf %220, %212 : vector<16x32xf32>
      %222 = arith.negf %221 : vector<16x32xf32>
      %223 = math.exp %222 : vector<16x32xf32>
      %cst_110 = arith.constant 1.000000e+00 : f32
      %224 = vector.broadcast %cst_110 : f32 to vector<16x32xf32>
      %225 = arith.addf %224, %223 : vector<16x32xf32>
      %226 = arith.divf %224, %225 : vector<16x32xf32>
      %227 = arith.index_cast %c3_i32 : i32 to index
      %c0_111 = arith.constant 0 : index
      %c0_112 = arith.constant 0 : index
      %228 = vector.load %alloca_27[%227, %c0_111, %c0_112] : memref<8x16x32xbf16, #tpu.memory_space<vmem>>, vector<1x16x32xbf16>
      %229 = vector.shape_cast %228 : vector<1x16x32xbf16> to vector<16x32xbf16>
      %230 = arith.extf %229 : vector<16x32xbf16> to vector<16x32xf32>
      %231 = arith.addf %230, %214 : vector<16x32xf32>
      %232 = arith.negf %231 : vector<16x32xf32>
      %233 = math.exp %232 : vector<16x32xf32>
      %cst_113 = arith.constant 1.000000e+00 : f32
      %234 = vector.broadcast %cst_113 : f32 to vector<16x32xf32>
      %235 = arith.addf %234, %233 : vector<16x32xf32>
      %236 = arith.divf %234, %235 : vector<16x32xf32>
      %237 = arith.index_cast %c3_i32 : i32 to index
      %c0_114 = arith.constant 0 : index
      %c0_115 = arith.constant 0 : index
      %238 = vector.load %alloca_28[%237, %c0_114, %c0_115] : memref<8x16x32xbf16, #tpu.memory_space<vmem>>, vector<1x16x32xbf16>
      %239 = vector.shape_cast %238 : vector<1x16x32xbf16> to vector<16x32xbf16>
      %240 = vector.broadcast %75 : vector<1x32xf32> to vector<16x32xf32>
      %241 = arith.addf %216, %240 : vector<16x32xf32>
      %242 = arith.mulf %226, %241 : vector<16x32xf32>
      %243 = arith.extf %239 : vector<16x32xbf16> to vector<16x32xf32>
      %244 = arith.addf %243, %242 : vector<16x32xf32>
      %245 = math.tanh %244 : vector<16x32xf32>
      %cst_116 = arith.constant 1.000000e+00 : f32
      %246 = vector.broadcast %cst_116 : f32 to vector<16x32xf32>
      %247 = arith.subf %246, %236 : vector<16x32xf32>
      %248 = arith.mulf %247, %245 : vector<16x32xf32>
      %249 = arith.mulf %236, %205 : vector<16x32xf32>
      %250 = arith.addf %248, %249 : vector<16x32xf32>
      %251 = arith.truncf %250 : vector<16x32xf32> to vector<16x32xbf16>
      %252 = arith.index_cast %c3_i32 : i32 to index
      %c0_117 = arith.constant 0 : index
      %c0_118 = arith.constant 0 : index
      %253 = vector.load %alloca_29[%252, %c0_117, %c0_118] : memref<8x16x32xbf16, #tpu.memory_space<vmem>>, vector<1x16x32xbf16>
      %254 = vector.shape_cast %253 : vector<1x16x32xbf16> to vector<16x32xbf16>
      %255 = vector.shape_cast %251 : vector<16x32xbf16> to vector<1x16x32xbf16>
      tpu.vector_store %alloca_29[%252, %c0_117, %c0_118], %255 {strides = array<i32>} : memref<8x16x32xbf16, #tpu.memory_space<vmem>>, vector<1x16x32xbf16>,
      %c4_i32 = arith.constant 4 : i32
      %256 = arith.truncf %250 : vector<16x32xf32> to vector<16x32xbf16>
      %cst_119 = arith.constant dense<0.000000e+00> : vector<16x32xf32>
      %257 = tpu.matmul %256, %3, %cst_119 {dimension_numbers = #tpu.dot_dimension_numbers<[1], [0], [0], [1], [0, 0, 1, 1], [], []>} : vector<16x32xbf16>, vector<32x32xbf16>, vector<16x32xf32> -> vector<16x32xf32>
      %258 = arith.truncf %250 : vector<16x32xf32> to vector<16x32xbf16>
      %cst_120 = arith.constant dense<0.000000e+00> : vector<16x32xf32>
      %259 = tpu.matmul %258, %4, %cst_120 {dimension_numbers = #tpu.dot_dimension_numbers<[1], [0], [0], [1], [0, 0, 1, 1], [], []>} : vector<16x32xbf16>, vector<32x32xbf16>, vector<16x32xf32> -> vector<16x32xf32>
      %260 = arith.truncf %250 : vector<16x32xf32> to vector<16x32xbf16>
      %cst_121 = arith.constant dense<0.000000e+00> : vector<16x32xf32>
      %261 = tpu.matmul %260, %5, %cst_121 {dimension_numbers = #tpu.dot_dimension_numbers<[1], [0], [0], [1], [0, 0, 1, 1], [], []>} : vector<16x32xbf16>, vector<32x32xbf16>, vector<16x32xf32> -> vector<16x32xf32>
      %262 = arith.index_cast %c4_i32 : i32 to index
      %c0_122 = arith.constant 0 : index
      %c0_123 = arith.constant 0 : index
      %263 = vector.load %alloca[%262, %c0_122, %c0_123] : memref<8x16x32xbf16, #tpu.memory_space<vmem>>, vector<1x16x32xbf16>
      %264 = vector.shape_cast %263 : vector<1x16x32xbf16> to vector<16x32xbf16>
      %265 = arith.extf %264 : vector<16x32xbf16> to vector<16x32xf32>
      %266 = arith.addf %265, %257 : vector<16x32xf32>
      %267 = arith.negf %266 : vector<16x32xf32>
      %268 = math.exp %267 : vector<16x32xf32>
      %cst_124 = arith.constant 1.000000e+00 : f32
      %269 = vector.broadcast %cst_124 : f32 to vector<16x32xf32>
      %270 = arith.addf %269, %268 : vector<16x32xf32>
      %271 = arith.divf %269, %270 : vector<16x32xf32>
      %272 = arith.index_cast %c4_i32 : i32 to index
      %c0_125 = arith.constant 0 : index
      %c0_126 = arith.constant 0 : index
      %273 = vector.load %alloca_27[%272, %c0_125, %c0_126] : memref<8x16x32xbf16, #tpu.memory_space<vmem>>, vector<1x16x32xbf16>
      %274 = vector.shape_cast %273 : vector<1x16x32xbf16> to vector<16x32xbf16>
      %275 = arith.extf %274 : vector<16x32xbf16> to vector<16x32xf32>
      %276 = arith.addf %275, %259 : vector<16x32xf32>
      %277 = arith.negf %276 : vector<16x32xf32>
      %278 = math.exp %277 : vector<16x32xf32>
      %cst_127 = arith.constant 1.000000e+00 : f32
      %279 = vector.broadcast %cst_127 : f32 to vector<16x32xf32>
      %280 = arith.addf %279, %278 : vector<16x32xf32>
      %281 = arith.divf %279, %280 : vector<16x32xf32>
      %282 = arith.index_cast %c4_i32 : i32 to index
      %c0_128 = arith.constant 0 : index
      %c0_129 = arith.constant 0 : index
      %283 = vector.load %alloca_28[%282, %c0_128, %c0_129] : memref<8x16x32xbf16, #tpu.memory_space<vmem>>, vector<1x16x32xbf16>
      %284 = vector.shape_cast %283 : vector<1x16x32xbf16> to vector<16x32xbf16>
      %285 = vector.broadcast %75 : vector<1x32xf32> to vector<16x32xf32>
      %286 = arith.addf %261, %285 : vector<16x32xf32>
      %287 = arith.mulf %271, %286 : vector<16x32xf32>
      %288 = arith.extf %284 : vector<16x32xbf16> to vector<16x32xf32>
      %289 = arith.addf %288, %287 : vector<16x32xf32>
      %290 = math.tanh %289 : vector<16x32xf32>
      %cst_130 = arith.constant 1.000000e+00 : f32
      %291 = vector.broadcast %cst_130 : f32 to vector<16x32xf32>
      %292 = arith.subf %291, %281 : vector<16x32xf32>
      %293 = arith.mulf %292, %290 : vector<16x32xf32>
      %294 = arith.mulf %281, %250 : vector<16x32xf32>
      %295 = arith.addf %293, %294 : vector<16x32xf32>
      %296 = arith.truncf %295 : vector<16x32xf32> to vector<16x32xbf16>
      %297 = arith.index_cast %c4_i32 : i32 to index
      %c0_131 = arith.constant 0 : index
      %c0_132 = arith.constant 0 : index
      %298 = vector.load %alloca_29[%297, %c0_131, %c0_132] : memref<8x16x32xbf16, #tpu.memory_space<vmem>>, vector<1x16x32xbf16>
      %299 = vector.shape_cast %298 : vector<1x16x32xbf16> to vector<16x32xbf16>
      %300 = vector.shape_cast %296 : vector<16x32xbf16> to vector<1x16x32xbf16>
      tpu.vector_store %alloca_29[%297, %c0_131, %c0_132], %300 {strides = array<i32>} : memref<8x16x32xbf16, #tpu.memory_space<vmem>>, vector<1x16x32xbf16>,
      %c5_i32 = arith.constant 5 : i32
      %301 = arith.truncf %295 : vector<16x32xf32> to vector<16x32xbf16>
      %cst_133 = arith.constant dense<0.000000e+00> : vector<16x32xf32>
      %302 = tpu.matmul %301, %3, %cst_133 {dimension_numbers = #tpu.dot_dimension_numbers<[1], [0], [0], [1], [0, 0, 1, 1], [], []>} : vector<16x32xbf16>, vector<32x32xbf16>, vector<16x32xf32> -> vector<16x32xf32>
      %303 = arith.truncf %295 : vector<16x32xf32> to vector<16x32xbf16>
      %cst_134 = arith.constant dense<0.000000e+00> : vector<16x32xf32>
      %304 = tpu.matmul %303, %4, %cst_134 {dimension_numbers = #tpu.dot_dimension_numbers<[1], [0], [0], [1], [0, 0, 1, 1], [], []>} : vector<16x32xbf16>, vector<32x32xbf16>, vector<16x32xf32> -> vector<16x32xf32>
      %305 = arith.truncf %295 : vector<16x32xf32> to vector<16x32xbf16>
      %cst_135 = arith.constant dense<0.000000e+00> : vector<16x32xf32>
      %306 = tpu.matmul %305, %5, %cst_135 {dimension_numbers = #tpu.dot_dimension_numbers<[1], [0], [0], [1], [0, 0, 1, 1], [], []>} : vector<16x32xbf16>, vector<32x32xbf16>, vector<16x32xf32> -> vector<16x32xf32>
      %307 = arith.index_cast %c5_i32 : i32 to index
      %c0_136 = arith.constant 0 : index
      %c0_137 = arith.constant 0 : index
      %308 = vector.load %alloca[%307, %c0_136, %c0_137] : memref<8x16x32xbf16, #tpu.memory_space<vmem>>, vector<1x16x32xbf16>
      %309 = vector.shape_cast %308 : vector<1x16x32xbf16> to vector<16x32xbf16>
      %310 = arith.extf %309 : vector<16x32xbf16> to vector<16x32xf32>
      %311 = arith.addf %310, %302 : vector<16x32xf32>
      %312 = arith.negf %311 : vector<16x32xf32>
      %313 = math.exp %312 : vector<16x32xf32>
      %cst_138 = arith.constant 1.000000e+00 : f32
      %314 = vector.broadcast %cst_138 : f32 to vector<16x32xf32>
      %315 = arith.addf %314, %313 : vector<16x32xf32>
      %316 = arith.divf %314, %315 : vector<16x32xf32>
      %317 = arith.index_cast %c5_i32 : i32 to index
      %c0_139 = arith.constant 0 : index
      %c0_140 = arith.constant 0 : index
      %318 = vector.load %alloca_27[%317, %c0_139, %c0_140] : memref<8x16x32xbf16, #tpu.memory_space<vmem>>, vector<1x16x32xbf16>
      %319 = vector.shape_cast %318 : vector<1x16x32xbf16> to vector<16x32xbf16>
      %320 = arith.extf %319 : vector<16x32xbf16> to vector<16x32xf32>
      %321 = arith.addf %320, %304 : vector<16x32xf32>
      %322 = arith.negf %321 : vector<16x32xf32>
      %323 = math.exp %322 : vector<16x32xf32>
      %cst_141 = arith.constant 1.000000e+00 : f32
      %324 = vector.broadcast %cst_141 : f32 to vector<16x32xf32>
      %325 = arith.addf %324, %323 : vector<16x32xf32>
      %326 = arith.divf %324, %325 : vector<16x32xf32>
      %327 = arith.index_cast %c5_i32 : i32 to index
      %c0_142 = arith.constant 0 : index
      %c0_143 = arith.constant 0 : index
      %328 = vector.load %alloca_28[%327, %c0_142, %c0_143] : memref<8x16x32xbf16, #tpu.memory_space<vmem>>, vector<1x16x32xbf16>
      %329 = vector.shape_cast %328 : vector<1x16x32xbf16> to vector<16x32xbf16>
      %330 = vector.broadcast %75 : vector<1x32xf32> to vector<16x32xf32>
      %331 = arith.addf %306, %330 : vector<16x32xf32>
      %332 = arith.mulf %316, %331 : vector<16x32xf32>
      %333 = arith.extf %329 : vector<16x32xbf16> to vector<16x32xf32>
      %334 = arith.addf %333, %332 : vector<16x32xf32>
      %335 = math.tanh %334 : vector<16x32xf32>
      %cst_144 = arith.constant 1.000000e+00 : f32
      %336 = vector.broadcast %cst_144 : f32 to vector<16x32xf32>
      %337 = arith.subf %336, %326 : vector<16x32xf32>
      %338 = arith.mulf %337, %335 : vector<16x32xf32>
      %339 = arith.mulf %326, %295 : vector<16x32xf32>
      %340 = arith.addf %338, %339 : vector<16x32xf32>
      %341 = arith.truncf %340 : vector<16x32xf32> to vector<16x32xbf16>
      %342 = arith.index_cast %c5_i32 : i32 to index
      %c0_145 = arith.constant 0 : index
      %c0_146 = arith.constant 0 : index
      %343 = vector.load %alloca_29[%342, %c0_145, %c0_146] : memref<8x16x32xbf16, #tpu.memory_space<vmem>>, vector<1x16x32xbf16>
      %344 = vector.shape_cast %343 : vector<1x16x32xbf16> to vector<16x32xbf16>
      %345 = vector.shape_cast %341 : vector<16x32xbf16> to vector<1x16x32xbf16>
      tpu.vector_store %alloca_29[%342, %c0_145, %c0_146], %345 {strides = array<i32>} : memref<8x16x32xbf16, #tpu.memory_space<vmem>>, vector<1x16x32xbf16>,
      %c6_i32 = arith.constant 6 : i32
      %346 = arith.truncf %340 : vector<16x32xf32> to vector<16x32xbf16>
      %cst_147 = arith.constant dense<0.000000e+00> : vector<16x32xf32>
      %347 = tpu.matmul %346, %3, %cst_147 {dimension_numbers = #tpu.dot_dimension_numbers<[1], [0], [0], [1], [0, 0, 1, 1], [], []>} : vector<16x32xbf16>, vector<32x32xbf16>, vector<16x32xf32> -> vector<16x32xf32>
      %348 = arith.truncf %340 : vector<16x32xf32> to vector<16x32xbf16>
      %cst_148 = arith.constant dense<0.000000e+00> : vector<16x32xf32>
      %349 = tpu.matmul %348, %4, %cst_148 {dimension_numbers = #tpu.dot_dimension_numbers<[1], [0], [0], [1], [0, 0, 1, 1], [], []>} : vector<16x32xbf16>, vector<32x32xbf16>, vector<16x32xf32> -> vector<16x32xf32>
      %350 = arith.truncf %340 : vector<16x32xf32> to vector<16x32xbf16>
      %cst_149 = arith.constant dense<0.000000e+00> : vector<16x32xf32>
      %351 = tpu.matmul %350, %5, %cst_149 {dimension_numbers = #tpu.dot_dimension_numbers<[1], [0], [0], [1], [0, 0, 1, 1], [], []>} : vector<16x32xbf16>, vector<32x32xbf16>, vector<16x32xf32> -> vector<16x32xf32>
      %352 = arith.index_cast %c6_i32 : i32 to index
      %c0_150 = arith.constant 0 : index
      %c0_151 = arith.constant 0 : index
      %353 = vector.load %alloca[%352, %c0_150, %c0_151] : memref<8x16x32xbf16, #tpu.memory_space<vmem>>, vector<1x16x32xbf16>
      %354 = vector.shape_cast %353 : vector<1x16x32xbf16> to vector<16x32xbf16>
      %355 = arith.extf %354 : vector<16x32xbf16> to vector<16x32xf32>
      %356 = arith.addf %355, %347 : vector<16x32xf32>
      %357 = arith.negf %356 : vector<16x32xf32>
      %358 = math.exp %357 : vector<16x32xf32>
      %cst_152 = arith.constant 1.000000e+00 : f32
      %359 = vector.broadcast %cst_152 : f32 to vector<16x32xf32>
      %360 = arith.addf %359, %358 : vector<16x32xf32>
      %361 = arith.divf %359, %360 : vector<16x32xf32>
      %362 = arith.index_cast %c6_i32 : i32 to index
      %c0_153 = arith.constant 0 : index
      %c0_154 = arith.constant 0 : index
      %363 = vector.load %alloca_27[%362, %c0_153, %c0_154] : memref<8x16x32xbf16, #tpu.memory_space<vmem>>, vector<1x16x32xbf16>
      %364 = vector.shape_cast %363 : vector<1x16x32xbf16> to vector<16x32xbf16>
      %365 = arith.extf %364 : vector<16x32xbf16> to vector<16x32xf32>
      %366 = arith.addf %365, %349 : vector<16x32xf32>
      %367 = arith.negf %366 : vector<16x32xf32>
      %368 = math.exp %367 : vector<16x32xf32>
      %cst_155 = arith.constant 1.000000e+00 : f32
      %369 = vector.broadcast %cst_155 : f32 to vector<16x32xf32>
      %370 = arith.addf %369, %368 : vector<16x32xf32>
      %371 = arith.divf %369, %370 : vector<16x32xf32>
      %372 = arith.index_cast %c6_i32 : i32 to index
      %c0_156 = arith.constant 0 : index
      %c0_157 = arith.constant 0 : index
      %373 = vector.load %alloca_28[%372, %c0_156, %c0_157] : memref<8x16x32xbf16, #tpu.memory_space<vmem>>, vector<1x16x32xbf16>
      %374 = vector.shape_cast %373 : vector<1x16x32xbf16> to vector<16x32xbf16>
      %375 = vector.broadcast %75 : vector<1x32xf32> to vector<16x32xf32>
      %376 = arith.addf %351, %375 : vector<16x32xf32>
      %377 = arith.mulf %361, %376 : vector<16x32xf32>
      %378 = arith.extf %374 : vector<16x32xbf16> to vector<16x32xf32>
      %379 = arith.addf %378, %377 : vector<16x32xf32>
      %380 = math.tanh %379 : vector<16x32xf32>
      %cst_158 = arith.constant 1.000000e+00 : f32
      %381 = vector.broadcast %cst_158 : f32 to vector<16x32xf32>
      %382 = arith.subf %381, %371 : vector<16x32xf32>
      %383 = arith.mulf %382, %380 : vector<16x32xf32>
      %384 = arith.mulf %371, %340 : vector<16x32xf32>
      %385 = arith.addf %383, %384 : vector<16x32xf32>
      %386 = arith.truncf %385 : vector<16x32xf32> to vector<16x32xbf16>
      %387 = arith.index_cast %c6_i32 : i32 to index
      %c0_159 = arith.constant 0 : index
      %c0_160 = arith.constant 0 : index
      %388 = vector.load %alloca_29[%387, %c0_159, %c0_160] : memref<8x16x32xbf16, #tpu.memory_space<vmem>>, vector<1x16x32xbf16>
      %389 = vector.shape_cast %388 : vector<1x16x32xbf16> to vector<16x32xbf16>
      %390 = vector.shape_cast %386 : vector<16x32xbf16> to vector<1x16x32xbf16>
      tpu.vector_store %alloca_29[%387, %c0_159, %c0_160], %390 {strides = array<i32>} : memref<8x16x32xbf16, #tpu.memory_space<vmem>>, vector<1x16x32xbf16>,
      %c7_i32 = arith.constant 7 : i32
      %391 = arith.truncf %385 : vector<16x32xf32> to vector<16x32xbf16>
      %cst_161 = arith.constant dense<0.000000e+00> : vector<16x32xf32>
      %392 = tpu.matmul %391, %3, %cst_161 {dimension_numbers = #tpu.dot_dimension_numbers<[1], [0], [0], [1], [0, 0, 1, 1], [], []>} : vector<16x32xbf16>, vector<32x32xbf16>, vector<16x32xf32> -> vector<16x32xf32>
      %393 = arith.truncf %385 : vector<16x32xf32> to vector<16x32xbf16>
      %cst_162 = arith.constant dense<0.000000e+00> : vector<16x32xf32>
      %394 = tpu.matmul %393, %4, %cst_162 {dimension_numbers = #tpu.dot_dimension_numbers<[1], [0], [0], [1], [0, 0, 1, 1], [], []>} : vector<16x32xbf16>, vector<32x32xbf16>, vector<16x32xf32> -> vector<16x32xf32>
      %395 = arith.truncf %385 : vector<16x32xf32> to vector<16x32xbf16>
      %cst_163 = arith.constant dense<0.000000e+00> : vector<16x32xf32>
      %396 = tpu.matmul %395, %5, %cst_163 {dimension_numbers = #tpu.dot_dimension_numbers<[1], [0], [0], [1], [0, 0, 1, 1], [], []>} : vector<16x32xbf16>, vector<32x32xbf16>, vector<16x32xf32> -> vector<16x32xf32>
      %397 = arith.index_cast %c7_i32 : i32 to index
      %c0_164 = arith.constant 0 : index
      %c0_165 = arith.constant 0 : index
      %398 = vector.load %alloca[%397, %c0_164, %c0_165] : memref<8x16x32xbf16, #tpu.memory_space<vmem>>, vector<1x16x32xbf16>
      %399 = vector.shape_cast %398 : vector<1x16x32xbf16> to vector<16x32xbf16>
      %400 = arith.extf %399 : vector<16x32xbf16> to vector<16x32xf32>
      %401 = arith.addf %400, %392 : vector<16x32xf32>
      %402 = arith.negf %401 : vector<16x32xf32>
      %403 = math.exp %402 : vector<16x32xf32>
      %cst_166 = arith.constant 1.000000e+00 : f32
      %404 = vector.broadcast %cst_166 : f32 to vector<16x32xf32>
      %405 = arith.addf %404, %403 : vector<16x32xf32>
      %406 = arith.divf %404, %405 : vector<16x32xf32>
      %407 = arith.index_cast %c7_i32 : i32 to index
      %c0_167 = arith.constant 0 : index
      %c0_168 = arith.constant 0 : index
      %408 = vector.load %alloca_27[%407, %c0_167, %c0_168] : memref<8x16x32xbf16, #tpu.memory_space<vmem>>, vector<1x16x32xbf16>
      %409 = vector.shape_cast %408 : vector<1x16x32xbf16> to vector<16x32xbf16>
      %410 = arith.extf %409 : vector<16x32xbf16> to vector<16x32xf32>
      %411 = arith.addf %410, %394 : vector<16x32xf32>
      %412 = arith.negf %411 : vector<16x32xf32>
      %413 = math.exp %412 : vector<16x32xf32>
      %cst_169 = arith.constant 1.000000e+00 : f32
      %414 = vector.broadcast %cst_169 : f32 to vector<16x32xf32>
      %415 = arith.addf %414, %413 : vector<16x32xf32>
      %416 = arith.divf %414, %415 : vector<16x32xf32>
      %417 = arith.index_cast %c7_i32 : i32 to index
      %c0_170 = arith.constant 0 : index
      %c0_171 = arith.constant 0 : index
      %418 = vector.load %alloca_28[%417, %c0_170, %c0_171] : memref<8x16x32xbf16, #tpu.memory_space<vmem>>, vector<1x16x32xbf16>
      %419 = vector.shape_cast %418 : vector<1x16x32xbf16> to vector<16x32xbf16>
      %420 = vector.broadcast %75 : vector<1x32xf32> to vector<16x32xf32>
      %421 = arith.addf %396, %420 : vector<16x32xf32>
      %422 = arith.mulf %406, %421 : vector<16x32xf32>
      %423 = arith.extf %419 : vector<16x32xbf16> to vector<16x32xf32>
      %424 = arith.addf %423, %422 : vector<16x32xf32>
      %425 = math.tanh %424 : vector<16x32xf32>
      %cst_172 = arith.constant 1.000000e+00 : f32
      %426 = vector.broadcast %cst_172 : f32 to vector<16x32xf32>
      %427 = arith.subf %426, %416 : vector<16x32xf32>
      %428 = arith.mulf %427, %425 : vector<16x32xf32>
      %429 = arith.mulf %416, %385 : vector<16x32xf32>
      %430 = arith.addf %428, %429 : vector<16x32xf32>
      %431 = arith.truncf %430 : vector<16x32xf32> to vector<16x32xbf16>
      %432 = arith.index_cast %c7_i32 : i32 to index
      %c0_173 = arith.constant 0 : index
      %c0_174 = arith.constant 0 : index
      %433 = vector.load %alloca_29[%432, %c0_173, %c0_174] : memref<8x16x32xbf16, #tpu.memory_space<vmem>>, vector<1x16x32xbf16>
      %434 = vector.shape_cast %433 : vector<1x16x32xbf16> to vector<16x32xbf16>
      %435 = vector.shape_cast %431 : vector<16x32xbf16> to vector<1x16x32xbf16>
      tpu.vector_store %alloca_29[%432, %c0_173, %c0_174], %435 {strides = array<i32>} : memref<8x16x32xbf16, #tpu.memory_space<vmem>>, vector<1x16x32xbf16>,
      %c8_i32 = arith.constant 8 : i32
      %c0_175 = arith.constant 0 : index
      %c0_176 = arith.constant 0 : index
      %c0_177 = arith.constant 0 : index
      %436 = vector.load %alloca_29[%c0_175, %c0_176, %c0_177] : memref<8x16x32xbf16, #tpu.memory_space<vmem>>, vector<8x16x32xbf16>
      %437 = vector.shape_cast %436 : vector<8x16x32xbf16> to vector<128x32xbf16>
      %c0_178 = arith.constant 0 : index
      %c0_179 = arith.constant 0 : index
      %438 = vector.load %arg22[%c0_178, %c0_179] : memref<32x128xbf16, #tpu.memory_space<vmem>>, vector<32x128xbf16>
      %cst_180 = arith.constant dense<0.000000e+00> : vector<128x128xf32>
      %439 = tpu.matmul %437, %438, %cst_180 {dimension_numbers = #tpu.dot_dimension_numbers<[1], [0], [0], [1], [0, 0, 1, 1], [], []>} : vector<128x32xbf16>, vector<32x128xbf16>, vector<128x128xf32> -> vector<128x128xf32>
      %c0_181 = arith.constant 0 : index
      %c0_182 = arith.constant 0 : index
      %440 = vector.load %arg23[%c0_181, %c0_182] : memref<1x128xf32, #tpu.memory_space<vmem>>, vector<1x128xf32>
      %441 = vector.broadcast %440 : vector<1x128xf32> to vector<128x128xf32>
      %442 = arith.addf %439, %441 : vector<128x128xf32>
      %cst_183 = arith.constant dense<0xFF800000> : vector<128xf32>
      %443 = vector.multi_reduction <maximumf>, %442, %cst_183 [1] : vector<128x128xf32> to vector<128xf32>
      %444 = vector.shape_cast %443 : vector<128xf32> to vector<128x1xf32>
      %445 = vector.broadcast %444 : vector<128x1xf32> to vector<128x128xf32>
      %446 = arith.subf %442, %445 : vector<128x128xf32>
      %447 = math.exp %446 : vector<128x128xf32>
      %cst_184 = arith.constant dense<0.000000e+00> : vector<128xf32>
      %448 = vector.multi_reduction <add>, %447, %cst_184 [1] : vector<128x128xf32> to vector<128xf32>
      %449 = vector.shape_cast %448 : vector<128xf32> to vector<128x1xf32>
      %450 = math.log %449 : vector<128x1xf32>
      %451 = arith.addf %444, %450 : vector<128x1xf32>
      %452 = vector.broadcast %451 : vector<128x1xf32> to vector<128x128xf32>
      %453 = arith.subf %442, %452 : vector<128x128xf32>
      %454 = vector.shape_cast %453 : vector<128x128xf32> to vector<8x16x128xf32>
      %c0_185 = arith.constant 0 : index
      %c0_186 = arith.constant 0 : index
      %c0_187 = arith.constant 0 : index
      %455 = vector.load %arg25[%c0_185, %c0_186, %c0_187] : memref<8x16x128xf32, #tpu.memory_space<vmem>>, vector<8x16x128xf32>
      tpu.vector_store %arg25[%c0_185, %c0_186, %c0_187], %454 {strides = array<i32>} : memref<8x16x128xf32, #tpu.memory_space<vmem>>, vector<8x16x128xf32>,
      tpu.yield
    }) : () -> ()
    return
  }
  func.func @transform_0(%arg0: i32) -> (i32, i32, i32) {
    %c0_i32 = arith.constant 0 : i32
    %c0_i32_0 = arith.constant 0 : i32
    %c0_i32_1 = arith.constant 0 : i32
    return %c0_i32, %arg0, %c0_i32_0 : i32, i32, i32
  }
  func.func @transform_1(%arg0: i32) -> (i32, i32, i32) {
    %c0_i32 = arith.constant 0 : i32
    %c0_i32_0 = arith.constant 0 : i32
    %c0_i32_1 = arith.constant 0 : i32
    return %c0_i32, %arg0, %c0_i32_0 : i32, i32, i32
  }
  func.func @transform_2(%arg0: i32) -> (i32, i32) {
    %c0_i32 = arith.constant 0 : i32
    %c0_i32_0 = arith.constant 0 : i32
    return %arg0, %c0_i32 : i32, i32
  }
  func.func @transform_3(%arg0: i32) -> (i32, i32) {
    %c0_i32 = arith.constant 0 : i32
    %c0_i32_0 = arith.constant 0 : i32
    return %arg0, %c0_i32 : i32, i32
  }
  func.func @transform_4(%arg0: i32) -> (i32, i32) {
    %c0_i32 = arith.constant 0 : i32
    %c0_i32_0 = arith.constant 0 : i32
    %c0_i32_1 = arith.constant 0 : i32
    return %c0_i32, %c0_i32_0 : i32, i32
  }
  func.func @transform_5(%arg0: i32) -> (i32, i32) {
    %c0_i32 = arith.constant 0 : i32
    %c0_i32_0 = arith.constant 0 : i32
    %c0_i32_1 = arith.constant 0 : i32
    return %c0_i32, %c0_i32_0 : i32, i32
  }
  func.func @transform_6(%arg0: i32) -> (i32, i32) {
    %c0_i32 = arith.constant 0 : i32
    %c0_i32_0 = arith.constant 0 : i32
    %c0_i32_1 = arith.constant 0 : i32
    return %c0_i32, %c0_i32_0 : i32, i32
  }
  func.func @transform_7(%arg0: i32) -> (i32, i32) {
    %c0_i32 = arith.constant 0 : i32
    %c0_i32_0 = arith.constant 0 : i32
    %c0_i32_1 = arith.constant 0 : i32
    return %c0_i32, %c0_i32_0 : i32, i32
  }
  func.func @transform_8(%arg0: i32) -> (i32, i32) {
    %c0_i32 = arith.constant 0 : i32
    %c0_i32_0 = arith.constant 0 : i32
    %c0_i32_1 = arith.constant 0 : i32
    return %c0_i32, %c0_i32_0 : i32, i32
  }
  func.func @transform_9(%arg0: i32) -> (i32, i32) {
    %c0_i32 = arith.constant 0 : i32
    %c0_i32_0 = arith.constant 0 : i32
    %c0_i32_1 = arith.constant 0 : i32
    return %c0_i32, %c0_i32_0 : i32, i32
  }
  func.func @transform_10(%arg0: i32) -> (i32, i32) {
    %c0_i32 = arith.constant 0 : i32
    %c0_i32_0 = arith.constant 0 : i32
    %c0_i32_1 = arith.constant 0 : i32
    return %c0_i32, %c0_i32_0 : i32, i32
  }
  func.func @transform_11(%arg0: i32) -> (i32, i32) {
    %c0_i32 = arith.constant 0 : i32
    %c0_i32_0 = arith.constant 0 : i32
    %c0_i32_1 = arith.constant 0 : i32
    return %c0_i32, %c0_i32_0 : i32, i32
  }
  func.func @transform_12(%arg0: i32) -> (i32, i32) {
    %c0_i32 = arith.constant 0 : i32
    %c0_i32_0 = arith.constant 0 : i32
    %c0_i32_1 = arith.constant 0 : i32
    return %c0_i32, %c0_i32_0 : i32, i32
  }
  func.func @transform_13(%arg0: i32) -> (i32, i32) {
    %c0_i32 = arith.constant 0 : i32
    %c0_i32_0 = arith.constant 0 : i32
    %c0_i32_1 = arith.constant 0 : i32
    return %c0_i32, %c0_i32_0 : i32, i32
  }
  func.func @transform_14(%arg0: i32) -> (i32, i32) {
    %c0_i32 = arith.constant 0 : i32
    %c0_i32_0 = arith.constant 0 : i32
    %c0_i32_1 = arith.constant 0 : i32
    return %c0_i32, %c0_i32_0 : i32, i32
  }
  func.func @transform_15(%arg0: i32) -> (i32, i32) {
    %c0_i32 = arith.constant 0 : i32
    %c0_i32_0 = arith.constant 0 : i32
    %c0_i32_1 = arith.constant 0 : i32
    return %c0_i32, %c0_i32_0 : i32, i32
  }
  func.func @transform_16(%arg0: i32) -> (i32, i32) {
    %c0_i32 = arith.constant 0 : i32
    %c0_i32_0 = arith.constant 0 : i32
    %c0_i32_1 = arith.constant 0 : i32
    return %c0_i32, %c0_i32_0 : i32, i32
  }
  func.func @transform_17(%arg0: i32) -> (i32, i32) {
    %c0_i32 = arith.constant 0 : i32
    %c0_i32_0 = arith.constant 0 : i32
    %c0_i32_1 = arith.constant 0 : i32
    return %c0_i32, %c0_i32_0 : i32, i32
  }
  func.func @transform_18(%arg0: i32) -> (i32, i32) {
    %c0_i32 = arith.constant 0 : i32
    %c0_i32_0 = arith.constant 0 : i32
    %c0_i32_1 = arith.constant 0 : i32
    return %c0_i32, %c0_i32_0 : i32, i32
  }
  func.func @transform_19(%arg0: i32) -> (i32, i32) {
    %c0_i32 = arith.constant 0 : i32
    %c0_i32_0 = arith.constant 0 : i32
    %c0_i32_1 = arith.constant 0 : i32
    return %c0_i32, %c0_i32_0 : i32, i32
  }
  func.func @transform_20(%arg0: i32) -> (i32, i32) {
    %c0_i32 = arith.constant 0 : i32
    %c0_i32_0 = arith.constant 0 : i32
    %c0_i32_1 = arith.constant 0 : i32
    return %c0_i32, %c0_i32_0 : i32, i32
  }
  func.func @transform_21(%arg0: i32) -> (i32, i32) {
    %c0_i32 = arith.constant 0 : i32
    %c0_i32_0 = arith.constant 0 : i32
    %c0_i32_1 = arith.constant 0 : i32
    return %c0_i32, %c0_i32_0 : i32, i32
  }
  func.func @transform_22(%arg0: i32) -> (i32, i32) {
    %c0_i32 = arith.constant 0 : i32
    %c0_i32_0 = arith.constant 0 : i32
    %c0_i32_1 = arith.constant 0 : i32
    return %c0_i32, %c0_i32_0 : i32, i32
  }
  func.func @transform_23(%arg0: i32) -> (i32, i32) {
    %c0_i32 = arith.constant 0 : i32
    %c0_i32_0 = arith.constant 0 : i32
    return %arg0, %c0_i32 : i32, i32
  }
  func.func @transform_24(%arg0: i32) -> (i32, i32, i32) {
    %c0_i32 = arith.constant 0 : i32
    %c0_i32_0 = arith.constant 0 : i32
    %c0_i32_1 = arith.constant 0 : i32
    return %c0_i32, %arg0, %c0_i32_0 : i32, i32, i32
  }
}

</mosaic_0001>

<bundles_post_ra>
// kernel: tpu_custom_call.1
= control target key start
LH: loop header
LB: loop body
LE: loop exit
PB: predicated region body
PF: predicated region fallthrough
CT: control target
= control target key end

     0   :  { %s8127_s0 = inlined_call_operand.vmem [shape: bf16[8,32,16], index: 0, kind: input, shape index: {}]   ;;  %s8128_s1 = inlined_call_operand.vmem [shape: bf16[8,32,16], index: 1, kind: input, shape index: {}]   ;;  %s8129_s2 = inlined_call_operand.vmem [shape: f32[32,8], index: 2, kind: input, shape index: {}]   ;;  %s8130_s3 = inlined_call_operand.vmem [shape: f32[32,16], index: 3, kind: input, shape index: {}]   ;;  %s8131_s4 = inlined_call_operand.vmem [shape: bf16[16,96], index: 4, kind: input, shape index: {}]   ;;  %s8132_s5 = inlined_call_operand.vmem [shape: f32[1,96], index: 5, kind: input, shape index: {}]   ;;  %s8133_s6 = inlined_call_operand.vmem [shape: bf16[32,96], index: 6, kind: input, shape index: {}]   ;;  %s8134_s7 = inlined_call_operand.vmem [shape: f32[1,32], index: 7, kind: input, shape index: {}]   ;;  %s8135_s8 = inlined_call_operand.vmem [shape: bf16[32,16], index: 8, kind: input, shape index: {}]   ;;  %s8136_s9 = inlined_call_operand.vmem [shape: f32[1,16], index: 9, kind: input, shape index: {}]   ;;  %s8137_s10 = inlined_call_operand.vmem [shape: bf16[32,16], index: 10, kind: input, shape index: {}]   ;;  %s8138_s11 = inlined_call_operand.vmem [shape: f32[1,16], index: 11, kind: input, shape index: {}]   ;;  %s8139_s12 = inlined_call_operand.vmem [shape: bf16[16,32], index: 12, kind: input, shape index: {}]   ;;  %s8140_s13 = inlined_call_operand.vmem [shape: bf16[8,32], index: 13, kind: input, shape index: {}]   ;;  %s8141_s14 = inlined_call_operand.vmem [shape: f32[1,32], index: 14, kind: input, shape index: {}]   ;;  %s8142_s15 = inlined_call_operand.vmem [shape: bf16[16,96], index: 15, kind: input, shape index: {}]   ;;  %s8143_s16 = inlined_call_operand.vmem [shape: bf16[16,96], index: 16, kind: input, shape index: {}]   ;;  %s8144_s17 = inlined_call_operand.vmem [shape: bf16[8,96], index: 17, kind: input, shape index: {}]   ;;  %s8145_s18 = inlined_call_operand.vmem [shape: f32[1,96], index: 18, kind: input, shape index: {}]   ;;  %s8146_s19 = inlined_call_operand.vmem [shape: bf16[32,96], index: 19, kind: input, shape index: {}]   ;;  %s8147_s20 = inlined_call_operand.vmem [shape: f32[1,32], index: 20, kind: input, shape index: {}]   ;;  %s8148_s21 = inlined_call_operand.vmem [shape: bf16[32,128], index: 21, kind: input, shape index: {}]   ;;  %s8149_s22 = inlined_call_operand.vmem [shape: f32[1,128], index: 22, kind: input, shape index: {}]   ;;  %s8150_s23 = inlined_call_operand.vmem [shape: f32[32,16], index: 23, kind: output, shape index: {0}]   ;;  %s8151_s24 = inlined_call_operand.hbm [shape: f32[8,32,128], index: 24, kind: output, shape index: {1}]  }
   0x1   :  { %8167 = sst [smem:[#allocation27_spill]] %s8127_s0 }
   0x2   :  { %8168 = sst [smem:[#allocation28_spill]] %s8128_s1 }
   0x3   :  { %8169 = sst [smem:[#allocation29_spill]] %s8129_s2 }
   0x4   :  { %8170 = sst [smem:[#allocation30_spill]] %s8130_s3 }
   0x5   :  { %8171 = sst [smem:[#allocation31_spill]] %s8131_s4 }
   0x6   :  { %8172 = sst [smem:[#allocation32_spill]] %s8132_s5 }
   0x7   :  { %8173 = sst [smem:[#allocation33_spill]] %s8133_s6 }
   0x8   :  { %8174 = sst [smem:[#allocation34_spill]] %s8134_s7 }
   0x9   :  { %8175 = sst [smem:[#allocation35_spill]] %s8135_s8 }
   0xa   :  { %8176 = sst [smem:[#allocation36_spill]] %s8149_s22 }
   0xb   :  { %8177 = sst [smem:[#allocation37_spill]] %s8151_s24 }
   0xc   :  { %30 = vsyncpa [#allocation6], 0 }
   0xd   :  { %32 = vsyncpa [#allocation6 + $0x1], 0  ;;  %s6999_s5 = smov 0   ;;  %s7001_s26 = smov 0  }
   0xe   :  { %s7003_s27 = smov 0   ;;  %s7005_s28 = smov 0  }
   0xf LB: > { %8178 = sst [smem:[#allocation17_spill]] %s6842_s5  ;;  %s7020_s6 = sadd.s32 4294967295, %s6854_s28   ;;  %s6854_s28 = sphi %s7005_s28, %s8209_s28   ;;  %s6850_s27 = sphi %s7003_s27, %s8212_s27   ;;  %s6846_s26 = sphi %s7001_s26, %s8211_s26   ;;  %s6842_s5 = sphi %s6999_s5, %s8210_s5  }
  0x10   : > { %8179 = sst [smem:[#allocation18_spill]] %s6846_s26  ;;  %s5469_s2 = sadd.s32 4294967294, %s6854_s28  }
  0x11   : > { %8180 = sst [smem:[#allocation19_spill]] %s6850_s27  ;;  %s7024_s29 = sadd.s32 1, %s6854_s28  }
  0x12   : > { %8181 = sst [smem:[#allocation20_spill]] %s6854_s28  ;;  %s45_s0 = sadd.s32 1, %s6850_s27 }
  0x13   : > { %8182 = sst [smem:[#allocation21_spill]] %s7020_s6  ;;  %s42_s7 = ssub.s32 %s6854_s28, %s7024_s29 }
  0x14   : > { %8183 = sst [smem:[#allocation22_spill]] %s7024_s29  ;;  %p52_p0 = scmp.ne.s32.totalorder %s6850_s27, %s6846_s26 }
  0x15   : > { %p43_p1 = scmp.eq.s32.totalorder %s42_s7, 0  ;;  %p53_p2 = scmp.eq.s32.totalorder %s6854_s28, 0 }
  0x16   : > { %p585_p3 = scmp.eq.s32.totalorder %s7020_s6, 1  ;;  %p590_p4 = scmp.ne.s32.totalorder %s6846_s26, %s6842_s5 }
  0x17   : > { %s7036_s30 = scalar_select %p43_p1, %s6850_s27, %s45_s0  }
  0x18   : > { %p7038_p5 = por %p53_p2, %p52_p0  ;;  %p7042_p6 = por %p585_p3, %p52_p0 }
  0x19   : > { %8184 = sst [smem:[#allocation23_spill]] %s7036_s30  ;;  %p591_p7 = scmp.eq.s32.totalorder %s5469_s2, 1 }
  0x1a   : > { %s8186_s25 = scalar_select %p7042_p6, 1, 0 }
  0x1b   : > { %p7046_p8 = por %p591_p7, %p590_p4  ;;  %p5471_p9 = scmp.ge.s32.totalorder %s6854_s28, 2 }
  0x1c   : > { %8187 = sst [smem:[#allocation24_spill]] %s8186_s25 }
  0x1d   : > { %s8188_s8 = scalar_select %p7046_p8, 1, 0 }
  0x1e   : > { %664 = sbr.rel (%p5471_p9) target bundleno = 65 (0x41), region = 92 }
  0x1f   : > { %8189 = sst [smem:[#allocation25_spill]] %s8188_s8 }
  0x25   : > { %667 = sbr.rel (!%p7038_p5) target bundleno = 51 (0x33), region = 96  ;;  %s669_s4 = sand.u32 (%p7038_p5), 1, %s6850_s27  }
  0x26   : > { %s5670_s1 = sshll.u32 (%p7038_p5), %s6854_s28, 3  ;;  %s5472_s0 = sshll.u32 (%p7038_p5), %s669_s4, 6 }
  0x27   : > { %s8190_s2 = sld [smem:[#allocation27_spill]] (%p7038_p5)  ;;  %s671_s8 = scalar_lea.vmem (%p7038_p5), [#allocation3], %s5472_s0 }
  0x2d   : > { %s674_s29 = scalar_lea.vmem %s8190_s2, %s5670_s1 }
  0x2e   : > { %v690_v0 = vld [vmem:[%s674_s29] sm:$0xff]   ;;  %v694_v1 = vld [vmem:[%s674_s29 + $0x10] sm:$0xff]  }
  0x2f   : > { %v698_v2 = vld [vmem:[%s674_s29 + $0x20] sm:$0xff]   ;;  %691 = vst [vmem:[%s671_s8] sm:$0xff] %v690_v0   ;;  %695 = vst [vmem:[%s671_s8 + $0x8] sm:$0xff] %v694_v1   ;;  %v702_v3 = vld [vmem:[%s674_s29 + $0x30] sm:$0xff]  }
  0x30   : > { %699 = vst [vmem:[%s671_s8 + $0x10] sm:$0xff] %v698_v2   ;;  %v706_v4 = vld [vmem:[%s674_s29 + $0x40] sm:$0xff]   ;;  %v710_v5 = vld [vmem:[%s674_s29 + $0x50] sm:$0xff]   ;;  %703 = vst [vmem:[%s671_s8 + $0x18] sm:$0xff] %v702_v3  }
  0x31   : > { %707 = vst [vmem:[%s671_s8 + $0x20] sm:$0xff] %v706_v4   ;;  %711 = vst [vmem:[%s671_s8 + $0x28] sm:$0xff] %v710_v5   ;;  %v714_v6 = vld [vmem:[%s674_s29 + $0x60] sm:$0xff]   ;;  %v718_v7 = vld [vmem:[%s674_s29 + $0x70] sm:$0xff]  }
  0x32   : > { %715 = vst [vmem:[%s671_s8 + $0x30] sm:$0xff] %v714_v6   ;;  %719 = vst [vmem:[%s671_s8 + $0x38] sm:$0xff] %v718_v7  }
  0x33 PF: > { %776 = sbr.rel (!%p7038_p5) target bundleno = 65 (0x41), region = 137  ;;  %s778_s30 = sand.u32 (%p7038_p5), 1, %s6850_s27  }
  0x34   : > { %s5671_s4 = sshll.u32 (%p7038_p5), %s6854_s28, 3  ;;  %s5475_s1 = sshll.u32 (%p7038_p5), %s778_s30, 6 }
  0x35   : > { %s8191_s2 = sld [smem:[#allocation28_spill]] (%p7038_p5)  ;;  %s780_s24 = scalar_lea.vmem (%p7038_p5), [#allocation4], %s5475_s1 }
  0x3b   : > { %s783_s5 = scalar_lea.vmem %s8191_s2, %s5671_s4 }
  0x3c   : > { %v799_v8 = vld [vmem:[%s783_s5] sm:$0xff]   ;;  %v803_v9 = vld [vmem:[%s783_s5 + $0x10] sm:$0xff]  }
  0x3d   : > { %v807_v10 = vld [vmem:[%s783_s5 + $0x20] sm:$0xff]   ;;  %800 = vst [vmem:[%s780_s24] sm:$0xff] %v799_v8   ;;  %804 = vst [vmem:[%s780_s24 + $0x8] sm:$0xff] %v803_v9   ;;  %v811_v11 = vld [vmem:[%s783_s5 + $0x30] sm:$0xff]  }
  0x3e   : > { %808 = vst [vmem:[%s780_s24 + $0x10] sm:$0xff] %v807_v10   ;;  %v815_v12 = vld [vmem:[%s783_s5 + $0x40] sm:$0xff]   ;;  %v819_v13 = vld [vmem:[%s783_s5 + $0x50] sm:$0xff]   ;;  %812 = vst [vmem:[%s780_s24 + $0x18] sm:$0xff] %v811_v11  }
  0x3f   : > { %816 = vst [vmem:[%s780_s24 + $0x20] sm:$0xff] %v815_v12   ;;  %820 = vst [vmem:[%s780_s24 + $0x28] sm:$0xff] %v819_v13   ;;  %v823_v14 = vld [vmem:[%s783_s5 + $0x60] sm:$0xff]   ;;  %v827_v15 = vld [vmem:[%s783_s5 + $0x70] sm:$0xff]  }
  0x40   : > { %824 = vst [vmem:[%s780_s24 + $0x30] sm:$0xff] %v823_v14   ;;  %828 = vst [vmem:[%s780_s24 + $0x38] sm:$0xff] %v827_v15  }
  0x41 PF: > { %p5478_p10 = scmp.ge.s32.totalorder %s6854_s28, 1  ;;  %p902_p11 = scmp.lt.s32.totalorder %s6854_s28, 3 }
  0x43   : > { %p903_p12 = pnand %p5478_p10, %p902_p11 }
  0x45   : > { %906 = sbr.rel (%p903_p12) target bundleno = 5456 (0x1550), region = 186 }
  0x4c   : > { %s7070_s29 = sand.u32 1, %s6846_s26   ;;  %s5482_s3 = sshll.u32 %s7020_s6, 1  ;;  %v7090_v20 = vld [vmem:[%s8146_s19] sm:$0xf]  ;;  %v7095_v21 = vld [vmem:[%s8146_s19 + $0x4] sm:$0xf] }
  0x4d   : > { %8192 = sst [smem:[#allocation26_spill]] %s7070_s29  ;;  %s8193_s5 = sld [smem:[#allocation33_spill]]  ;;  %v7100_v22 = vld [vmem:[%s8146_s19 + $0x8] sm:$0xf]  ;;  %v7105_v23 = vld [vmem:[%s8146_s19 + $0xc] sm:$0xf] }
  0x4e   : > { %s5479_s0 = sshll.u32 %s7070_s29, 6  ;;  %s5481_s7 = sshll.u32 %s7070_s29, 7 }
  0x4f   : > { %p1003_p13 = scmp.lt.s32.totalorder %s5482_s3, 3  ;;  %s8195_s25 = sld [smem:[#allocation29_spill]] }
  0x50   : > { %s7122_s27 = scalar_lea.vmem [#allocation3], %s5479_s0  ;;  %s7124_s1 = scalar_lea.vmem [#allocation4], %s5479_s0 }
  0x51   : > { %s8214_s3 = smov (!%p1003_p13, %s5482_s3), 3 }
  0x52   : > { %s5483_s26 = sshll.u32 %s8214_s3, 3  ;;  %s7126_s3 = scalar_lea.vmem [#allocation5], %s5481_s7 }
  0x53   : > { %s8194_s4 = smov %s8193_s5  ;;  %v1022_v16 = vld [vmem:[%s8193_s5] sm:$0xf]  ;;  %s7120_s22 = scalar_lea.vmem %s8150_s23, %s5483_s26 }
  0x54   : > { %v1023_v17 = vld [vmem:[%s8194_s4 + $0x4] sm:$0xf]  ;;  %v1024_v18 = vld [vmem:[%s8194_s4 + $0x8] sm:$0xf]  ;;  %v1025_v19 = vld [vmem:[%s8194_s4 + $0xc] sm:$0xf] }
  0x55   : > { %s7110_s2 = scalar_lea.vmem %s8195_s25, %s5483_s26  ;;  %s8196_s4 = sld [smem:[#allocation30_spill]] }
  0x5b   : > { %s7115_s29 = scalar_lea.vmem %s8196_s4, %s5483_s26 }
  0x5c   : > { %v7128_v24 = vcombine.low %v1022_v16, %v1023_v17  ;;  %s8197_s25 = sld [smem:[#allocation31_spill]]  ;;  %v6405_v26 = vld [vmem:[%s7122_s27] sm:$0xff]   ;;  %vm1101_vm0 = vcmask 130048   ;;  %s6856_s4 = smov 96   ;;  %v7136_v27 = vcombine.low %v1024_v18, %v1025_v19  ;;  %v6407_v29 = vld [vmem:[%s7122_s27 + $0x8] sm:$0xff]   ;;  %v6409_v31 = vld [vmem:[%s7122_s27 + $0x30] sm:$0xff]  }
  0x5d   : > { %v6406_v28 = vld [vmem:[%s7122_s27 + $0x20] sm:$0xff]   ;;  %5861 = vmatprep.mubr.msk.bf16.mxu0 %vm1101_vm0, %v6405_v26  ;;  %v6408_v30 = vld [vmem:[%s7122_s27 + $0x28] sm:$0xff]   ;;  %s6857_s0 = smov 64   ;;  %v6858_v32 = vmov 0.0   ;;  %v6411_v33 = vld [vmem:[%s7122_s27 + $0x10] sm:$0xff]   ;;  %vm6859_vm1 = vmmov 0  }
  0x5e   : > { %1369 = vrot.lane.b32.xlu0 %v7128_v24, %s6856_s4  ;;  %5869 = vmatprep.mubr.msk.bf16.mxu1 %vm1101_vm0, %v6406_v28  ;;  %v6412_v34 = vld [vmem:[%s7122_s27 + $0x18] sm:$0xff]   ;;  %v6860_v36 = vmov 0   ;;  %s8198_s8 = sld [smem:[#allocation32_spill]]  ;;  %vm1231_vm2 = vcmask 261120   ;;  %s8199_s24 = sld [smem:[#allocation34_spill]]  ;;  %vm6862_vm3 = vmmov 0  }
  0x5f   : > { %1457 = vrot.lane.b32.xlu1 %v7128_v24, %s6857_s0  ;;  %v6410_v35 = vld [vmem:[%s7122_s27 + $0x38] sm:$0xff]  }
  0x62   : > { %v6404_v25 = vld [vmem:[%s8197_s25] sm:$0xff]   ;;  %1371 = vrot.lane.b32.xlu0 %v7136_v27, %s6856_s4 }
  0x63   : > { %5859 = vmatprep.subr.bf16.mxu0 %v6404_v25  ;;  %6339 = vmatprep.subr.bf16.mxu1 %v6404_v25 }
  0x64   : > { %5860 = vmatpush3.bf16.msra.mxu0 %v6404_v25  ;;  %6340 = vmatpush3.bf16.msra.mxu1 %v6404_v25  ;;  %v5488_v42 = vld [vmem:[%s8198_s8] ss:$0 sm:$0xff]  ;;  %s8200_s8 = sld [smem:[#allocation35_spill]] }
  0x65   : > { %5877 = vmatprep.subr.bf16.mxu1 %v6858_v32  ;;  %1459 = vrot.lane.b32.xlu1 %v7136_v27, %s6857_s0 }
  0x66   : > { %5909 = vmatprep.subr.bf16.mxu0 %v6858_v32 }
  0x67   : > { %5862 = vmatmul.mubr.msk.bf16.vlgmr.msra.gmra.mrb[0].mxu0 %vm1101_vm0, %v6407_v29  ;;  %5870 = vmatmul.mubr.msk.bf16.vlgmr.msra.gmra.mrb[0].mxu1 %vm1101_vm0, %v6408_v30 }
  0x68   : > { %5873 = vmatprep.mubr.msk.bf16.mxu1 %vm1101_vm0, %v6409_v31  ;;  %5878 = vmatpush3.bf16.msra.mxu1 %v7128_v24 }
  0x69   : > { %5879 = vmatprep.subr.bf16.mxu1 %v6858_v32  ;;  %5865 = vmatprep.mubr.msk.bf16.mxu0 %vm1101_vm0, %v6411_v33 }
  0x6c   : > { %5880 = vmatpush3.bf16.msra.mxu1 %v7136_v27 }
  0x6d   : > { %5885 = vmatprep.subr.bf16.mxu1 %v6858_v32 }
  0x6f   : > { %5866 = vmatmul.mubr.msk.bf16.gmra.mrb[4].mxu0 %vm1101_vm0, %v6412_v34  ;;  %5874 = vmatmul.mubr.msk.bf16.gmra.mrb[4].mxu1 %vm1101_vm0, %v6410_v35 }
  0x70   : > { %5913 = vmatprep.mubr.msk.bf16.mxu0 %vm6859_vm1, %v6858_v32  ;;  %5881 = vmatprep.mubr.msk.bf16.mxu1 %vm6859_vm1, %v6858_v32 }
  0x77   : > { %5882 = vmatmul.mubr.bf16.vlgmr.msra.gmra.mrb[8].mxu1 %v6860_v36 }
  0x78   : > { %5889 = vmatprep.mubr.msk.bf16.mxu1 %vm6859_vm1, %v6858_v32 }
  0xd0   : > { %v7171_v37 = vpop.permute.xlu0 %1369 }
  0xd1   : > { %5886 = vmatpush3.bf16.msra.mxu1 %v7171_v37  ;;  %5910 = vmatpush3.bf16.msra.mxu0 %v7171_v37  ;;  %v7179_v39 = vpop.permute.xlu1 %1457 }
  0xd2   : > { %5887 = vmatprep.subr.bf16.mxu1 %v6858_v32  ;;  %5911 = vmatprep.subr.bf16.mxu0 %v6858_v32 }
  0xd4   : > { %v7177_v38 = vpop.permute.xlu0 %1371 }
  0xd5   : > { %5888 = vmatpush3.bf16.msra.mxu1 %v7177_v38  ;;  %5912 = vmatpush3.bf16.msra.mxu0 %v7177_v38 }
  0xd6   : > { %5893 = vmatprep.subr.bf16.mxu1 %v6858_v32  ;;  %5925 = vmatprep.subr.bf16.mxu0 %v6858_v32 }
  0xd7   : > { %v7188_v40 = vpop.permute.xlu1 %1459 }
  0xd8   : > { %5890 = vmatmul.mubr.bf16.vlgmr.msra.gmra.mrb[12].mxu1 %v6860_v36 }
  0xd9   : > { %5894 = vmatpush3.bf16.msra.mxu1 %v7179_v39  ;;  %5897 = vmatprep.mubr.msk.bf16.mxu1 %vm6859_vm1, %v6858_v32 }
  0xda   : > { %5895 = vmatprep.subr.bf16.mxu1 %v6858_v32 }
  0xdd   : > { %5896 = vmatpush3.bf16.msra.mxu1 %v7188_v40 }
  0xde   : > { %5901 = vmatprep.subr.bf16.mxu1 %v6858_v32 }
  0xe0   : > { %5898 = vmatmul.mubr.bf16.vlgmr.msra.gmra.mrb[16].mxu1 %v6860_v36 }
  0xe1   : > { %5902 = vmatpush3.bf16.msra.mxu1 %v7128_v24  ;;  %5905 = vmatprep.mubr.msk.bf16.mxu1 %vm6859_vm1, %v6858_v32 }
  0xe2   : > { %5903 = vmatprep.subr.bf16.mxu1 %v6858_v32 }
  0xe5   : > { %5904 = vmatpush3.bf16.msra.mxu1 %v7136_v27 }
  0xe6   : > { %5917 = vmatprep.subr.bf16.mxu1 %v6858_v32 }
 0x13a   : > { %v5863_v41 = vpop.f32.mrb[0].mxu0  ;;  %v5871_v44 = vpop.f32.mrb[0].mxu1 }
 0x13b   : > { %v1160_v43 = vpop.f32.mrb[1].mxu0  ;;  %v1201_v46 = vadd.f32 %v5871_v44, %v5488_v42  ;;  %v1192_v47 = vpop.f32.mrb[1].mxu1  ;;  %v1169_v48 = vadd.f32 %v5863_v41, %v5488_v42 }
 0x13c   : > { %v5864_v45 = vpop.f32.mrb[2].mxu0  ;;  %v1193_v51 = vadd.f32 %v5488_v42, %v1192_v47  ;;  %v5872_v52 = vpop.f32.mrb[2].mxu1  ;;  %v1161_v53 = vadd.f32 %v5488_v42, %v1160_v43 }
 0x13d   : > { %v1172_v49 = vadd.f32 %v5864_v45, %v5488_v42  ;;  %v1163_v50 = vpop.f32.mrb[3].mxu0  ;;  %v1204_v55 = vadd.f32 %v5872_v52, %v5488_v42  ;;  %v1195_v56 = vpop.f32.mrb[3].mxu1 }
 0x13e   : > { %v1164_v54 = vadd.f32 %v5488_v42, %v1163_v50  ;;  %v1196_v58 = vadd.f32 %v5488_v42, %v1195_v56  ;;  %v7231_v50 = vld [vmem:[%s8199_s24] ss:$0 sm:$0xff] }
 0x13f   : > { %v1224_v57 = vpack.c.bf16 %v1172_v49, %v1169_v48  ;;  %v1228_v60 = vpack.c.bf16 %v1204_v55, %v1201_v46 }
 0x140   : > { %v1223_v59 = vpack.c.bf16 %v1164_v54, %v1161_v53  ;;  %v1227_v61 = vpack.c.bf16 %v1196_v58, %v1193_v51 }
 0x141   : > { %1233 = vst.msk [vmem:[#allocation7 + $0x8] sm:$0xff] %vm1231_vm2, %v1224_v57  ;;  %1237 = vst.msk [vmem:[#allocation7 + $0x28] sm:$0xff] %vm1231_vm2, %v1228_v60 }
 0x142   : > { %1232 = vst.msk [vmem:[#allocation7] sm:$0xff] %vm1231_vm2, %v1223_v59  ;;  %1280 = vrot.lane.b32.xlu1 %v1223_v59, %s6857_s0  ;;  %1248 = vrot.lane.b32.xlu0 %v1223_v59, %s6856_s4  ;;  %v5867_v62 = vpop.f32.mrb[4].mxu0  ;;  %1236 = vst.msk [vmem:[#allocation7 + $0x20] sm:$0xff] %vm1231_vm2, %v1227_v61  ;;  %v5875_v63 = vpop.f32.mrb[4].mxu1 }
 0x143   : > { %v1185_v0 = vadd.f32 %v5867_v62, %v5488_v42  ;;  %v1176_v1 = vpop.f32.mrb[5].mxu0  ;;  %v1217_v2 = vadd.f32 %v5875_v63, %v5488_v42  ;;  %v1208_v3 = vpop.f32.mrb[5].mxu1 }
 0x144   : > { %v1177_v4 = vadd.f32 %v5488_v42, %v1176_v1  ;;  %v5868_v5 = vpop.f32.mrb[6].mxu0  ;;  %v1209_v6 = vadd.f32 %v5488_v42, %v1208_v3  ;;  %v5876_v7 = vpop.f32.mrb[6].mxu1 }
 0x145   : > { %v1188_v8 = vadd.f32 %v5868_v5, %v5488_v42  ;;  %v1179_v9 = vpop.f32.mrb[7].mxu0  ;;  %v1220_v10 = vadd.f32 %v5876_v7, %v5488_v42  ;;  %v1211_v11 = vpop.f32.mrb[7].mxu1 }
 0x146   : > { %1282 = vrot.lane.b32.xlu1 %v1224_v57, %s6857_s0  ;;  %1250 = vrot.lane.b32.xlu0 %v1224_v57, %s6856_s4  ;;  %v1180_v12 = vadd.f32 %v5488_v42, %v1179_v9  ;;  %v1212_v13 = vadd.f32 %v5488_v42, %v1211_v11 }
 0x147   : > { %v1226_v14 = vpack.c.bf16 %v1188_v8, %v1185_v0  ;;  %v1230_v15 = vpack.c.bf16 %v1220_v10, %v1217_v2 }
 0x148   : > { %v1225_v16 = vpack.c.bf16 %v1180_v12, %v1177_v4  ;;  %v1229_v17 = vpack.c.bf16 %v1212_v13, %v1209_v6 }
 0x149   : > { %1235 = vst.msk [vmem:[#allocation7 + $0x18] sm:$0xff] %vm1231_vm2, %v1226_v14  ;;  %1239 = vst.msk [vmem:[#allocation7 + $0x38] sm:$0xff] %vm1231_vm2, %v1230_v15  ;;  %v1416_v28 = vld [vmem:[#allocation7] sm:$0xff] }
 0x14a   : > { %1234 = vst.msk [vmem:[#allocation7 + $0x10] sm:$0xff] %vm1231_vm2, %v1225_v16  ;;  %1284 = vrot.lane.b32.xlu1 %v1225_v16, %s6857_s0  ;;  %1252 = vrot.lane.b32.xlu0 %v1225_v16, %s6856_s4  ;;  %1238 = vst.msk [vmem:[#allocation7 + $0x30] sm:$0xff] %vm1231_vm2, %v1229_v17  ;;  %v1362_v18 = vpop.f32.mrb[8].mxu1  ;;  %v1417_v29 = vunpack.c.l.bf16 %v1416_v28  ;;  %v1418_v30 = vunpack.c.h.bf16 %v1416_v28 }
 0x14b   : > { %v5883_v19 = vpop.f32.mrb[9].mxu1 }
 0x14c   : > { %v1365_v25 = vpop.f32.mrb[10].mxu1  ;;  %v1419_v31 = vadd.f32 %v1417_v29, %v1362_v18 }
 0x14d   : > { %v5884_v26 = vpop.f32.mrb[11].mxu1  ;;  %v1420_v33 = vadd.f32 %v1418_v30, %v1365_v25 }
 0x14e   : > { %1286 = vrot.lane.b32.xlu1 %v1226_v14, %s6857_s0  ;;  %1254 = vrot.lane.b32.xlu0 %v1226_v14, %s6856_s4  ;;  %v5508_v34 = vmul.f32 -1.442695, %v1419_v31 }
 0x14f   : > { %v5509_v35 = vmul.f32 -1.442695, %v1420_v33 }
 0x150   : > { %6413 = vpow2.f32 %v5508_v34 }
 0x151   : > { %6415 = vpow2.f32 %v5509_v35 }
 0x152   : > { %1288 = vrot.lane.b32.xlu1 %v1227_v61, %s6857_s0  ;;  %1256 = vrot.lane.b32.xlu0 %v1227_v61, %s6856_s4 }
 0x156   : > { %1290 = vrot.lane.b32.xlu1 %v1228_v60, %s6857_s0  ;;  %1258 = vrot.lane.b32.xlu0 %v1228_v60, %s6856_s4 }
 0x15a   : > { %1292 = vrot.lane.b32.xlu1 %v1229_v17, %s6857_s0  ;;  %1260 = vrot.lane.b32.xlu0 %v1229_v17, %s6856_s4  ;;  %v6414_v36 = vpop.eup %6413 }
 0x15b   : > { %v6416_v41 = vpop.eup %6415  ;;  %v1427_v42 = vadd.f32 1.0, %v6414_v36 }
 0x15c   : > { %v1428_v43 = vadd.f32 1.0, %v6416_v41 }
 0x15d   : > { %6417 = vrcp.f32 %v1427_v42 }
 0x15e   : > { %1294 = vrot.lane.b32.xlu1 %v1230_v15, %s6857_s0  ;;  %1262 = vrot.lane.b32.xlu0 %v1230_v15, %s6856_s4  ;;  %6419 = vrcp.f32 %v1428_v43 }
 0x167   : > { %v6418_v56 = vpop.eup %6417 }
 0x168   : > { %v6420_v61 = vpop.eup %6419 }
 0x1ab   : > { %v1409_v44 = vpop.f32.mrb[12].mxu1 }
 0x1ac   : > { %v5891_v45 = vpop.f32.mrb[13].mxu1 }
 0x1ad   : > { %v1412_v46 = vpop.f32.mrb[14].mxu1 }
 0x1ae   : > { %v5892_v47 = vpop.f32.mrb[15].mxu1 }
 0x1b3   : > { %v1497_v51 = vpop.f32.mrb[16].mxu1 }
 0x1b4   : > { %v1281_v48 = vpop.permute.xlu1 %1280  ;;  %v1249_v49 = vpop.permute.xlu0 %1248  ;;  %v1498_v53 = vadd.f32 %v7231_v50, %v1497_v51 }
 0x1b5   : > { %1304 = vst.msk [vmem:[#allocation9] sm:$0xff] %vm1231_vm2, %v1281_v48  ;;  %1272 = vst.msk [vmem:[#allocation8] sm:$0xff] %vm1231_vm2, %v1249_v49  ;;  %v5899_v54 = vpop.f32.mrb[17].mxu1 }
 0x1b6   : > { %v1500_v57 = vpop.f32.mrb[18].mxu1  ;;  %v1504_v58 = vmul.f32 %v6418_v56, %v1498_v53 }
 0x1b7   : > { %v1501_v59 = vadd.f32 %v7231_v50, %v1500_v57  ;;  %v5900_v60 = vpop.f32.mrb[19].mxu1 }
 0x1b8   : > { %v1283_v52 = vpop.permute.xlu1 %1282  ;;  %v1251_v55 = vpop.permute.xlu0 %1250 }
 0x1b9   : > { %1305 = vst.msk [vmem:[#allocation9 + $0x8] sm:$0xff] %vm1231_vm2, %v1283_v52  ;;  %1273 = vst.msk [vmem:[#allocation8 + $0x8] sm:$0xff] %vm1231_vm2, %v1251_v55  ;;  %v1505_v2 = vmul.f32 %v6420_v61, %v1501_v59  ;;  %v1607_v52 = vld [vmem:[#allocation7 + $0x8] sm:$0xff] }
 0x1ba   : > { %v1608_v53 = vunpack.c.l.bf16 %v1607_v52  ;;  %v1609_v60 = vunpack.c.h.bf16 %v1607_v52 }
 0x1bc   : > { %v1433_v62 = vld [vmem:[#allocation8] sm:$0xff]  ;;  %v1285_v63 = vpop.permute.xlu1 %1284  ;;  %v1253_v3 = vpop.permute.xlu0 %1252 }
 0x1bd   : > { %v1434_v0 = vunpack.c.l.bf16 %v1433_v62  ;;  %v1435_v1 = vunpack.c.h.bf16 %v1433_v62  ;;  %1306 = vst.msk [vmem:[#allocation9 + $0x10] sm:$0xff] %vm1231_vm2, %v1285_v63  ;;  %1274 = vst.msk [vmem:[#allocation8 + $0x10] sm:$0xff] %vm1231_vm2, %v1253_v3  ;;  %v1450_v12 = vld [vmem:[#allocation9] sm:$0xff] }
 0x1be   : > { %v1506_v15 = vunpack.c.l.bf16 %v1450_v12  ;;  %v1507_v16 = vunpack.c.h.bf16 %v1450_v12 }
 0x1bf   : > { %v1436_v4 = vadd.f32 %v1434_v0, %v1409_v44  ;;  %v1437_v5 = vadd.f32 %v1435_v1, %v1412_v46 }
 0x1c0   : > { %v1287_v6 = vpop.permute.xlu1 %1286  ;;  %v1255_v9 = vpop.permute.xlu0 %1254  ;;  %v1508_v28 = vadd.f32 %v1506_v15, %v1504_v58  ;;  %v1509_v30 = vadd.f32 %v1507_v16, %v1505_v2  ;;  %v1625_v54 = vld [vmem:[#allocation8 + $0x8] sm:$0xff] }
 0x1c1   : > { %v5510_v7 = vmul.f32 -1.442695, %v1436_v4  ;;  %v5511_v8 = vmul.f32 -1.442695, %v1437_v5  ;;  %1307 = vst.msk [vmem:[#allocation9 + $0x18] sm:$0xff] %vm1231_vm2, %v1287_v6  ;;  %1275 = vst.msk [vmem:[#allocation8 + $0x18] sm:$0xff] %vm1231_vm2, %v1255_v9  ;;  %v1626_v61 = vunpack.c.l.bf16 %v1625_v54  ;;  %v1627_v5 = vunpack.c.h.bf16 %v1625_v54 }
 0x1c3   : > { %6421 = vpow2.f32 %v5510_v7 }
 0x1c4   : > { %6423 = vpow2.f32 %v5511_v8  ;;  %v1289_v10 = vpop.permute.xlu1 %1288  ;;  %v1257_v11 = vpop.permute.xlu0 %1256 }
 0x1c5   : > { %1308 = vst.msk [vmem:[#allocation9 + $0x20] sm:$0xff] %vm1231_vm2, %v1289_v10  ;;  %1276 = vst.msk [vmem:[#allocation8 + $0x20] sm:$0xff] %vm1231_vm2, %v1257_v11 }
 0x1c8   : > { %v1291_v13 = vpop.permute.xlu1 %1290  ;;  %v1259_v14 = vpop.permute.xlu0 %1258 }
 0x1c9   : > { %1309 = vst.msk [vmem:[#allocation9 + $0x28] sm:$0xff] %vm1231_vm2, %v1291_v13  ;;  %1277 = vst.msk [vmem:[#allocation8 + $0x28] sm:$0xff] %vm1231_vm2, %v1259_v14 }
 0x1cc   : > { %v1293_v17 = vpop.permute.xlu1 %1292  ;;  %v1261_v19 = vpop.permute.xlu0 %1260 }
 0x1cd   : > { %v6422_v18 = vpop.eup %6421  ;;  %1310 = vst.msk [vmem:[#allocation9 + $0x30] sm:$0xff] %vm1231_vm2, %v1293_v17  ;;  %1278 = vst.msk [vmem:[#allocation8 + $0x30] sm:$0xff] %vm1231_vm2, %v1261_v19 }
 0x1ce   : > { %v6424_v25 = vpop.eup %6423  ;;  %v1444_v26 = vadd.f32 1.0, %v6422_v18 }
 0x1cf   : > { %v1445_v29 = vadd.f32 1.0, %v6424_v25 }
 0x1d0   : > { %6425 = vrcp.f32 %v1444_v26  ;;  %v1295_v31 = vpop.permute.xlu1 %1294  ;;  %v1263_v33 = vpop.permute.xlu0 %1262  ;;  %v1643_v26 = vld [vmem:[#allocation9 + $0x8] sm:$0xff] }
 0x1d1   : > { %6427 = vrcp.f32 %v1445_v29  ;;  %1311 = vst.msk [vmem:[#allocation9 + $0x38] sm:$0xff] %vm1231_vm2, %v1295_v31  ;;  %1279 = vst.msk [vmem:[#allocation8 + $0x38] sm:$0xff] %vm1231_vm2, %v1263_v33  ;;  %v1687_v33 = vunpack.c.l.bf16 %v1643_v26 }
 0x1d2   : > { %6429 = vtanh.f32 %v1508_v28 }
 0x1d3   : > { %6431 = vtanh.f32 %v1509_v30 }
 0x1da   : > { %v6426_v34 = vpop.eup %6425 }
 0x1db   : > { %v6428_v35 = vpop.eup %6427  ;;  %v1512_v36 = vsub.f32 1.0, %v6426_v34  ;;  %v1516_v45 = vmul.f32 0.0, %v6426_v34 }
 0x1dc   : > { %v6430_v41 = vpop.eup %6429  ;;  %v1513_v42 = vsub.f32 1.0, %v6428_v35  ;;  %v1517_v46 = vmul.f32 0.0, %v6428_v35 }
 0x1dd   : > { %v6432_v43 = vpop.eup %6431  ;;  %v1514_v44 = vmul.f32 %v6430_v41, %v1512_v36 }
 0x1de   : > { %v1515_v47 = vmul.f32 %v6432_v43, %v1513_v42  ;;  %v1688_v42 = vunpack.c.h.bf16 %v1643_v26 }
 0x1df   : > { %v7249_v48 = vadd.f32 %v1516_v45, %v1514_v44 }
 0x1e0   : > { %v7251_v49 = vadd.f32 %v1517_v46, %v1515_v47 }
 0x1e2   : > { %v1520_v51 = vpack.c.bf16 %v7251_v49, %v7249_v48 }
 0x1e4   : > { %5906 = vmatmul.mubr.msk.bf16.vlgmr.msra.gmra.mrb[20].mxu1 %vm1231_vm2, %v1520_v51  ;;  %5914 = vmatmul.mubr.msk.bf16.vlgmr.msra.gmra.mrb[8].mxu0 %vm1231_vm2, %v1520_v51 }
 0x1e5   : > { %5918 = vmatpush3.bf16.msra.mxu1 %v7179_v39  ;;  %5921 = vmatprep.mubr.msk.bf16.mxu1 %vm6859_vm1, %v6858_v32 }
 0x1e6   : > { %5919 = vmatprep.subr.bf16.mxu1 %v6858_v32  ;;  %5926 = vmatpush3.bf16.msra.mxu0 %v7128_v24 }
 0x1e7   : > { %5927 = vmatprep.subr.bf16.mxu0 %v6858_v32  ;;  %5929 = vmatprep.mubr.msk.bf16.mxu0 %vm6859_vm1, %v6858_v32 }
 0x1e9   : > { %5920 = vmatpush3.bf16.msra.mxu1 %v7188_v40 }
 0x1ea   : > { %5933 = vmatprep.subr.bf16.mxu1 %v6858_v32  ;;  %5928 = vmatpush3.bf16.msra.mxu0 %v7136_v27 }
 0x1eb   : > { %5941 = vmatprep.subr.bf16.mxu0 %v6858_v32 }
 0x1ec   : > { %5922 = vmatmul.mubr.msk.bf16.vlgmr.msra.gmra.mrb[24].mxu1 %vm1231_vm2, %v1520_v51 }
 0x1ed   : > { %5934 = vmatpush3.bf16.msra.mxu1 %v7171_v37  ;;  %5937 = vmatprep.mubr.msk.bf16.mxu1 %vm6859_vm1, %v6858_v32 }
 0x1ee   : > { %5935 = vmatprep.subr.bf16.mxu1 %v6858_v32 }
 0x1f1   : > { %5936 = vmatpush3.bf16.msra.mxu1 %v7177_v38 }
 0x1f2   : > { %5949 = vmatprep.subr.bf16.mxu1 %v6858_v32 }
 0x2b7   : > { %v1558_v55 = vpop.f32.mrb[20].mxu1  ;;  %v1599_v56 = vpop.f32.mrb[8].mxu0 }
 0x2b8   : > { %v1610_v57 = vadd.f32 %v1608_v53, %v1558_v55  ;;  %v5907_v58 = vpop.f32.mrb[21].mxu1  ;;  %v5915_v59 = vpop.f32.mrb[9].mxu0  ;;  %v1628_v4 = vadd.f32 %v1626_v61, %v1599_v56 }
 0x2b9   : > { %v1561_v62 = vpop.f32.mrb[22].mxu1  ;;  %v1602_v63 = vpop.f32.mrb[10].mxu0 }
 0x2ba   : > { %v5515_v0 = vmul.f32 -1.442695, %v1610_v57  ;;  %v1611_v1 = vadd.f32 %v1609_v60, %v1561_v62  ;;  %v5908_v2 = vpop.f32.mrb[23].mxu1  ;;  %v5916_v3 = vpop.f32.mrb[11].mxu0  ;;  %v1629_v7 = vadd.f32 %v1627_v5, %v1602_v63  ;;  %v5517_v8 = vmul.f32 -1.442695, %v1628_v4 }
 0x2bb   : > { %v1806_v60 = vld [vmem:[#allocation8 + $0x10] sm:$0xff] }
 0x2bc   : > { %6433 = vpow2.f32 %v5515_v0  ;;  %v5516_v6 = vmul.f32 -1.442695, %v1611_v1  ;;  %v5518_v11 = vmul.f32 -1.442695, %v1629_v7  ;;  %v1807_v3 = vunpack.c.l.bf16 %v1806_v60 }
 0x2be   : > { %6435 = vpow2.f32 %v5516_v6 }
 0x2bf   : > { %v1678_v9 = vpop.f32.mrb[24].mxu1  ;;  %6437 = vpow2.f32 %v5517_v8 }
 0x2c0   : > { %v5923_v10 = vpop.f32.mrb[25].mxu1  ;;  %6439 = vpow2.f32 %v5518_v11  ;;  %v1679_v29 = vadd.f32 %v7231_v50, %v1678_v9  ;;  %v1808_v11 = vunpack.c.h.bf16 %v1806_v60 }
 0x2c1   : > { %v1681_v12 = vpop.f32.mrb[26].mxu1 }
 0x2c2   : > { %v5924_v13 = vpop.f32.mrb[27].mxu1  ;;  %v1682_v34 = vadd.f32 %v7231_v50, %v1681_v12 }
 0x2c6   : > { %v6434_v14 = vpop.eup %6433 }
 0x2c7   : > { %v1618_v15 = vadd.f32 1.0, %v6434_v14 }
 0x2c8   : > { %v6436_v16 = vpop.eup %6435 }
 0x2c9   : > { %6441 = vrcp.f32 %v1618_v15  ;;  %v1619_v17 = vadd.f32 1.0, %v6436_v16  ;;  %v6438_v18 = vpop.eup %6437 }
 0x2ca   : > { %v6440_v19 = vpop.eup %6439  ;;  %v1636_v25 = vadd.f32 1.0, %v6438_v18 }
 0x2cb   : > { %6443 = vrcp.f32 %v1619_v17  ;;  %v1637_v28 = vadd.f32 1.0, %v6440_v19 }
 0x2cc   : > { %6445 = vrcp.f32 %v1636_v25 }
 0x2cd   : > { %6447 = vrcp.f32 %v1637_v28 }
 0x2d3   : > { %v6442_v30 = vpop.eup %6441 }
 0x2d4   : > { %v1685_v31 = vmul.f32 %v6442_v30, %v1679_v29 }
 0x2d5   : > { %v6444_v35 = vpop.eup %6443 }
 0x2d6   : > { %v1689_v36 = vadd.f32 %v1687_v33, %v1685_v31  ;;  %v1686_v41 = vmul.f32 %v6444_v35, %v1682_v34  ;;  %v6446_v44 = vpop.eup %6445  ;;  %v1824_v34 = vld [vmem:[#allocation9 + $0x10] sm:$0xff] }
 0x2d7   : > { %v6448_v45 = vpop.eup %6447  ;;  %v1693_v46 = vsub.f32 1.0, %v6446_v44  ;;  %v1697_v51 = vmul.f32 %v6446_v44, %v7249_v48  ;;  %v1788_v48 = vld [vmem:[#allocation7 + $0x10] sm:$0xff] }
 0x2d8   : > { %6449 = vtanh.f32 %v1689_v36  ;;  %v1690_v43 = vadd.f32 %v1688_v42, %v1686_v41  ;;  %v1694_v52 = vsub.f32 1.0, %v6448_v45  ;;  %v1698_v55 = vmul.f32 %v6448_v45, %v7251_v49 }
 0x2d9   : > { %v1789_v49 = vunpack.c.l.bf16 %v1788_v48  ;;  %v1790_v2 = vunpack.c.h.bf16 %v1788_v48 }
 0x2da   : > { %6451 = vtanh.f32 %v1690_v43  ;;  %v1868_v43 = vunpack.c.l.bf16 %v1824_v34 }
 0x2e2   : > { %v6450_v47 = vpop.eup %6449 }
 0x2e3   : > { %v1695_v53 = vmul.f32 %v6450_v47, %v1693_v46 }
 0x2e4   : > { %v6452_v54 = vpop.eup %6451 }
 0x2e5   : > { %v1696_v56 = vmul.f32 %v6452_v54, %v1694_v52  ;;  %v7280_v57 = vadd.f32 %v1697_v51, %v1695_v53  ;;  %v1869_v51 = vunpack.c.h.bf16 %v1824_v34 }
 0x2e7   : > { %v7282_v58 = vadd.f32 %v1698_v55, %v1696_v56 }
 0x2e9   : > { %v1701_v59 = vpack.c.bf16 %v7282_v58, %v7280_v57 }
 0x2eb   : > { %5930 = vmatmul.mubr.msk.bf16.vlgmr.msra.gmra.mrb[12].mxu0 %vm1231_vm2, %v1701_v59  ;;  %5938 = vmatmul.mubr.msk.bf16.vlgmr.msra.gmra.mrb[28].mxu1 %vm1231_vm2, %v1701_v59 }
 0x2ec   : > { %5942 = vmatpush3.bf16.msra.mxu0 %v7179_v39  ;;  %5945 = vmatprep.mubr.msk.bf16.mxu0 %vm6859_vm1, %v6858_v32 }
 0x2ed   : > { %5943 = vmatprep.subr.bf16.mxu0 %v6858_v32  ;;  %5950 = vmatpush3.bf16.msra.mxu1 %v7128_v24 }
 0x2ee   : > { %5951 = vmatprep.subr.bf16.mxu1 %v6858_v32  ;;  %5953 = vmatprep.mubr.msk.bf16.mxu1 %vm6859_vm1, %v6858_v32 }
 0x2f0   : > { %5944 = vmatpush3.bf16.msra.mxu0 %v7188_v40 }
 0x2f1   : > { %5957 = vmatprep.subr.bf16.mxu0 %v6858_v32  ;;  %5952 = vmatpush3.bf16.msra.mxu1 %v7136_v27 }
 0x2f2   : > { %5965 = vmatprep.subr.bf16.mxu1 %v6858_v32 }
 0x2f3   : > { %5946 = vmatmul.mubr.msk.bf16.vlgmr.msra.gmra.mrb[16].mxu0 %vm1231_vm2, %v1701_v59 }
 0x2f4   : > { %5958 = vmatpush3.bf16.msra.mxu0 %v7171_v37  ;;  %5961 = vmatprep.mubr.msk.bf16.mxu0 %vm6859_vm1, %v6858_v32 }
 0x2f5   : > { %5959 = vmatprep.subr.bf16.mxu0 %v6858_v32 }
 0x2f8   : > { %5960 = vmatpush3.bf16.msra.mxu0 %v7177_v38 }
 0x2f9   : > { %5973 = vmatprep.subr.bf16.mxu0 %v6858_v32 }
 0x3be   : > { %v1739_v61 = vpop.f32.mrb[12].mxu0  ;;  %v1780_v62 = vpop.f32.mrb[28].mxu1 }
 0x3bf   : > { %v1791_v63 = vadd.f32 %v1789_v49, %v1739_v61  ;;  %v5931_v0 = vpop.f32.mrb[13].mxu0  ;;  %v5939_v1 = vpop.f32.mrb[29].mxu1  ;;  %v1809_v10 = vadd.f32 %v1807_v3, %v1780_v62 }
 0x3c0   : > { %v1742_v4 = vpop.f32.mrb[14].mxu0  ;;  %v1783_v5 = vpop.f32.mrb[30].mxu1 }
 0x3c1   : > { %v5522_v6 = vmul.f32 -1.442695, %v1791_v63  ;;  %v1792_v7 = vadd.f32 %v1790_v2, %v1742_v4  ;;  %v5932_v8 = vpop.f32.mrb[15].mxu0  ;;  %v5940_v9 = vpop.f32.mrb[31].mxu1  ;;  %v1810_v13 = vadd.f32 %v1808_v11, %v1783_v5  ;;  %v5524_v14 = vmul.f32 -1.442695, %v1809_v10 }
 0x3c2   : > { %v1987_v2 = vld [vmem:[#allocation8 + $0x18] sm:$0xff] }
 0x3c3   : > { %6453 = vpow2.f32 %v5522_v6  ;;  %v5523_v12 = vmul.f32 -1.442695, %v1792_v7  ;;  %v5525_v17 = vmul.f32 -1.442695, %v1810_v13  ;;  %v1988_v9 = vunpack.c.l.bf16 %v1987_v2 }
 0x3c5   : > { %6455 = vpow2.f32 %v5523_v12 }
 0x3c6   : > { %v1859_v15 = vpop.f32.mrb[16].mxu0  ;;  %6457 = vpow2.f32 %v5524_v14 }
 0x3c7   : > { %v5947_v16 = vpop.f32.mrb[17].mxu0  ;;  %6459 = vpow2.f32 %v5525_v17  ;;  %v1860_v36 = vadd.f32 %v7231_v50, %v1859_v15  ;;  %v1989_v17 = vunpack.c.h.bf16 %v1987_v2 }
 0x3c8   : > { %v1862_v18 = vpop.f32.mrb[18].mxu0 }
 0x3c9   : > { %v5948_v19 = vpop.f32.mrb[19].mxu0  ;;  %v1863_v44 = vadd.f32 %v7231_v50, %v1862_v18 }
 0x3cd   : > { %v6454_v25 = vpop.eup %6453 }
 0x3ce   : > { %v1799_v26 = vadd.f32 1.0, %v6454_v25 }
 0x3cf   : > { %v6456_v28 = vpop.eup %6455 }
 0x3d0   : > { %6461 = vrcp.f32 %v1799_v26  ;;  %v1800_v29 = vadd.f32 1.0, %v6456_v28  ;;  %v6458_v30 = vpop.eup %6457 }
 0x3d1   : > { %v6460_v31 = vpop.eup %6459  ;;  %v1817_v33 = vadd.f32 1.0, %v6458_v30 }
 0x3d2   : > { %6463 = vrcp.f32 %v1800_v29  ;;  %v1818_v35 = vadd.f32 1.0, %v6460_v31 }
 0x3d3   : > { %6465 = vrcp.f32 %v1817_v33 }
 0x3d4   : > { %6467 = vrcp.f32 %v1818_v35 }
 0x3da   : > { %v6462_v41 = vpop.eup %6461 }
 0x3db   : > { %v1866_v42 = vmul.f32 %v6462_v41, %v1860_v36 }
 0x3dc   : > { %v6464_v45 = vpop.eup %6463 }
 0x3dd   : > { %v1870_v46 = vadd.f32 %v1868_v43, %v1866_v42  ;;  %v1867_v47 = vmul.f32 %v6464_v45, %v1863_v44  ;;  %v6466_v53 = vpop.eup %6465  ;;  %v2005_v44 = vld [vmem:[#allocation9 + $0x18] sm:$0xff] }
 0x3de   : > { %v6468_v54 = vpop.eup %6467  ;;  %v1874_v55 = vsub.f32 1.0, %v6466_v53  ;;  %v1878_v59 = vmul.f32 %v6466_v53, %v7280_v57  ;;  %v1969_v57 = vld [vmem:[#allocation7 + $0x18] sm:$0xff] }
 0x3df   : > { %6469 = vtanh.f32 %v1870_v46  ;;  %v1871_v52 = vadd.f32 %v1869_v51, %v1867_v47  ;;  %v1875_v48 = vsub.f32 1.0, %v6468_v54  ;;  %v1879_v61 = vmul.f32 %v6468_v54, %v7282_v58 }
 0x3e0   : > { %v1970_v58 = vunpack.c.l.bf16 %v1969_v57  ;;  %v1971_v8 = vunpack.c.h.bf16 %v1969_v57 }
 0x3e1   : > { %6471 = vtanh.f32 %v1871_v52  ;;  %v2049_v52 = vunpack.c.l.bf16 %v2005_v44 }
 0x3e9   : > { %v6470_v56 = vpop.eup %6469 }
 0x3ea   : > { %v1876_v49 = vmul.f32 %v6470_v56, %v1874_v55 }
 0x3eb   : > { %v6472_v60 = vpop.eup %6471 }
 0x3ec   : > { %v1877_v62 = vmul.f32 %v6472_v60, %v1875_v48  ;;  %v7311_v63 = vadd.f32 %v1878_v59, %v1876_v49  ;;  %v2050_v59 = vunpack.c.h.bf16 %v2005_v44 }
 0x3ee   : > { %v7313_v0 = vadd.f32 %v1879_v61, %v1877_v62 }
 0x3f0   : > { %v1882_v1 = vpack.c.bf16 %v7313_v0, %v7311_v63 }
 0x3f2   : > { %5954 = vmatmul.mubr.msk.bf16.vlgmr.msra.gmra.mrb[32].mxu1 %vm1231_vm2, %v1882_v1  ;;  %5962 = vmatmul.mubr.msk.bf16.vlgmr.msra.gmra.mrb[20].mxu0 %vm1231_vm2, %v1882_v1 }
 0x3f3   : > { %5966 = vmatpush3.bf16.msra.mxu1 %v7179_v39  ;;  %5969 = vmatprep.mubr.msk.bf16.mxu1 %vm6859_vm1, %v6858_v32 }
 0x3f4   : > { %5967 = vmatprep.subr.bf16.mxu1 %v6858_v32  ;;  %5974 = vmatpush3.bf16.msra.mxu0 %v7128_v24 }
 0x3f5   : > { %5975 = vmatprep.subr.bf16.mxu0 %v6858_v32  ;;  %5977 = vmatprep.mubr.msk.bf16.mxu0 %vm6859_vm1, %v6858_v32 }
 0x3f7   : > { %5968 = vmatpush3.bf16.msra.mxu1 %v7188_v40 }
 0x3f8   : > { %5981 = vmatprep.subr.bf16.mxu1 %v6858_v32  ;;  %5976 = vmatpush3.bf16.msra.mxu0 %v7136_v27 }
 0x3f9   : > { %5989 = vmatprep.subr.bf16.mxu0 %v6858_v32 }
 0x3fa   : > { %5970 = vmatmul.mubr.msk.bf16.vlgmr.msra.gmra.mrb[36].mxu1 %vm1231_vm2, %v1882_v1 }
 0x3fb   : > { %5982 = vmatpush3.bf16.msra.mxu1 %v7171_v37  ;;  %5985 = vmatprep.mubr.msk.bf16.mxu1 %vm6859_vm1, %v6858_v32 }
 0x3fc   : > { %5983 = vmatprep.subr.bf16.mxu1 %v6858_v32 }
 0x3ff   : > { %5984 = vmatpush3.bf16.msra.mxu1 %v7177_v38 }
 0x400   : > { %5997 = vmatprep.subr.bf16.mxu1 %v6858_v32 }
 0x4c5   : > { %v1920_v3 = vpop.f32.mrb[32].mxu1  ;;  %v1961_v4 = vpop.f32.mrb[20].mxu0 }
 0x4c6   : > { %v1972_v5 = vadd.f32 %v1970_v58, %v1920_v3  ;;  %v5955_v6 = vpop.f32.mrb[33].mxu1  ;;  %v5963_v7 = vpop.f32.mrb[21].mxu0  ;;  %v1990_v16 = vadd.f32 %v1988_v9, %v1961_v4 }
 0x4c7   : > { %v1923_v10 = vpop.f32.mrb[34].mxu1  ;;  %v1964_v11 = vpop.f32.mrb[22].mxu0 }
 0x4c8   : > { %v5529_v12 = vmul.f32 -1.442695, %v1972_v5  ;;  %v1973_v13 = vadd.f32 %v1971_v8, %v1923_v10  ;;  %v5956_v14 = vpop.f32.mrb[35].mxu1  ;;  %v5964_v15 = vpop.f32.mrb[23].mxu0  ;;  %v1991_v19 = vadd.f32 %v1989_v17, %v1964_v11  ;;  %v5531_v25 = vmul.f32 -1.442695, %v1990_v16 }
 0x4c9   : > { %v2168_v8 = vld [vmem:[#allocation8 + $0x20] sm:$0xff] }
 0x4ca   : > { %6473 = vpow2.f32 %v5529_v12  ;;  %v5530_v18 = vmul.f32 -1.442695, %v1973_v13  ;;  %v5532_v29 = vmul.f32 -1.442695, %v1991_v19  ;;  %v2169_v15 = vunpack.c.l.bf16 %v2168_v8 }
 0x4cc   : > { %6475 = vpow2.f32 %v5530_v18 }
 0x4cd   : > { %v2040_v26 = vpop.f32.mrb[36].mxu1  ;;  %6477 = vpow2.f32 %v5531_v25 }
 0x4ce   : > { %v5971_v28 = vpop.f32.mrb[37].mxu1  ;;  %6479 = vpow2.f32 %v5532_v29  ;;  %v2041_v46 = vadd.f32 %v7231_v50, %v2040_v26  ;;  %v2170_v29 = vunpack.c.h.bf16 %v2168_v8 }
 0x4cf   : > { %v2043_v30 = vpop.f32.mrb[38].mxu1 }
 0x4d0   : > { %v5972_v31 = vpop.f32.mrb[39].mxu1  ;;  %v2044_v53 = vadd.f32 %v7231_v50, %v2043_v30 }
 0x4d4   : > { %v6474_v33 = vpop.eup %6473 }
 0x4d5   : > { %v1980_v34 = vadd.f32 1.0, %v6474_v33 }
 0x4d6   : > { %v6476_v35 = vpop.eup %6475 }
 0x4d7   : > { %6481 = vrcp.f32 %v1980_v34  ;;  %v1981_v36 = vadd.f32 1.0, %v6476_v35  ;;  %v6478_v41 = vpop.eup %6477 }
 0x4d8   : > { %v6480_v42 = vpop.eup %6479  ;;  %v1998_v43 = vadd.f32 1.0, %v6478_v41 }
 0x4d9   : > { %6483 = vrcp.f32 %v1981_v36  ;;  %v1999_v45 = vadd.f32 1.0, %v6480_v42 }
 0x4da   : > { %6485 = vrcp.f32 %v1998_v43 }
 0x4db   : > { %6487 = vrcp.f32 %v1999_v45 }
 0x4e1   : > { %v6482_v47 = vpop.eup %6481 }
 0x4e2   : > { %v2047_v51 = vmul.f32 %v6482_v47, %v2041_v46 }
 0x4e3   : > { %v6484_v54 = vpop.eup %6483 }
 0x4e4   : > { %v2051_v55 = vadd.f32 %v2049_v52, %v2047_v51  ;;  %v2048_v56 = vmul.f32 %v6484_v54, %v2044_v53  ;;  %v6486_v49 = vpop.eup %6485  ;;  %v2186_v53 = vld [vmem:[#allocation9 + $0x20] sm:$0xff] }
 0x4e5   : > { %v6488_v60 = vpop.eup %6487  ;;  %v2055_v61 = vsub.f32 1.0, %v6486_v49  ;;  %v2059_v1 = vmul.f32 %v6486_v49, %v7311_v63  ;;  %v2150_v63 = vld [vmem:[#allocation7 + $0x20] sm:$0xff] }
 0x4e6   : > { %6489 = vtanh.f32 %v2051_v55  ;;  %v2052_v48 = vadd.f32 %v2050_v59, %v2048_v56  ;;  %v2056_v57 = vsub.f32 1.0, %v6488_v60  ;;  %v2060_v3 = vmul.f32 %v6488_v60, %v7313_v0 }
 0x4e7   : > { %v2151_v0 = vunpack.c.l.bf16 %v2150_v63  ;;  %v2152_v14 = vunpack.c.h.bf16 %v2150_v63 }
 0x4e8   : > { %6491 = vtanh.f32 %v2052_v48  ;;  %v2230_v48 = vunpack.c.l.bf16 %v2186_v53 }
 0x4f0   : > { %v6490_v62 = vpop.eup %6489 }
 0x4f1   : > { %v2057_v58 = vmul.f32 %v6490_v62, %v2055_v61 }
 0x4f2   : > { %v6492_v2 = vpop.eup %6491 }
 0x4f3   : > { %v2058_v4 = vmul.f32 %v6492_v2, %v2056_v57  ;;  %v7342_v5 = vadd.f32 %v2059_v1, %v2057_v58  ;;  %v2231_v1 = vunpack.c.h.bf16 %v2186_v53 }
 0x4f5   : > { %v7344_v6 = vadd.f32 %v2060_v3, %v2058_v4 }
 0x4f7   : > { %v2063_v7 = vpack.c.bf16 %v7344_v6, %v7342_v5 }
 0x4f9   : > { %5978 = vmatmul.mubr.msk.bf16.vlgmr.msra.gmra.mrb[24].mxu0 %vm1231_vm2, %v2063_v7  ;;  %5986 = vmatmul.mubr.msk.bf16.vlgmr.msra.gmra.mrb[40].mxu1 %vm1231_vm2, %v2063_v7 }
 0x4fa   : > { %5990 = vmatpush3.bf16.msra.mxu0 %v7179_v39  ;;  %5993 = vmatprep.mubr.msk.bf16.mxu0 %vm6859_vm1, %v6858_v32 }
 0x4fb   : > { %5991 = vmatprep.subr.bf16.mxu0 %v6858_v32  ;;  %5998 = vmatpush3.bf16.msra.mxu1 %v7128_v24 }
 0x4fc   : > { %5999 = vmatprep.subr.bf16.mxu1 %v6858_v32  ;;  %6001 = vmatprep.mubr.msk.bf16.mxu1 %vm6859_vm1, %v6858_v32 }
 0x4fe   : > { %5992 = vmatpush3.bf16.msra.mxu0 %v7188_v40 }
 0x4ff   : > { %6005 = vmatprep.subr.bf16.mxu0 %v6858_v32  ;;  %6000 = vmatpush3.bf16.msra.mxu1 %v7136_v27 }
 0x500   : > { %6013 = vmatprep.subr.bf16.mxu1 %v6858_v32 }
 0x501   : > { %5994 = vmatmul.mubr.msk.bf16.vlgmr.msra.gmra.mrb[28].mxu0 %vm1231_vm2, %v2063_v7 }
 0x502   : > { %6006 = vmatpush3.bf16.msra.mxu0 %v7171_v37  ;;  %6009 = vmatprep.mubr.msk.bf16.mxu0 %vm6859_vm1, %v6858_v32 }
 0x503   : > { %6007 = vmatprep.subr.bf16.mxu0 %v6858_v32 }
 0x506   : > { %6008 = vmatpush3.bf16.msra.mxu0 %v7177_v38 }
 0x507   : > { %6021 = vmatprep.subr.bf16.mxu0 %v6858_v32 }
 0x5cc   : > { %v2101_v9 = vpop.f32.mrb[24].mxu0  ;;  %v2142_v10 = vpop.f32.mrb[40].mxu1 }
 0x5cd   : > { %v2153_v11 = vadd.f32 %v2151_v0, %v2101_v9  ;;  %v5979_v12 = vpop.f32.mrb[25].mxu0  ;;  %v5987_v13 = vpop.f32.mrb[41].mxu1  ;;  %v2171_v28 = vadd.f32 %v2169_v15, %v2142_v10 }
 0x5ce   : > { %v2104_v16 = vpop.f32.mrb[26].mxu0  ;;  %v2145_v17 = vpop.f32.mrb[42].mxu1 }
 0x5cf   : > { %v5536_v18 = vmul.f32 -1.442695, %v2153_v11  ;;  %v2154_v19 = vadd.f32 %v2152_v14, %v2104_v16  ;;  %v5980_v25 = vpop.f32.mrb[27].mxu0  ;;  %v5988_v26 = vpop.f32.mrb[43].mxu1  ;;  %v2172_v31 = vadd.f32 %v2170_v29, %v2145_v17  ;;  %v5538_v33 = vmul.f32 -1.442695, %v2171_v28 }
 0x5d0   : > { %v2349_v14 = vld [vmem:[#allocation8 + $0x28] sm:$0xff] }
 0x5d1   : > { %6493 = vpow2.f32 %v5536_v18  ;;  %v5537_v30 = vmul.f32 -1.442695, %v2154_v19  ;;  %v5539_v36 = vmul.f32 -1.442695, %v2172_v31  ;;  %v2350_v26 = vunpack.c.l.bf16 %v2349_v14 }
 0x5d3   : > { %6495 = vpow2.f32 %v5537_v30 }
 0x5d4   : > { %v2221_v34 = vpop.f32.mrb[28].mxu0  ;;  %6497 = vpow2.f32 %v5538_v33 }
 0x5d5   : > { %v5995_v35 = vpop.f32.mrb[29].mxu0  ;;  %6499 = vpow2.f32 %v5539_v36  ;;  %v2222_v55 = vadd.f32 %v7231_v50, %v2221_v34  ;;  %v2351_v36 = vunpack.c.h.bf16 %v2349_v14 }
 0x5d6   : > { %v2224_v41 = vpop.f32.mrb[30].mxu0 }
 0x5d7   : > { %v5996_v42 = vpop.f32.mrb[31].mxu0  ;;  %v2225_v49 = vadd.f32 %v7231_v50, %v2224_v41 }
 0x5db   : > { %v6494_v43 = vpop.eup %6493 }
 0x5dc   : > { %v2161_v44 = vadd.f32 1.0, %v6494_v43 }
 0x5dd   : > { %v6496_v45 = vpop.eup %6495 }
 0x5de   : > { %6501 = vrcp.f32 %v2161_v44  ;;  %v2162_v46 = vadd.f32 1.0, %v6496_v45  ;;  %v6498_v47 = vpop.eup %6497 }
 0x5df   : > { %v6500_v51 = vpop.eup %6499  ;;  %v2179_v52 = vadd.f32 1.0, %v6498_v47 }
 0x5e0   : > { %6503 = vrcp.f32 %v2162_v46  ;;  %v2180_v54 = vadd.f32 1.0, %v6500_v51 }
 0x5e1   : > { %6505 = vrcp.f32 %v2179_v52 }
 0x5e2   : > { %6507 = vrcp.f32 %v2180_v54 }
 0x5e8   : > { %v6502_v56 = vpop.eup %6501 }
 0x5e9   : > { %v2228_v59 = vmul.f32 %v6502_v56, %v2222_v55 }
 0x5ea   : > { %v6504_v60 = vpop.eup %6503 }
 0x5eb   : > { %v2232_v61 = vadd.f32 %v2230_v48, %v2228_v59  ;;  %v2229_v62 = vmul.f32 %v6504_v60, %v2225_v49  ;;  %v6506_v58 = vpop.eup %6505  ;;  %v2367_v49 = vld [vmem:[#allocation9 + $0x28] sm:$0xff] }
 0x5ec   : > { %v6508_v2 = vpop.eup %6507  ;;  %v2236_v3 = vsub.f32 1.0, %v6506_v58  ;;  %v2240_v7 = vmul.f32 %v6506_v58, %v7342_v5  ;;  %v2331_v5 = vld [vmem:[#allocation7 + $0x28] sm:$0xff] }
 0x5ed   : > { %6509 = vtanh.f32 %v2232_v61  ;;  %v2233_v57 = vadd.f32 %v2231_v1, %v2229_v62  ;;  %v2237_v63 = vsub.f32 1.0, %v6508_v2  ;;  %v2241_v9 = vmul.f32 %v6508_v2, %v7344_v6 }
 0x5ee   : > { %v2332_v6 = vunpack.c.l.bf16 %v2331_v5  ;;  %v2333_v25 = vunpack.c.h.bf16 %v2331_v5 }
 0x5ef   : > { %6511 = vtanh.f32 %v2233_v57  ;;  %v2411_v57 = vunpack.c.l.bf16 %v2367_v49 }
 0x5f7   : > { %v6510_v4 = vpop.eup %6509 }
 0x5f8   : > { %v2238_v0 = vmul.f32 %v6510_v4, %v2236_v3 }
 0x5f9   : > { %v6512_v8 = vpop.eup %6511 }
 0x5fa   : > { %v2239_v10 = vmul.f32 %v6512_v8, %v2237_v63  ;;  %v7373_v11 = vadd.f32 %v2240_v7, %v2238_v0  ;;  %v2412_v7 = vunpack.c.h.bf16 %v2367_v49 }
 0x5fc   : > { %v7375_v12 = vadd.f32 %v2241_v9, %v2239_v10 }
 0x5fe   : > { %v2244_v13 = vpack.c.bf16 %v7375_v12, %v7373_v11 }
 0x600   : > { %6002 = vmatmul.mubr.msk.bf16.vlgmr.msra.gmra.mrb[44].mxu1 %vm1231_vm2, %v2244_v13  ;;  %6010 = vmatmul.mubr.msk.bf16.vlgmr.msra.gmra.mrb[32].mxu0 %vm1231_vm2, %v2244_v13 }
 0x601   : > { %6014 = vmatpush3.bf16.msra.mxu1 %v7179_v39  ;;  %6017 = vmatprep.mubr.msk.bf16.mxu1 %vm6859_vm1, %v6858_v32 }
 0x602   : > { %6015 = vmatprep.subr.bf16.mxu1 %v6858_v32  ;;  %6022 = vmatpush3.bf16.msra.mxu0 %v7128_v24 }
 0x603   : > { %6023 = vmatprep.subr.bf16.mxu0 %v6858_v32  ;;  %6025 = vmatprep.mubr.msk.bf16.mxu0 %vm6859_vm1, %v6858_v32 }
 0x605   : > { %6016 = vmatpush3.bf16.msra.mxu1 %v7188_v40 }
 0x606   : > { %6029 = vmatprep.subr.bf16.mxu1 %v6858_v32  ;;  %6024 = vmatpush3.bf16.msra.mxu0 %v7136_v27 }
 0x607   : > { %6037 = vmatprep.subr.bf16.mxu0 %v6858_v32 }
 0x608   : > { %6018 = vmatmul.mubr.msk.bf16.vlgmr.msra.gmra.mrb[48].mxu1 %vm1231_vm2, %v2244_v13 }
 0x609   : > { %6030 = vmatpush3.bf16.msra.mxu1 %v7171_v37  ;;  %6033 = vmatprep.mubr.msk.bf16.mxu1 %vm6859_vm1, %v6858_v32 }
 0x60a   : > { %6031 = vmatprep.subr.bf16.mxu1 %v6858_v32 }
 0x60d   : > { %6032 = vmatpush3.bf16.msra.mxu1 %v7177_v38 }
 0x60e   : > { %6045 = vmatprep.subr.bf16.mxu1 %v6858_v32 }
 0x6d3   : > { %v2282_v15 = vpop.f32.mrb[44].mxu1  ;;  %v2323_v16 = vpop.f32.mrb[32].mxu0 }
 0x6d4   : > { %v2334_v17 = vadd.f32 %v2332_v6, %v2282_v15  ;;  %v6003_v18 = vpop.f32.mrb[45].mxu1  ;;  %v6011_v19 = vpop.f32.mrb[33].mxu0  ;;  %v2352_v35 = vadd.f32 %v2350_v26, %v2323_v16 }
 0x6d5   : > { %v2285_v28 = vpop.f32.mrb[46].mxu1  ;;  %v2326_v29 = vpop.f32.mrb[34].mxu0 }
 0x6d6   : > { %v5543_v30 = vmul.f32 -1.442695, %v2334_v17  ;;  %v2335_v31 = vadd.f32 %v2333_v25, %v2285_v28  ;;  %v6004_v33 = vpop.f32.mrb[47].mxu1  ;;  %v6012_v34 = vpop.f32.mrb[35].mxu0  ;;  %v2353_v42 = vadd.f32 %v2351_v36, %v2326_v29  ;;  %v5545_v43 = vmul.f32 -1.442695, %v2352_v35 }
 0x6d8   : > { %6513 = vpow2.f32 %v5543_v30  ;;  %v5544_v41 = vmul.f32 -1.442695, %v2335_v31  ;;  %v5546_v46 = vmul.f32 -1.442695, %v2353_v42 }
 0x6da   : > { %6515 = vpow2.f32 %v5544_v41 }
 0x6db   : > { %v2402_v44 = vpop.f32.mrb[48].mxu1  ;;  %6517 = vpow2.f32 %v5545_v43 }
 0x6dc   : > { %v6019_v45 = vpop.f32.mrb[49].mxu1  ;;  %6519 = vpow2.f32 %v5546_v46  ;;  %v2403_v61 = vadd.f32 %v7231_v50, %v2402_v44 }
 0x6dd   : > { %v2405_v47 = vpop.f32.mrb[50].mxu1 }
 0x6de   : > { %v6020_v51 = vpop.f32.mrb[51].mxu1  ;;  %v2406_v58 = vadd.f32 %v7231_v50, %v2405_v47 }
 0x6e2   : > { %v6514_v52 = vpop.eup %6513 }
 0x6e3   : > { %v2342_v53 = vadd.f32 1.0, %v6514_v52 }
 0x6e4   : > { %v6516_v54 = vpop.eup %6515 }
 0x6e5   : > { %6521 = vrcp.f32 %v2342_v53  ;;  %v2343_v55 = vadd.f32 1.0, %v6516_v54  ;;  %v6518_v56 = vpop.eup %6517 }
 0x6e6   : > { %v6520_v59 = vpop.eup %6519  ;;  %v2360_v48 = vadd.f32 1.0, %v6518_v56 }
 0x6e7   : > { %6523 = vrcp.f32 %v2343_v55  ;;  %v2361_v60 = vadd.f32 1.0, %v6520_v59 }
 0x6e8   : > { %6525 = vrcp.f32 %v2360_v48 }
 0x6e9   : > { %6527 = vrcp.f32 %v2361_v60  ;;  %v2548_v60 = vld [vmem:[#allocation9 + $0x30] sm:$0xff] }
 0x6ef   : > { %v6522_v62 = vpop.eup %6521 }
 0x6f0   : > { %v2409_v1 = vmul.f32 %v6522_v62, %v2403_v61  ;;  %v7433_v62 = vld [vmem:[%s8199_s24] ss:$0 sm:$0xff] }
 0x6f1   : > { %v6524_v2 = vpop.eup %6523 }
 0x6f2   : > { %v2413_v3 = vadd.f32 %v2411_v57, %v2409_v1  ;;  %v2410_v4 = vmul.f32 %v6524_v2, %v2406_v58  ;;  %v6526_v0 = vpop.eup %6525  ;;  %v2592_v2 = vunpack.c.l.bf16 %v2548_v60 }
 0x6f3   : > { %v6528_v8 = vpop.eup %6527  ;;  %v2417_v9 = vsub.f32 1.0, %v6526_v0  ;;  %v2421_v13 = vmul.f32 %v6526_v0, %v7373_v11  ;;  %v2593_v0 = vunpack.c.h.bf16 %v2548_v60 }
 0x6f4   : > { %6529 = vtanh.f32 %v2413_v3  ;;  %v2414_v63 = vadd.f32 %v2412_v7, %v2410_v4  ;;  %v2418_v5 = vsub.f32 1.0, %v6528_v8  ;;  %v2422_v15 = vmul.f32 %v6528_v8, %v7375_v12  ;;  %v2530_v12 = vld [vmem:[#allocation8 + $0x30] sm:$0xff] }
 0x6f5   : > { %v2531_v30 = vunpack.c.l.bf16 %v2530_v12  ;;  %v2532_v42 = vunpack.c.h.bf16 %v2530_v12 }
 0x6f6   : > { %6531 = vtanh.f32 %v2414_v63 }
 0x6fe   : > { %v6530_v10 = vpop.eup %6529 }
 0x6ff   : > { %v2419_v6 = vmul.f32 %v6530_v10, %v2417_v9 }
 0x700   : > { %v6532_v14 = vpop.eup %6531 }
 0x701   : > { %v2420_v50 = vmul.f32 %v6532_v14, %v2418_v5  ;;  %v7404_v16 = vadd.f32 %v2421_v13, %v2419_v6 }
 0x703   : > { %v7406_v17 = vadd.f32 %v2422_v15, %v2420_v50 }
 0x705   : > { %v2425_v18 = vpack.c.bf16 %v7406_v17, %v7404_v16 }
 0x707   : > { %6026 = vmatmul.mubr.msk.bf16.vlgmr.msra.gmra.mrb[36].mxu0 %vm1231_vm2, %v2425_v18  ;;  %6034 = vmatmul.mubr.msk.bf16.vlgmr.msra.gmra.mrb[52].mxu1 %vm1231_vm2, %v2425_v18 }
 0x708   : > { %6038 = vmatpush3.bf16.msra.mxu0 %v7179_v39  ;;  %6041 = vmatprep.mubr.msk.bf16.mxu0 %vm6859_vm1, %v6858_v32 }
 0x709   : > { %6039 = vmatprep.subr.bf16.mxu0 %v6858_v32  ;;  %6046 = vmatpush3.bf16.msra.mxu1 %v7128_v24  ;;  %v2512_v24 = vld [vmem:[#allocation7 + $0x30] sm:$0xff] }
 0x70a   : > { %6047 = vmatprep.subr.bf16.mxu1 %v6858_v32  ;;  %6049 = vmatprep.mubr.msk.bf16.mxu1 %vm6859_vm1, %v6858_v32  ;;  %v2513_v11 = vunpack.c.l.bf16 %v2512_v24  ;;  %v2514_v29 = vunpack.c.h.bf16 %v2512_v24 }
 0x70c   : > { %6040 = vmatpush3.bf16.msra.mxu0 %v7188_v40 }
 0x70d   : > { %6053 = vmatprep.subr.bf16.mxu0 %v6858_v32  ;;  %6048 = vmatpush3.bf16.msra.mxu1 %v7136_v27 }
 0x70e   : > { %6061 = vmatprep.subr.bf16.mxu1 %v6858_v32 }
 0x70f   : > { %6042 = vmatmul.mubr.msk.bf16.vlgmr.msra.gmra.mrb[40].mxu0 %vm1231_vm2, %v2425_v18 }
 0x710   : > { %6054 = vmatpush3.bf16.msra.mxu0 %v7171_v37  ;;  %6057 = vmatprep.mubr.msk.bf16.mxu0 %vm6859_vm1, %v6858_v32 }
 0x711   : > { %6055 = vmatprep.subr.bf16.mxu0 %v6858_v32 }
 0x714   : > { %6056 = vmatpush3.bf16.msra.mxu0 %v7177_v38 }
 0x7da   : > { %v2463_v19 = vpop.f32.mrb[36].mxu0  ;;  %v2504_v25 = vpop.f32.mrb[52].mxu1 }
 0x7db   : > { %v2515_v26 = vadd.f32 %v2513_v11, %v2463_v19  ;;  %v6027_v27 = vpop.f32.mrb[37].mxu0  ;;  %v6035_v28 = vpop.f32.mrb[53].mxu1  ;;  %v2533_v41 = vadd.f32 %v2531_v30, %v2504_v25  ;;  %v2711_v25 = vld [vmem:[#allocation8 + $0x38] sm:$0xff] }
 0x7dc   : > { %v2466_v31 = vpop.f32.mrb[38].mxu0  ;;  %v2507_v33 = vpop.f32.mrb[54].mxu1 }
 0x7dd   : > { %v5550_v37 = vmul.f32 -1.442695, %v2515_v26  ;;  %v2516_v34 = vadd.f32 %v2514_v29, %v2466_v31  ;;  %v6028_v35 = vpop.f32.mrb[39].mxu0  ;;  %v6036_v36 = vpop.f32.mrb[55].mxu1  ;;  %v2534_v43 = vadd.f32 %v2532_v42, %v2507_v33  ;;  %v5552_v44 = vmul.f32 -1.442695, %v2533_v41 }
 0x7de   : > { %v2712_v33 = vunpack.c.l.bf16 %v2711_v25 }
 0x7df   : > { %6533 = vpow2.f32 %v5550_v37  ;;  %v5551_v38 = vmul.f32 -1.442695, %v2516_v34  ;;  %v5553_v47 = vmul.f32 -1.442695, %v2534_v43 }
 0x7e1   : > { %6535 = vpow2.f32 %v5551_v38 }
 0x7e2   : > { %v2583_v45 = vpop.f32.mrb[40].mxu0  ;;  %6537 = vpow2.f32 %v5552_v44 }
 0x7e3   : > { %v6043_v46 = vpop.f32.mrb[41].mxu0  ;;  %6539 = vpow2.f32 %v5553_v47  ;;  %v2584_v1 = vadd.f32 %v7433_v62, %v2583_v45 }
 0x7e4   : > { %v2586_v51 = vpop.f32.mrb[42].mxu0 }
 0x7e5   : > { %v6044_v52 = vpop.f32.mrb[43].mxu0  ;;  %v2587_v3 = vadd.f32 %v7433_v62, %v2586_v51 }
 0x7e9   : > { %v6534_v53 = vpop.eup %6533 }
 0x7ea   : > { %v2523_v54 = vadd.f32 1.0, %v6534_v53 }
 0x7eb   : > { %v6536_v55 = vpop.eup %6535 }
 0x7ec   : > { %6541 = vrcp.f32 %v2523_v54  ;;  %v2524_v56 = vadd.f32 1.0, %v6536_v55  ;;  %v6538_v59 = vpop.eup %6537 }
 0x7ed   : > { %v6540_v48 = vpop.eup %6539  ;;  %v2541_v49 = vadd.f32 1.0, %v6538_v59 }
 0x7ee   : > { %6543 = vrcp.f32 %v2524_v56  ;;  %v2542_v61 = vadd.f32 1.0, %v6540_v48 }
 0x7ef   : > { %6545 = vrcp.f32 %v2541_v49  ;;  %v2729_v49 = vld [vmem:[#allocation9 + $0x38] sm:$0xff] }
 0x7f0   : > { %6547 = vrcp.f32 %v2542_v61 }
 0x7f6   : > { %v6542_v57 = vpop.eup %6541 }
 0x7f7   : > { %v2590_v58 = vmul.f32 %v6542_v57, %v2584_v1 }
 0x7f8   : > { %v6544_v4 = vpop.eup %6543 }
 0x7f9   : > { %v2594_v7 = vadd.f32 %v2592_v2, %v2590_v58  ;;  %v2591_v63 = vmul.f32 %v6544_v4, %v2587_v3  ;;  %v6546_v9 = vpop.eup %6545  ;;  %v2773_v58 = vunpack.c.l.bf16 %v2729_v49 }
 0x7fa   : > { %v6548_v10 = vpop.eup %6547  ;;  %v2598_v13 = vsub.f32 1.0, %v6546_v9  ;;  %v2602_v6 = vmul.f32 %v6546_v9, %v7404_v16  ;;  %v2693_v16 = vld [vmem:[#allocation7 + $0x38] sm:$0xff] }
 0x7fb   : > { %6549 = vtanh.f32 %v2594_v7  ;;  %v2595_v8 = vadd.f32 %v2593_v0, %v2591_v63  ;;  %v2599_v14 = vsub.f32 1.0, %v6548_v10  ;;  %v2603_v18 = vmul.f32 %v6548_v10, %v7406_v17 }
 0x7fc   : > { %v2694_v17 = vunpack.c.l.bf16 %v2693_v16  ;;  %v2695_v31 = vunpack.c.h.bf16 %v2693_v16  ;;  %v2774_v63 = vunpack.c.h.bf16 %v2729_v49  ;;  %v6861_v16 = vmov 0.0  }
 0x7fd   : > { %6551 = vtanh.f32 %v2595_v8  ;;  %6069 = vmatprep.subr.bf16.mxu0 %v6861_v16 }
 0x805   : > { %v6550_v5 = vpop.eup %6549 }
 0x806   : > { %v2600_v15 = vmul.f32 %v6550_v5, %v2598_v13 }
 0x807   : > { %v6552_v50 = vpop.eup %6551 }
 0x808   : > { %v2601_v24 = vmul.f32 %v6552_v50, %v2599_v14  ;;  %v7439_v11 = vadd.f32 %v2602_v6, %v2600_v15 }
 0x80a   : > { %v7441_v12 = vadd.f32 %v2603_v18, %v2601_v24 }
 0x80c   : > { %v2606_v19 = vpack.c.bf16 %v7441_v12, %v7439_v11 }
 0x80e   : > { %6050 = vmatmul.mubr.msk.bf16.vlgmr.msra.gmra.mrb[56].mxu1 %vm1231_vm2, %v2606_v19  ;;  %6058 = vmatmul.mubr.msk.bf16.vlgmr.msra.gmra.mrb[44].mxu0 %vm1231_vm2, %v2606_v19 }
 0x80f   : > { %6062 = vmatpush3.bf16.msra.mxu1 %v7179_v39  ;;  %6065 = vmatprep.mubr.msk.bf16.mxu1 %vm6859_vm1, %v6858_v32 }
 0x810   : > { %6063 = vmatprep.subr.bf16.mxu1 %v6858_v32  ;;  %6073 = vmatprep.mubr.msk.bf16.mxu0 %vm6862_vm3, %v6861_v16 }
 0x813   : > { %6064 = vmatpush3.bf16.msra.mxu1 %v7188_v40  ;;  %v2713_v40 = vunpack.c.h.bf16 %v2711_v25  ;;  %v6576_v25 = vld [vmem:[%s8200_s8] sm:$0xff]  }
 0x814   : > { %6077 = vmatprep.subr.bf16.mxu1 %v6861_v16  ;;  %6070 = vmatpush3.bf16.msra.mxu0 %v6576_v25 }
 0x815   : > { %6071 = vmatprep.subr.bf16.mxu0 %v6861_v16 }
 0x816   : > { %6066 = vmatmul.mubr.msk.bf16.vlgmr.msra.gmra.mrb[60].mxu1 %vm1231_vm2, %v2606_v19  ;;  %v6574_v19 = vld [vmem:[%s8137_s10] sm:$0xff]  }
 0x817   : > { %6078 = vmatpush3.bf16.msra.mxu1 %v6574_v19  ;;  %6081 = vmatprep.mubr.msk.bf16.mxu1 %vm6862_vm3, %v6861_v16 }
 0x818   : > { %6079 = vmatprep.subr.bf16.mxu1 %v6861_v16 }
 0x8e1   : > { %v2644_v26 = vpop.f32.mrb[56].mxu1  ;;  %v2685_v27 = vpop.f32.mrb[44].mxu0 }
 0x8e2   : > { %v2696_v28 = vadd.f32 %v2694_v17, %v2644_v26  ;;  %v6051_v29 = vpop.f32.mrb[57].mxu1  ;;  %v6059_v30 = vpop.f32.mrb[45].mxu0  ;;  %v2714_v41 = vadd.f32 %v2712_v33, %v2685_v27  ;;  %v6577_v27 = vld [vmem:[%s8200_s8 + $0x8] sm:$0xff]  }
 0x8e3   : > { %v2647_v39 = vpop.f32.mrb[58].mxu1  ;;  %v2688_v37 = vpop.f32.mrb[46].mxu0  ;;  %6072 = vmatpush3.bf16.msra.mxu0 %v6577_v27  ;;  %v2940_v29 = vld [vmem:[%s7110_s2 + $0x8] sm:$0xff]  ;;  %v5566_v30 = vld [vmem:[%s8138_s11] ss:$0 sm:$0xff] }
 0x8e4   : > { %v5557_v34 = vmul.f32 -1.442695, %v2696_v28  ;;  %v2697_v35 = vadd.f32 %v2695_v31, %v2647_v39  ;;  %v6052_v36 = vpop.f32.mrb[59].mxu1  ;;  %v6060_v32 = vpop.f32.mrb[47].mxu0  ;;  %v2715_v38 = vadd.f32 %v2713_v40, %v2688_v37  ;;  %v5559_v43 = vmul.f32 -1.442695, %v2714_v41 }
 0x8e5   : > { %v2939_v28 = vld [vmem:[%s7110_s2] sm:$0xff] }
 0x8e6   : > { %6553 = vpow2.f32 %v5557_v34  ;;  %v5558_v42 = vmul.f32 -1.442695, %v2697_v35  ;;  %v5560_v46 = vmul.f32 -1.442695, %v2715_v38 }
 0x8e8   : > { %6555 = vpow2.f32 %v5558_v42 }
 0x8e9   : > { %v2764_v44 = vpop.f32.mrb[60].mxu1  ;;  %6557 = vpow2.f32 %v5559_v43 }
 0x8ea   : > { %v6067_v45 = vpop.f32.mrb[61].mxu1  ;;  %6559 = vpow2.f32 %v5560_v46  ;;  %v2765_v61 = vadd.f32 %v7433_v62, %v2764_v44  ;;  %v2924_v46 = vld [vmem:[%s7115_s29] sm:$0xff] }
 0x8eb   : > { %v2767_v47 = vpop.f32.mrb[62].mxu1  ;;  %v5562_v45 = vld [vmem:[%s8136_s9] ss:$0 sm:$0xff] }
 0x8ec   : > { %v6068_v51 = vpop.f32.mrb[63].mxu1  ;;  %v2768_v2 = vadd.f32 %v7433_v62, %v2767_v47 }
 0x8f0   : > { %v6554_v52 = vpop.eup %6553 }
 0x8f1   : > { %v2704_v53 = vadd.f32 1.0, %v6554_v52  ;;  %v2925_v52 = vld [vmem:[%s7115_s29 + $0x8] sm:$0xff] }
 0x8f2   : > { %v6556_v54 = vpop.eup %6555 }
 0x8f3   : > { %6561 = vrcp.f32 %v2704_v53  ;;  %v2705_v55 = vadd.f32 1.0, %v6556_v54  ;;  %v6558_v56 = vpop.eup %6557 }
 0x8f4   : > { %v6560_v59 = vpop.eup %6559  ;;  %v2722_v48 = vadd.f32 1.0, %v6558_v56 }
 0x8f5   : > { %6563 = vrcp.f32 %v2705_v55  ;;  %v2723_v60 = vadd.f32 1.0, %v6560_v59 }
 0x8f6   : > { %6565 = vrcp.f32 %v2722_v48 }
 0x8f7   : > { %6567 = vrcp.f32 %v2723_v60 }
 0x8fd   : > { %v6562_v1 = vpop.eup %6561 }
 0x8fe   : > { %v2771_v57 = vmul.f32 %v6562_v1, %v2765_v61 }
 0x8ff   : > { %v6564_v3 = vpop.eup %6563 }
 0x900   : > { %v2775_v4 = vadd.f32 %v2773_v58, %v2771_v57  ;;  %v2772_v7 = vmul.f32 %v6564_v3, %v2768_v2  ;;  %v6566_v8 = vpop.eup %6565 }
 0x901   : > { %v6568_v9 = vpop.eup %6567  ;;  %v2779_v10 = vsub.f32 1.0, %v6566_v8  ;;  %v2783_v5 = vmul.f32 %v6566_v8, %v7439_v11  ;;  %v6575_v11 = vld [vmem:[%s8137_s10 + $0x8] sm:$0xff]  }
 0x902   : > { %6569 = vtanh.f32 %v2775_v4  ;;  %v2776_v0 = vadd.f32 %v2774_v63, %v2772_v7  ;;  %v2780_v6 = vsub.f32 1.0, %v6568_v9  ;;  %v2784_v50 = vmul.f32 %v6568_v9, %v7441_v12  ;;  %6080 = vmatpush3.bf16.msra.mxu1 %v6575_v11 }
 0x904   : > { %6571 = vtanh.f32 %v2776_v0 }
 0x90c   : > { %v6570_v13 = vpop.eup %6569 }
 0x90d   : > { %v2781_v14 = vmul.f32 %v6570_v13, %v2779_v10 }
 0x90e   : > { %v6572_v15 = vpop.eup %6571 }
 0x90f   : > { %v2785_v62 = vadd.f32 %v2783_v5, %v2781_v14  ;;  %v2782_v18 = vmul.f32 %v6572_v15, %v2780_v6 }
 0x911   : > { %2787 = vst.msk [vmem:[#allocation2] sm:$0xff] %vm1231_vm2, %v2785_v62  ;;  %v2786_v24 = vadd.f32 %v2784_v50, %v2782_v18 }
 0x913   : > { %2788 = vst.msk [vmem:[#allocation2 + $0x8] sm:$0xff] %vm1231_vm2, %v2786_v24 }
 0x918   : > { %v2789_v12 = vld [vmem:[#allocation2] sm:$0xff] }
 0x91a   : > { %v2790_v17 = vld [vmem:[#allocation2 + $0x8] sm:$0xff] }
 0x91b   : > { %v2795_v26 = vpack.c.bf16 %v2790_v17, %v2789_v12 }
 0x91d   : > { %6082 = vmatmul.mubr.msk.bf16.vlgmr.msra.gmra.mrb[64].mxu1 %vm1231_vm2, %v2795_v26  ;;  %6074 = vmatmul.mubr.msk.bf16.vlgmr.msra.gmra.mrb[48].mxu0 %vm1231_vm2, %v2795_v26 }
 0x9f0   : > { %v2917_v31 = vpop.f32.mrb[64].mxu1  ;;  %v2853_v32 = vpop.f32.mrb[48].mxu0 }
 0x9f1   : > { %v2918_v33 = vadd.f32 %v5566_v30, %v2917_v31  ;;  %v6083_v39 = vpop.f32.mrb[65].mxu1  ;;  %v6075_v41 = vpop.f32.mrb[49].mxu0  ;;  %v2854_v47 = vadd.f32 %v5562_v45, %v2853_v32 }
 0x9f2   : > { %v2920_v37 = vpop.f32.mrb[66].mxu1  ;;  %v2856_v38 = vpop.f32.mrb[50].mxu0 }
 0x9f3   : > { %v2926_v34 = vmul.f32 0.5, %v2918_v33  ;;  %v2921_v35 = vadd.f32 %v5566_v30, %v2920_v37  ;;  %v6084_v36 = vpop.f32.mrb[67].mxu1  ;;  %v6076_v43 = vpop.f32.mrb[51].mxu0  ;;  %v2857_v56 = vadd.f32 %v5562_v45, %v2856_v38 }
 0x9f5   : > { %v2928_v40 = vmul.f32 1.442695, %v2926_v34  ;;  %v2927_v42 = vmul.f32 0.5, %v2921_v35 }
 0x9f7   : > { %6578 = vpow2.f32 %v2928_v40  ;;  %v2930_v44 = vmul.f32 1.442695, %v2927_v42 }
 0x9f9   : > { %6580 = vpow2.f32 %v2930_v44 }
 0xa01   : > { %v6579_v51 = vpop.eup %6578 }
 0xa02   : > { %v2932_v53 = vmul.f32 %v6579_v51, %v2924_v46 }
 0xa03   : > { %v6581_v54 = vpop.eup %6580 }
 0xa04   : > { %v2934_v55 = vadd.f32 %v2932_v53, %v2854_v47  ;;  %v2933_v59 = vmul.f32 %v6581_v54, %v2925_v52 }
 0xa06   : > { %2937 = vst.msk [vmem:[%s7120_s22] sm:$0xff] %vm1101_vm0, %v2934_v55  ;;  %v2935_v48 = vadd.f32 %v2933_v59, %v2857_v56 }
 0xa08   : > { %2938 = vst.msk [vmem:[%s7120_s22 + $0x8] sm:$0xff] %vm1101_vm0, %v2935_v48 }
 0xa09   : > { %v2944_v49 = vld [vmem:[%s8140_s13] sm:$0xf]  ;;  %vm2950_vm4 = vcmask 1043456   ;;  %v6863_v61 = vmov 0.0   ;;  %v2945_v58 = vpack.c.bf16 %v2940_v29, %v2939_v28  ;;  %vm2946_vm5 = vcmask 64512   ;;  %s6865_s28 = smov 96  }
 0xa0a   : > { %v3056_v60 = vld [vmem:[%s8144_s17] sm:$0xf]  ;;  %6085 = vmatprep.subr.bf16.mxu0 %v6863_v61  ;;  %v2952_v1 = vsel %vm2950_vm4, %v2944_v49, 0  ;;  %6091 = vmatprep.subr.bf16.mxu1 %v6863_v61  ;;  %vm6864_vm6 = vmmov 0   ;;  %v2943_v4 = vpack.c.bf16 %v2935_v48, %v2934_v55  ;;  %v7513_v63 = vcombine.low %v7090_v20, %v7095_v21  ;;  %v6585_v21 = vld [vmem:[%s7124_s1] sm:$0xff]   ;;  %s6866_s2 = smov 64  }
 0xa0b   : > { %v3058_v57 = vsel %vm2950_vm4, %v3056_v60, 0  ;;  %6086 = vmatpush3.bf16.msra.mxu0 %v2952_v1  ;;  %v6582_v2 = vld [vmem:[%s8139_s12] sm:$0xff]   ;;  %6087 = vmatprep.mubr.msk.bf16.mxu0 %vm6864_vm6, %v6863_v61  ;;  %v7524_v20 = vcombine.low %v7100_v22, %v7105_v23  ;;  %v6586_v22 = vld [vmem:[%s7124_s1 + $0x8] sm:$0xff]   ;;  %v6588_v0 = vld [vmem:[%s7124_s1 + $0x18] sm:$0xff]   ;;  %s8202_s6 = sld [smem:[#allocation26_spill]] }
 0xa0c   : > { %v6583_v3 = vld [vmem:[%s8143_s16] sm:$0xff]   ;;  %6093 = vmatprep.mubr.msk.bf16.mxu1 %vm6864_vm6, %v6863_v61  ;;  %6092 = vmatpush3.bf16.msra.mxu1 %v6582_v2  ;;  %v6589_v8 = vld [vmem:[%s7124_s1 + $0x20] sm:$0xff]   ;;  %v6590_v9 = vld [vmem:[%s7124_s1 + $0x28] sm:$0xff]  }
 0xa0d   : > { %6097 = vmatprep.subr.bf16.mxu0 %v6863_v61  ;;  %v6584_v7 = vld [vmem:[%s8142_s15] sm:$0xff]   ;;  %6103 = vmatprep.subr.bf16.mxu1 %v6863_v61  ;;  %v6592_v13 = vld [vmem:[%s7124_s1 + $0x38] sm:$0xff]  }
 0xa0e   : > { %6088 = vmatmul.mubr.msk.bf16.vlgmr.msra.gmra.mrb[52].mxu0 %vm2946_vm5, %v2945_v58  ;;  %3504 = vrot.lane.b32.xlu0 %v7513_v63, %s6865_s28  ;;  %v6587_v23 = vld [vmem:[%s7124_s1 + $0x10] sm:$0xff]  }
 0xa0f   : > { %6098 = vmatpush3.bf16.msra.mxu0 %v3058_v57  ;;  %6099 = vmatprep.mubr.msk.bf16.mxu0 %vm6864_vm6, %v6863_v61  ;;  %v6591_v10 = vld [vmem:[%s7124_s1 + $0x30] sm:$0xff]   ;;  %s8201_s1 = sld [smem:[#allocation36_spill]] }
 0xa10   : > { %6094 = vmatmul.mubr.msk.bf16.vlgmr.msra.gmra.mrb[68].mxu1 %vm1101_vm0, %v2943_v4  ;;  %6109 = vmatprep.subr.bf16.mxu0 %v6584_v7  ;;  %v5573_v16 = vld [vmem:[%s8141_s14] ss:$0 sm:$0xff] }
 0xa11   : > { %6104 = vmatpush3.bf16.msra.mxu1 %v6583_v3  ;;  %6105 = vmatprep.mubr.msk.bf16.mxu1 %vm6864_vm6, %v6863_v61  ;;  %v5577_v39 = vld [vmem:[%s8145_s18] ss:$0 sm:$0xff]  ;;  %s5288_s25 = scalar_lea.sflag [#allocation6], %s8202_s6 }
 0xa12   : > { %6127 = vmatprep.subr.bf16.mxu1 %v6863_v61  ;;  %3592 = vrot.lane.b32.xlu1 %v7513_v63, %s6866_s2 }
 0xa13   : > { %3506 = vrot.lane.b32.xlu0 %v7524_v20, %s6865_s28 }
 0xa16   : > { %6100 = vmatmul.mubr.msk.bf16.vlgmr.msra.gmra.mrb[56].mxu0 %vm2946_vm5, %v2945_v58  ;;  %3594 = vrot.lane.b32.xlu1 %v7524_v20, %s6866_s2 }
 0xa17   : > { %6110 = vmatpush3.bf16.msra.mxu0 %v6584_v7  ;;  %6111 = vmatprep.mubr.msk.bf16.mxu0 %vm1101_vm0, %v6585_v21 }
 0xa18   : > { %6106 = vmatmul.mubr.msk.bf16.vlgmr.msra.gmra.mrb[72].mxu1 %vm1101_vm0, %v2943_v4  ;;  %6159 = vmatprep.subr.bf16.mxu0 %v6863_v61 }
 0xa19   : > { %6128 = vmatpush3.bf16.msra.mxu1 %v7513_v63  ;;  %6131 = vmatprep.mubr.msk.bf16.mxu1 %vm6864_vm6, %v6863_v61 }
 0xa1a   : > { %6129 = vmatprep.subr.bf16.mxu1 %v6863_v61 }
 0xa1d   : > { %6130 = vmatpush3.bf16.msra.mxu1 %v7524_v20 }
 0xa1e   : > { %6112 = vmatmul.mubr.msk.bf16.vlgmr.msra.gmra.mrb[60].mxu0 %vm1101_vm0, %v6586_v22  ;;  %6135 = vmatprep.subr.bf16.mxu1 %v6863_v61 }
 0xa1f   : > { %6115 = vmatprep.mubr.msk.bf16.mxu0 %vm1101_vm0, %v6587_v23 }
 0xa26   : > { %6116 = vmatmul.mubr.msk.bf16.gmra.mrb[64].mxu0 %vm1101_vm0, %v6588_v0 }
 0xa27   : > { %6119 = vmatprep.mubr.msk.bf16.mxu0 %vm1101_vm0, %v6589_v8 }
 0xa2e   : > { %6120 = vmatmul.mubr.msk.bf16.gmra.mrb[68].mxu0 %vm1101_vm0, %v6590_v9 }
 0xa2f   : > { %6123 = vmatprep.mubr.msk.bf16.mxu0 %vm1101_vm0, %v6591_v10 }
 0xa36   : > { %6124 = vmatmul.mubr.msk.bf16.gmra.mrb[72].mxu0 %vm1101_vm0, %v6592_v13 }
 0xa37   : > { %6163 = vmatprep.mubr.msk.bf16.mxu0 %vm6864_vm6, %v6863_v61 }
 0xa80   : > { %v7560_v5 = vpop.permute.xlu0 %3504 }
 0xa81   : > { %6160 = vmatpush3.bf16.msra.mxu0 %v7560_v5 }
 0xa82   : > { %6161 = vmatprep.subr.bf16.mxu0 %v6863_v61 }
 0xa84   : > { %v7587_v40 = vpop.permute.xlu1 %3592 }
 0xa85   : > { %v7564_v6 = vpop.permute.xlu0 %3506 }
 0xa86   : > { %6162 = vmatpush3.bf16.msra.mxu0 %v7564_v6 }
 0xa87   : > { %6175 = vmatprep.subr.bf16.mxu0 %v6863_v61 }
 0xa88   : > { %v7601_v53 = vpop.permute.xlu1 %3594 }
 0xae1   : > { %v2988_v14 = vpop.f32.mrb[52].mxu0 }
 0xae2   : > { %v6089_v15 = vpop.f32.mrb[53].mxu0 }
 0xae3   : > { %v3038_v50 = vpop.f32.mrb[68].mxu1  ;;  %v2991_v62 = vpop.f32.mrb[54].mxu0 }
 0xae4   : > { %v3039_v18 = vadd.f32 %v3038_v50, %v2988_v14  ;;  %v6095_v24 = vpop.f32.mrb[69].mxu1  ;;  %v6090_v19 = vpop.f32.mrb[55].mxu0 }
 0xae5   : > { %v3041_v11 = vpop.f32.mrb[70].mxu1 }
 0xae6   : > { %v3042_v12 = vadd.f32 %v3041_v11, %v2991_v62  ;;  %v6096_v17 = vpop.f32.mrb[71].mxu1  ;;  %v7571_v25 = vadd.f32 %v5573_v16, %v3039_v18 }
 0xae8   : > { %v7573_v26 = vadd.f32 %v5573_v16, %v3042_v12 }
 0xae9   : > { %v3094_v27 = vpop.f32.mrb[56].mxu0 }
 0xaea   : > { %v3447_v28 = vpack.c.bf16 %v7573_v26, %v7571_v25  ;;  %v6101_v29 = vpop.f32.mrb[57].mxu0 }
 0xaeb   : > { %v3141_v30 = vpop.f32.mrb[72].mxu1  ;;  %v3097_v31 = vpop.f32.mrb[58].mxu0 }
 0xaec   : > { %6132 = vmatmul.mubr.msk.bf16.vlgmr.msra.gmra.mrb[76].mxu1 %vm1231_vm2, %v3447_v28  ;;  %v3142_v33 = vadd.f32 %v3141_v30, %v3094_v27  ;;  %v6107_v37 = vpop.f32.mrb[73].mxu1  ;;  %v6102_v34 = vpop.f32.mrb[59].mxu0 }
 0xaed   : > { %6136 = vmatpush3.bf16.msra.mxu1 %v7560_v5  ;;  %6139 = vmatprep.mubr.msk.bf16.mxu1 %vm6864_vm6, %v6863_v61  ;;  %v3144_v35 = vpop.f32.mrb[74].mxu1 }
 0xaee   : > { %6137 = vmatprep.subr.bf16.mxu1 %v6863_v61  ;;  %v3145_v36 = vadd.f32 %v3144_v35, %v3097_v31  ;;  %v6108_v32 = vpop.f32.mrb[75].mxu1  ;;  %v7585_v41 = vadd.f32 %v5577_v39, %v3142_v33 }
 0xaf0   : > { %v7590_v42 = vadd.f32 %v5577_v39, %v3145_v36 }
 0xaf1   : > { %6138 = vmatpush3.bf16.msra.mxu1 %v7564_v6  ;;  %v6113_v38 = vpop.f32.mrb[60].mxu0 }
 0xaf2   : > { %6143 = vmatprep.subr.bf16.mxu1 %v6863_v61  ;;  %v3344_v43 = vadd.f32 %v6113_v38, %v7585_v41  ;;  %v3279_v44 = vpop.f32.mrb[61].mxu0 }
 0xaf3   : > { %v3342_v45 = vadd.f32 %v3279_v44, %v7585_v41  ;;  %v6114_v46 = vpop.f32.mrb[62].mxu0 }
 0xaf4   : > { %6140 = vmatmul.mubr.msk.bf16.vlgmr.msra.gmra.mrb[80].mxu1 %vm1231_vm2, %v3447_v28  ;;  %v3345_v47 = vadd.f32 %v6114_v46, %v7590_v42  ;;  %v3282_v51 = vpop.f32.mrb[63].mxu0 }
 0xaf5   : > { %6144 = vmatpush3.bf16.msra.mxu1 %v7587_v40  ;;  %6147 = vmatprep.mubr.msk.bf16.mxu1 %vm6864_vm6, %v6863_v61  ;;  %v3343_v52 = vadd.f32 %v3282_v51, %v7590_v42 }
 0xaf6   : > { %6145 = vmatprep.subr.bf16.mxu1 %v6863_v61  ;;  %v3359_v54 = vpack.c.bf16 %v3345_v47, %v3344_v43 }
 0xaf7   : > { %v3358_v55 = vpack.c.bf16 %v3343_v52, %v3342_v45 }
 0xaf8   : > { %3367 = vst.msk [vmem:[#allocation10 + $0x8] sm:$0xff] %vm1231_vm2, %v3359_v54 }
 0xaf9   : > { %6146 = vmatpush3.bf16.msra.mxu1 %v7601_v53  ;;  %3366 = vst.msk [vmem:[#allocation10] sm:$0xff] %vm1231_vm2, %v3358_v55  ;;  %v6117_v56 = vpop.f32.mrb[64].mxu0  ;;  %3414 = vrot.lane.b32.xlu1 %v3358_v55, %s6866_s2 }
 0xafa   : > { %v3348_v59 = vadd.f32 %v6117_v56, %v7585_v41  ;;  %3382 = vrot.lane.b32.xlu0 %v3358_v55, %s6865_s28  ;;  %v3295_v48 = vpop.f32.mrb[65].mxu0  ;;  %6151 = vmatprep.subr.bf16.mxu1 %v6863_v61 }
 0xafb   : > { %v3346_v49 = vadd.f32 %v3295_v48, %v7585_v41  ;;  %v6118_v60 = vpop.f32.mrb[66].mxu0 }
 0xafc   : > { %6148 = vmatmul.mubr.msk.bf16.vlgmr.msra.gmra.mrb[84].mxu1 %vm1231_vm2, %v3447_v28  ;;  %v3349_v1 = vadd.f32 %v6118_v60, %v7590_v42  ;;  %v3298_v57 = vpop.f32.mrb[67].mxu0 }
 0xafd   : > { %v3347_v58 = vadd.f32 %v3298_v57, %v7590_v42  ;;  %3416 = vrot.lane.b32.xlu1 %v3359_v54, %s6866_s2  ;;  %6152 = vmatpush3.bf16.msra.mxu1 %v7513_v63 }
 0xafe   : > { %v3361_v2 = vpack.c.bf16 %v3349_v1, %v3348_v59  ;;  %3384 = vrot.lane.b32.xlu0 %v3359_v54, %s6865_s28  ;;  %6153 = vmatprep.subr.bf16.mxu1 %v6863_v61 }
 0xaff   : > { %v3360_v3 = vpack.c.bf16 %v3347_v58, %v3346_v49  ;;  %6155 = vmatprep.mubr.msk.bf16.mxu1 %vm6864_vm6, %v6863_v61 }
 0xb00   : > { %3369 = vst.msk [vmem:[#allocation10 + $0x18] sm:$0xff] %vm1231_vm2, %v3361_v2  ;;  %v3551_v43 = vld [vmem:[#allocation10] sm:$0xff] }
 0xb01   : > { %3368 = vst.msk [vmem:[#allocation10 + $0x10] sm:$0xff] %vm1231_vm2, %v3360_v3  ;;  %v6121_v4 = vpop.f32.mrb[68].mxu0  ;;  %3418 = vrot.lane.b32.xlu1 %v3360_v3, %s6866_s2  ;;  %6154 = vmatpush3.bf16.msra.mxu1 %v7524_v20  ;;  %v3552_v44 = vunpack.c.l.bf16 %v3551_v43  ;;  %v3553_v51 = vunpack.c.h.bf16 %v3551_v43 }
 0xb02   : > { %v3352_v7 = vadd.f32 %v6121_v4, %v7585_v41  ;;  %3386 = vrot.lane.b32.xlu0 %v3360_v3, %s6865_s28  ;;  %v3311_v21 = vpop.f32.mrb[69].mxu0  ;;  %6167 = vmatprep.subr.bf16.mxu1 %v6863_v61 }
 0xb03   : > { %v3350_v22 = vadd.f32 %v3311_v21, %v7585_v41  ;;  %v6122_v23 = vpop.f32.mrb[70].mxu0 }
 0xb04   : > { %v3353_v0 = vadd.f32 %v6122_v23, %v7590_v42  ;;  %v3314_v8 = vpop.f32.mrb[71].mxu0 }
 0xb05   : > { %v3351_v9 = vadd.f32 %v3314_v8, %v7590_v42  ;;  %3420 = vrot.lane.b32.xlu1 %v3361_v2, %s6866_s2 }
 0xb06   : > { %v3363_v10 = vpack.c.bf16 %v3353_v0, %v3352_v7  ;;  %3388 = vrot.lane.b32.xlu0 %v3361_v2, %s6865_s28 }
 0xb07   : > { %v3362_v13 = vpack.c.bf16 %v3351_v9, %v3350_v22 }
 0xb08   : > { %3371 = vst.msk [vmem:[#allocation10 + $0x28] sm:$0xff] %vm1231_vm2, %v3363_v10 }
 0xb09   : > { %3370 = vst.msk [vmem:[#allocation10 + $0x20] sm:$0xff] %vm1231_vm2, %v3362_v13  ;;  %v6125_v14 = vpop.f32.mrb[72].mxu0  ;;  %3422 = vrot.lane.b32.xlu1 %v3362_v13, %s6866_s2 }
 0xb0a   : > { %v3356_v15 = vadd.f32 %v6125_v14, %v7585_v41  ;;  %3390 = vrot.lane.b32.xlu0 %v3362_v13, %s6865_s28  ;;  %v3327_v50 = vpop.f32.mrb[73].mxu0 }
 0xb0b   : > { %v3354_v62 = vadd.f32 %v3327_v50, %v7585_v41  ;;  %v6126_v18 = vpop.f32.mrb[74].mxu0  ;;  %v7668_v50 = vld [vmem:[%s8147_s20] ss:$0 sm:$0xff] }
 0xb0c   : > { %v3357_v24 = vadd.f32 %v6126_v18, %v7590_v42  ;;  %v3330_v19 = vpop.f32.mrb[75].mxu0 }
 0xb0d   : > { %v3355_v16 = vadd.f32 %v3330_v19, %v7590_v42  ;;  %3424 = vrot.lane.b32.xlu1 %v3363_v10, %s6866_s2 }
 0xb0e   : > { %v3365_v11 = vpack.c.bf16 %v3357_v24, %v3356_v15  ;;  %3392 = vrot.lane.b32.xlu0 %v3363_v10, %s6865_s28 }
 0xb0f   : > { %v3364_v12 = vpack.c.bf16 %v3355_v16, %v3354_v62 }
 0xb10   : > { %3373 = vst.msk [vmem:[#allocation10 + $0x38] sm:$0xff] %vm1231_vm2, %v3365_v11 }
 0xb11   : > { %3372 = vst.msk [vmem:[#allocation10 + $0x30] sm:$0xff] %vm1231_vm2, %v3364_v12  ;;  %3426 = vrot.lane.b32.xlu1 %v3364_v12, %s6866_s2 }
 0xb12   : > { %3394 = vrot.lane.b32.xlu0 %v3364_v12, %s6865_s28 }
 0xb15   : > { %3428 = vrot.lane.b32.xlu1 %v3365_v11, %s6866_s2 }
 0xb16   : > { %3396 = vrot.lane.b32.xlu0 %v3365_v11, %s6865_s28 }
 0xb6b   : > { %v3415_v17 = vpop.permute.xlu1 %3414 }
 0xb6c   : > { %3438 = vst.msk [vmem:[#allocation12] sm:$0xff] %vm1231_vm2, %v3415_v17  ;;  %v3383_v27 = vpop.permute.xlu0 %3382 }
 0xb6d   : > { %3406 = vst.msk [vmem:[#allocation11] sm:$0xff] %vm1231_vm2, %v3383_v27 }
 0xb6f   : > { %v3417_v28 = vpop.permute.xlu1 %3416 }
 0xb70   : > { %3439 = vst.msk [vmem:[#allocation12 + $0x8] sm:$0xff] %vm1231_vm2, %v3417_v28  ;;  %v3385_v29 = vpop.permute.xlu0 %3384 }
 0xb71   : > { %3407 = vst.msk [vmem:[#allocation11 + $0x8] sm:$0xff] %vm1231_vm2, %v3385_v29 }
 0xb73   : > { %v3419_v30 = vpop.permute.xlu1 %3418  ;;  %v3585_v24 = vld [vmem:[#allocation12] sm:$0xff] }
 0xb74   : > { %3440 = vst.msk [vmem:[#allocation12 + $0x10] sm:$0xff] %vm1231_vm2, %v3419_v30  ;;  %v3387_v31 = vpop.permute.xlu0 %3386  ;;  %v3568_v54 = vld [vmem:[#allocation11] sm:$0xff]  ;;  %v3641_v17 = vunpack.c.l.bf16 %v3585_v24 }
 0xb75   : > { %3408 = vst.msk [vmem:[#allocation11 + $0x10] sm:$0xff] %vm1231_vm2, %v3387_v31  ;;  %v3569_v49 = vunpack.c.l.bf16 %v3568_v54  ;;  %v3570_v58 = vunpack.c.h.bf16 %v3568_v54  ;;  %v3642_v31 = vunpack.c.h.bf16 %v3585_v24 }
 0xb77   : > { %v3421_v33 = vpop.permute.xlu1 %3420 }
 0xb78   : > { %3441 = vst.msk [vmem:[#allocation12 + $0x18] sm:$0xff] %vm1231_vm2, %v3421_v33  ;;  %v3389_v39 = vpop.permute.xlu0 %3388 }
 0xb79   : > { %3409 = vst.msk [vmem:[#allocation11 + $0x18] sm:$0xff] %vm1231_vm2, %v3389_v39 }
 0xb7b   : > { %v3423_v37 = vpop.permute.xlu1 %3422 }
 0xb7c   : > { %3442 = vst.msk [vmem:[#allocation12 + $0x20] sm:$0xff] %vm1231_vm2, %v3423_v37  ;;  %v3391_v34 = vpop.permute.xlu0 %3390 }
 0xb7d   : > { %3410 = vst.msk [vmem:[#allocation11 + $0x20] sm:$0xff] %vm1231_vm2, %v3391_v34 }
 0xb7f   : > { %v3425_v35 = vpop.permute.xlu1 %3424 }
 0xb80   : > { %3443 = vst.msk [vmem:[#allocation12 + $0x28] sm:$0xff] %vm1231_vm2, %v3425_v35  ;;  %v3393_v36 = vpop.permute.xlu0 %3392 }
 0xb81   : > { %3411 = vst.msk [vmem:[#allocation11 + $0x28] sm:$0xff] %vm1231_vm2, %v3393_v36 }
 0xb83   : > { %v3427_v32 = vpop.permute.xlu1 %3426 }
 0xb84   : > { %3444 = vst.msk [vmem:[#allocation12 + $0x30] sm:$0xff] %vm1231_vm2, %v3427_v32  ;;  %v3395_v41 = vpop.permute.xlu0 %3394 }
 0xb85   : > { %3412 = vst.msk [vmem:[#allocation11 + $0x30] sm:$0xff] %vm1231_vm2, %v3395_v41 }
 0xb87   : > { %v3429_v42 = vpop.permute.xlu1 %3428 }
 0xb88   : > { %3445 = vst.msk [vmem:[#allocation12 + $0x38] sm:$0xff] %vm1231_vm2, %v3429_v42  ;;  %v3397_v38 = vpop.permute.xlu0 %3396 }
 0xb89   : > { %3413 = vst.msk [vmem:[#allocation11 + $0x38] sm:$0xff] %vm1231_vm2, %v3397_v38 }
 0xbbf   : > { %v3497_v45 = vpop.f32.mrb[76].mxu1 }
 0xbc0   : > { %v3554_v46 = vadd.f32 %v3552_v44, %v3497_v45  ;;  %v6133_v47 = vpop.f32.mrb[77].mxu1 }
 0xbc1   : > { %v3500_v52 = vpop.f32.mrb[78].mxu1  ;;  %v3761_v47 = vld [vmem:[#allocation11 + $0x8] sm:$0xff] }
 0xbc2   : > { %v5599_v55 = vmul.f32 -1.442695, %v3554_v46  ;;  %v3555_v56 = vadd.f32 %v3553_v51, %v3500_v52  ;;  %v6134_v59 = vpop.f32.mrb[79].mxu1 }
 0xbc4   : > { %6595 = vpow2.f32 %v5599_v55  ;;  %v5600_v48 = vmul.f32 -1.442695, %v3555_v56 }
 0xbc6   : > { %6597 = vpow2.f32 %v5600_v48  ;;  %v3762_v48 = vunpack.c.l.bf16 %v3761_v47 }
 0xbc7   : > { %v3544_v60 = vpop.f32.mrb[80].mxu1 }
 0xbc8   : > { %v3571_v1 = vadd.f32 %v3569_v49, %v3544_v60  ;;  %v6141_v57 = vpop.f32.mrb[81].mxu1 }
 0xbc9   : > { %v3547_v2 = vpop.f32.mrb[82].mxu1 }
 0xbca   : > { %v5601_v3 = vmul.f32 -1.442695, %v3571_v1  ;;  %v3572_v4 = vadd.f32 %v3570_v58, %v3547_v2  ;;  %v6142_v7 = vpop.f32.mrb[83].mxu1 }
 0xbcc   : > { %6599 = vpow2.f32 %v5601_v3  ;;  %v5602_v21 = vmul.f32 -1.442695, %v3572_v4  ;;  %v3763_v4 = vunpack.c.h.bf16 %v3761_v47 }
 0xbce   : > { %v6596_v22 = vpop.eup %6595  ;;  %6601 = vpow2.f32 %v5602_v21 }
 0xbcf   : > { %v3562_v23 = vadd.f32 1.0, %v6596_v22  ;;  %v3632_v0 = vpop.f32.mrb[84].mxu1 }
 0xbd0   : > { %v6598_v8 = vpop.eup %6597  ;;  %v6149_v9 = vpop.f32.mrb[85].mxu1  ;;  %v3633_v16 = vadd.f32 %v7668_v50, %v3632_v0 }
 0xbd1   : > { %6603 = vrcp.f32 %v3562_v23  ;;  %v3563_v10 = vadd.f32 1.0, %v6598_v8  ;;  %v3635_v13 = vpop.f32.mrb[86].mxu1 }
 0xbd2   : > { %v6150_v14 = vpop.f32.mrb[87].mxu1  ;;  %v3636_v27 = vadd.f32 %v7668_v50, %v3635_v13 }
 0xbd3   : > { %6605 = vrcp.f32 %v3563_v10 }
 0xbd6   : > { %v6600_v15 = vpop.eup %6599 }
 0xbd7   : > { %v3579_v18 = vadd.f32 1.0, %v6600_v15 }
 0xbd8   : > { %v6602_v62 = vpop.eup %6601 }
 0xbd9   : > { %v3580_v19 = vadd.f32 1.0, %v6602_v62  ;;  %6607 = vrcp.f32 %v3579_v18 }
 0xbdb   : > { %v6604_v11 = vpop.eup %6603  ;;  %6609 = vrcp.f32 %v3580_v19 }
 0xbdc   : > { %v3639_v12 = vmul.f32 %v6604_v11, %v3633_v16  ;;  %v3779_v16 = vld [vmem:[#allocation12 + $0x8] sm:$0xff] }
 0xbdd   : > { %v6606_v28 = vpop.eup %6605 }
 0xbde   : > { %v3643_v29 = vadd.f32 %v3641_v17, %v3639_v12  ;;  %v3640_v30 = vmul.f32 %v6606_v28, %v3636_v27  ;;  %v3823_v28 = vunpack.c.l.bf16 %v3779_v16 }
 0xbe0   : > { %6611 = vtanh.f32 %v3643_v29  ;;  %v3644_v33 = vadd.f32 %v3642_v31, %v3640_v30 }
 0xbe2   : > { %6613 = vtanh.f32 %v3644_v33 }
 0xbe3   : > { %v6608_v39 = vpop.eup %6607 }
 0xbe4   : > { %v3647_v34 = vsub.f32 1.0, %v6608_v39  ;;  %v3651_v41 = vmul.f32 %v6608_v39, %v7571_v25  ;;  %v3743_v25 = vld [vmem:[#allocation10 + $0x8] sm:$0xff]  ;;  %v3824_v39 = vunpack.c.h.bf16 %v3779_v16 }
 0xbe5   : > { %v6610_v37 = vpop.eup %6609  ;;  %v3745_v59 = vunpack.c.h.bf16 %v3743_v25 }
 0xbe6   : > { %v3648_v36 = vsub.f32 1.0, %v6610_v37  ;;  %v3652_v43 = vmul.f32 %v6610_v37, %v7573_v26  ;;  %v3744_v26 = vunpack.c.l.bf16 %v3743_v25 }
 0xbea   : > { %v6612_v35 = vpop.eup %6611 }
 0xbeb   : > { %v3649_v32 = vmul.f32 %v6612_v35, %v3647_v34 }
 0xbec   : > { %v6614_v42 = vpop.eup %6613 }
 0xbed   : > { %v3650_v38 = vmul.f32 %v6614_v42, %v3648_v36  ;;  %v7674_v44 = vadd.f32 %v3651_v41, %v3649_v32 }
 0xbef   : > { %v7676_v45 = vadd.f32 %v3652_v43, %v3650_v38 }
 0xbf1   : > { %v3655_v46 = vpack.c.bf16 %v7676_v45, %v7674_v44 }
 0xbf3   : > { %3656 = vst.msk [vmem:[#allocation13] sm:$0xff] %vm1231_vm2, %v3655_v46  ;;  %6156 = vmatmul.mubr.msk.bf16.vlgmr.msra.gmra.mrb[88].mxu1 %vm1231_vm2, %v3655_v46  ;;  %6164 = vmatmul.mubr.msk.bf16.vlgmr.msra.gmra.mrb[76].mxu0 %vm1231_vm2, %v3655_v46 }
 0xbf4   : > { %6168 = vmatpush3.bf16.msra.mxu1 %v7587_v40  ;;  %6171 = vmatprep.mubr.msk.bf16.mxu1 %vm6864_vm6, %v6863_v61 }
 0xbf5   : > { %6169 = vmatprep.subr.bf16.mxu1 %v6863_v61  ;;  %6176 = vmatpush3.bf16.msra.mxu0 %v7513_v63 }
 0xbf6   : > { %6177 = vmatprep.subr.bf16.mxu0 %v6863_v61  ;;  %6179 = vmatprep.mubr.msk.bf16.mxu0 %vm6864_vm6, %v6863_v61 }
 0xbf8   : > { %6170 = vmatpush3.bf16.msra.mxu1 %v7601_v53 }
 0xbf9   : > { %6183 = vmatprep.subr.bf16.mxu1 %v6863_v61  ;;  %6178 = vmatpush3.bf16.msra.mxu0 %v7524_v20 }
 0xbfa   : > { %6191 = vmatprep.subr.bf16.mxu0 %v6863_v61 }
 0xbfb   : > { %6172 = vmatmul.mubr.msk.bf16.vlgmr.msra.gmra.mrb[92].mxu1 %vm1231_vm2, %v3655_v46 }
 0xbfc   : > { %6184 = vmatpush3.bf16.msra.mxu1 %v7560_v5  ;;  %6187 = vmatprep.mubr.msk.bf16.mxu1 %vm6864_vm6, %v6863_v61 }
 0xbfd   : > { %6185 = vmatprep.subr.bf16.mxu1 %v6863_v61 }
 0xc00   : > { %6186 = vmatpush3.bf16.msra.mxu1 %v7564_v6 }
 0xc01   : > { %6199 = vmatprep.subr.bf16.mxu1 %v6863_v61 }
 0xcc6   : > { %v3694_v51 = vpop.f32.mrb[88].mxu1  ;;  %v3735_v52 = vpop.f32.mrb[76].mxu0 }
 0xcc7   : > { %v3746_v54 = vadd.f32 %v3744_v26, %v3694_v51  ;;  %v6157_v55 = vpop.f32.mrb[89].mxu1  ;;  %v6165_v56 = vpop.f32.mrb[77].mxu0  ;;  %v3764_v3 = vadd.f32 %v3762_v48, %v3735_v52  ;;  %v3944_v52 = vld [vmem:[#allocation11 + $0x10] sm:$0xff] }
 0xcc8   : > { %v3697_v49 = vpop.f32.mrb[90].mxu1  ;;  %v3738_v60 = vpop.f32.mrb[78].mxu0 }
 0xcc9   : > { %v5607_v1 = vmul.f32 -1.442695, %v3746_v54  ;;  %v3747_v57 = vadd.f32 %v3745_v59, %v3697_v49  ;;  %v6158_v58 = vpop.f32.mrb[91].mxu1  ;;  %v6166_v2 = vpop.f32.mrb[79].mxu0  ;;  %v3765_v21 = vadd.f32 %v3763_v4, %v3738_v60  ;;  %v5609_v22 = vmul.f32 -1.442695, %v3764_v3 }
 0xcca   : > { %v3945_v60 = vunpack.c.l.bf16 %v3944_v52 }
 0xccb   : > { %6615 = vpow2.f32 %v5607_v1  ;;  %v5608_v7 = vmul.f32 -1.442695, %v3747_v57  ;;  %v5610_v8 = vmul.f32 -1.442695, %v3765_v21  ;;  %v3946_v21 = vunpack.c.h.bf16 %v3944_v52 }
 0xccd   : > { %6617 = vpow2.f32 %v5608_v7 }
 0xcce   : > { %v3814_v23 = vpop.f32.mrb[92].mxu1  ;;  %6619 = vpow2.f32 %v5609_v22 }
 0xccf   : > { %v6173_v0 = vpop.f32.mrb[93].mxu1  ;;  %6621 = vpow2.f32 %v5610_v8  ;;  %v3815_v12 = vadd.f32 %v7668_v50, %v3814_v23 }
 0xcd0   : > { %v3817_v9 = vpop.f32.mrb[94].mxu1 }
 0xcd1   : > { %v6174_v10 = vpop.f32.mrb[95].mxu1  ;;  %v3818_v29 = vadd.f32 %v7668_v50, %v3817_v9 }
 0xcd5   : > { %v6616_v13 = vpop.eup %6615 }
 0xcd6   : > { %v3754_v14 = vadd.f32 1.0, %v6616_v13 }
 0xcd7   : > { %v6618_v15 = vpop.eup %6617 }
 0xcd8   : > { %6623 = vrcp.f32 %v3754_v14  ;;  %v3755_v62 = vadd.f32 1.0, %v6618_v15  ;;  %v6620_v18 = vpop.eup %6619 }
 0xcd9   : > { %v6622_v24 = vpop.eup %6621  ;;  %v3772_v19 = vadd.f32 1.0, %v6620_v18 }
 0xcda   : > { %6625 = vrcp.f32 %v3755_v62  ;;  %v3773_v11 = vadd.f32 1.0, %v6622_v24 }
 0xcdb   : > { %6627 = vrcp.f32 %v3772_v19 }
 0xcdc   : > { %6629 = vrcp.f32 %v3773_v11 }
 0xce2   : > { %v6624_v17 = vpop.eup %6623 }
 0xce3   : > { %v3821_v27 = vmul.f32 %v6624_v17, %v3815_v12  ;;  %v3962_v12 = vld [vmem:[#allocation12 + $0x10] sm:$0xff] }
 0xce4   : > { %v6626_v30 = vpop.eup %6625 }
 0xce5   : > { %v3825_v31 = vadd.f32 %v3823_v28, %v3821_v27  ;;  %v3822_v33 = vmul.f32 %v6626_v30, %v3818_v29  ;;  %v6628_v34 = vpop.eup %6627  ;;  %v4006_v30 = vunpack.c.l.bf16 %v3962_v12 }
 0xce6   : > { %v6630_v35 = vpop.eup %6629  ;;  %v3829_v36 = vsub.f32 1.0, %v6628_v34  ;;  %v3833_v38 = vmul.f32 %v6628_v34, %v7674_v44  ;;  %v3926_v44 = vld [vmem:[#allocation10 + $0x10] sm:$0xff]  ;;  %v4007_v34 = vunpack.c.h.bf16 %v3962_v12 }
 0xce7   : > { %6631 = vtanh.f32 %v3825_v31  ;;  %v3826_v37 = vadd.f32 %v3824_v39, %v3822_v33  ;;  %v3830_v41 = vsub.f32 1.0, %v6630_v35  ;;  %v3834_v25 = vmul.f32 %v6630_v35, %v7676_v45 }
 0xce8   : > { %v3927_v45 = vunpack.c.l.bf16 %v3926_v44  ;;  %v3928_v49 = vunpack.c.h.bf16 %v3926_v44 }
 0xce9   : > { %6633 = vtanh.f32 %v3826_v37 }
 0xcf1   : > { %v6632_v32 = vpop.eup %6631 }
 0xcf2   : > { %v3831_v42 = vmul.f32 %v6632_v32, %v3829_v36 }
 0xcf3   : > { %v6634_v43 = vpop.eup %6633 }
 0xcf4   : > { %v3832_v46 = vmul.f32 %v6634_v43, %v3830_v41  ;;  %v7706_v26 = vadd.f32 %v3833_v38, %v3831_v42 }
 0xcf6   : > { %v7708_v47 = vadd.f32 %v3834_v25, %v3832_v46 }
 0xcf8   : > { %v3837_v51 = vpack.c.bf16 %v7708_v47, %v7706_v26 }
 0xcfa   : > { %3839 = vst.msk [vmem:[#allocation13 + $0x8] sm:$0xff] %vm1231_vm2, %v3837_v51  ;;  %6180 = vmatmul.mubr.msk.bf16.vlgmr.msra.gmra.mrb[80].mxu0 %vm1231_vm2, %v3837_v51  ;;  %6188 = vmatmul.mubr.msk.bf16.vlgmr.msra.gmra.mrb[96].mxu1 %vm1231_vm2, %v3837_v51 }
 0xcfb   : > { %6192 = vmatpush3.bf16.msra.mxu0 %v7587_v40  ;;  %6195 = vmatprep.mubr.msk.bf16.mxu0 %vm6864_vm6, %v6863_v61 }
 0xcfc   : > { %6193 = vmatprep.subr.bf16.mxu0 %v6863_v61  ;;  %6200 = vmatpush3.bf16.msra.mxu1 %v7513_v63 }
 0xcfd   : > { %6201 = vmatprep.subr.bf16.mxu1 %v6863_v61  ;;  %6203 = vmatprep.mubr.msk.bf16.mxu1 %vm6864_vm6, %v6863_v61 }
 0xcff   : > { %6194 = vmatpush3.bf16.msra.mxu0 %v7601_v53 }
 0xd00   : > { %6207 = vmatprep.subr.bf16.mxu0 %v6863_v61  ;;  %6202 = vmatpush3.bf16.msra.mxu1 %v7524_v20 }
 0xd01   : > { %6215 = vmatprep.subr.bf16.mxu1 %v6863_v61 }
 0xd02   : > { %6196 = vmatmul.mubr.msk.bf16.vlgmr.msra.gmra.mrb[84].mxu0 %vm1231_vm2, %v3837_v51 }
 0xd03   : > { %6208 = vmatpush3.bf16.msra.mxu0 %v7560_v5  ;;  %6211 = vmatprep.mubr.msk.bf16.mxu0 %vm6864_vm6, %v6863_v61 }
 0xd04   : > { %6209 = vmatprep.subr.bf16.mxu0 %v6863_v61 }
 0xd07   : > { %6210 = vmatpush3.bf16.msra.mxu0 %v7564_v6 }
 0xd08   : > { %6223 = vmatprep.subr.bf16.mxu0 %v6863_v61 }
 0xdcd   : > { %v3877_v54 = vpop.f32.mrb[80].mxu0  ;;  %v3918_v55 = vpop.f32.mrb[96].mxu1 }
 0xdce   : > { %v3929_v56 = vadd.f32 %v3927_v45, %v3877_v54  ;;  %v6181_v59 = vpop.f32.mrb[81].mxu0  ;;  %v6189_v48 = vpop.f32.mrb[97].mxu1  ;;  %v3947_v7 = vadd.f32 %v3945_v60, %v3918_v55  ;;  %v4127_v55 = vld [vmem:[#allocation11 + $0x18] sm:$0xff] }
 0xdcf   : > { %v3880_v1 = vpop.f32.mrb[82].mxu0  ;;  %v3921_v57 = vpop.f32.mrb[98].mxu1 }
 0xdd0   : > { %v5614_v58 = vmul.f32 -1.442695, %v3929_v56  ;;  %v3930_v2 = vadd.f32 %v3928_v49, %v3880_v1  ;;  %v6182_v3 = vpop.f32.mrb[83].mxu0  ;;  %v6190_v4 = vpop.f32.mrb[99].mxu1  ;;  %v3948_v23 = vadd.f32 %v3946_v21, %v3921_v57  ;;  %v5616_v0 = vmul.f32 -1.442695, %v3947_v7 }
 0xdd1   : > { %v4128_v57 = vunpack.c.l.bf16 %v4127_v55 }
 0xdd2   : > { %6635 = vpow2.f32 %v5614_v58  ;;  %v5615_v22 = vmul.f32 -1.442695, %v3930_v2  ;;  %v5617_v10 = vmul.f32 -1.442695, %v3948_v23  ;;  %v4129_v23 = vunpack.c.h.bf16 %v4127_v55 }
 0xdd4   : > { %6637 = vpow2.f32 %v5615_v22 }
 0xdd5   : > { %v3997_v8 = vpop.f32.mrb[84].mxu0  ;;  %6639 = vpow2.f32 %v5616_v0 }
 0xdd6   : > { %v6197_v9 = vpop.f32.mrb[85].mxu0  ;;  %6641 = vpow2.f32 %v5617_v10  ;;  %v3998_v27 = vadd.f32 %v7668_v50, %v3997_v8 }
 0xdd7   : > { %v4000_v13 = vpop.f32.mrb[86].mxu0 }
 0xdd8   : > { %v6198_v14 = vpop.f32.mrb[87].mxu0  ;;  %v4001_v31 = vadd.f32 %v7668_v50, %v4000_v13 }
 0xddc   : > { %v6636_v15 = vpop.eup %6635 }
 0xddd   : > { %v3937_v62 = vadd.f32 1.0, %v6636_v15 }
 0xdde   : > { %v6638_v18 = vpop.eup %6637 }
 0xddf   : > { %6643 = vrcp.f32 %v3937_v62  ;;  %v3938_v24 = vadd.f32 1.0, %v6638_v18  ;;  %v6640_v19 = vpop.eup %6639 }
 0xde0   : > { %v6642_v16 = vpop.eup %6641  ;;  %v3955_v11 = vadd.f32 1.0, %v6640_v19 }
 0xde1   : > { %6645 = vrcp.f32 %v3938_v24  ;;  %v3956_v17 = vadd.f32 1.0, %v6642_v16 }
 0xde2   : > { %6647 = vrcp.f32 %v3955_v11 }
 0xde3   : > { %6649 = vrcp.f32 %v3956_v17 }
 0xde9   : > { %v6644_v28 = vpop.eup %6643 }
 0xdea   : > { %v4004_v29 = vmul.f32 %v6644_v28, %v3998_v27  ;;  %v4145_v27 = vld [vmem:[#allocation12 + $0x18] sm:$0xff] }
 0xdeb   : > { %v6646_v33 = vpop.eup %6645 }
 0xdec   : > { %v4008_v39 = vadd.f32 %v4006_v30, %v4004_v29  ;;  %v4005_v37 = vmul.f32 %v6646_v33, %v4001_v31  ;;  %v6648_v36 = vpop.eup %6647  ;;  %v4189_v33 = vunpack.c.l.bf16 %v4145_v27 }
 0xded   : > { %v6650_v32 = vpop.eup %6649  ;;  %v4012_v41 = vsub.f32 1.0, %v6648_v36  ;;  %v4016_v46 = vmul.f32 %v6648_v36, %v7706_v26  ;;  %v4109_v26 = vld [vmem:[#allocation10 + $0x18] sm:$0xff]  ;;  %v4190_v36 = vunpack.c.h.bf16 %v4145_v27 }
 0xdee   : > { %6651 = vtanh.f32 %v4008_v39  ;;  %v4009_v35 = vadd.f32 %v4007_v34, %v4005_v37  ;;  %v4013_v38 = vsub.f32 1.0, %v6650_v32  ;;  %v4017_v44 = vmul.f32 %v6650_v32, %v7708_v47 }
 0xdef   : > { %v4110_v47 = vunpack.c.l.bf16 %v4109_v26  ;;  %v4111_v1 = vunpack.c.h.bf16 %v4109_v26 }
 0xdf0   : > { %6653 = vtanh.f32 %v4009_v35 }
 0xdf8   : > { %v6652_v42 = vpop.eup %6651 }
 0xdf9   : > { %v4014_v43 = vmul.f32 %v6652_v42, %v4012_v41 }
 0xdfa   : > { %v6654_v25 = vpop.eup %6653 }
 0xdfb   : > { %v4015_v51 = vmul.f32 %v6654_v25, %v4013_v38  ;;  %v7738_v45 = vadd.f32 %v4016_v46, %v4014_v43 }
 0xdfd   : > { %v7740_v52 = vadd.f32 %v4017_v44, %v4015_v51 }
 0xdff   : > { %v4020_v54 = vpack.c.bf16 %v7740_v52, %v7738_v45 }
 0xe01   : > { %4022 = vst.msk [vmem:[#allocation13 + $0x10] sm:$0xff] %vm1231_vm2, %v4020_v54  ;;  %6204 = vmatmul.mubr.msk.bf16.vlgmr.msra.gmra.mrb[100].mxu1 %vm1231_vm2, %v4020_v54  ;;  %6212 = vmatmul.mubr.msk.bf16.vlgmr.msra.gmra.mrb[88].mxu0 %vm1231_vm2, %v4020_v54 }
 0xe02   : > { %6216 = vmatpush3.bf16.msra.mxu1 %v7587_v40  ;;  %6219 = vmatprep.mubr.msk.bf16.mxu1 %vm6864_vm6, %v6863_v61 }
 0xe03   : > { %6217 = vmatprep.subr.bf16.mxu1 %v6863_v61  ;;  %6224 = vmatpush3.bf16.msra.mxu0 %v7513_v63 }
 0xe04   : > { %6225 = vmatprep.subr.bf16.mxu0 %v6863_v61  ;;  %6227 = vmatprep.mubr.msk.bf16.mxu0 %vm6864_vm6, %v6863_v61 }
 0xe06   : > { %6218 = vmatpush3.bf16.msra.mxu1 %v7601_v53 }
 0xe07   : > { %6231 = vmatprep.subr.bf16.mxu1 %v6863_v61  ;;  %6226 = vmatpush3.bf16.msra.mxu0 %v7524_v20 }
 0xe08   : > { %6239 = vmatprep.subr.bf16.mxu0 %v6863_v61 }
 0xe09   : > { %6220 = vmatmul.mubr.msk.bf16.vlgmr.msra.gmra.mrb[104].mxu1 %vm1231_vm2, %v4020_v54 }
 0xe0a   : > { %6232 = vmatpush3.bf16.msra.mxu1 %v7560_v5  ;;  %6235 = vmatprep.mubr.msk.bf16.mxu1 %vm6864_vm6, %v6863_v61 }
 0xe0b   : > { %6233 = vmatprep.subr.bf16.mxu1 %v6863_v61 }
 0xe0e   : > { %6234 = vmatpush3.bf16.msra.mxu1 %v7564_v6 }
 0xe0f   : > { %6247 = vmatprep.subr.bf16.mxu1 %v6863_v61 }
 0xed4   : > { %v4060_v56 = vpop.f32.mrb[100].mxu1  ;;  %v4101_v59 = vpop.f32.mrb[88].mxu0 }
 0xed5   : > { %v4112_v48 = vadd.f32 %v4110_v47, %v4060_v56  ;;  %v6205_v49 = vpop.f32.mrb[101].mxu1  ;;  %v6213_v60 = vpop.f32.mrb[89].mxu0  ;;  %v4130_v22 = vadd.f32 %v4128_v57, %v4101_v59  ;;  %v4310_v59 = vld [vmem:[#allocation11 + $0x20] sm:$0xff] }
 0xed6   : > { %v4063_v58 = vpop.f32.mrb[102].mxu1  ;;  %v4104_v2 = vpop.f32.mrb[90].mxu0 }
 0xed7   : > { %v5621_v3 = vmul.f32 -1.442695, %v4112_v48  ;;  %v4113_v4 = vadd.f32 %v4111_v1, %v4063_v58  ;;  %v6206_v7 = vpop.f32.mrb[103].mxu1  ;;  %v6214_v21 = vpop.f32.mrb[91].mxu0  ;;  %v4131_v8 = vadd.f32 %v4129_v23, %v4104_v2  ;;  %v5623_v9 = vmul.f32 -1.442695, %v4130_v22 }
 0xed8   : > { %v4311_v2 = vunpack.c.l.bf16 %v4310_v59 }
 0xed9   : > { %6655 = vpow2.f32 %v5621_v3  ;;  %v5622_v0 = vmul.f32 -1.442695, %v4113_v4  ;;  %v5624_v14 = vmul.f32 -1.442695, %v4131_v8  ;;  %v4312_v8 = vunpack.c.h.bf16 %v4310_v59 }
 0xedb   : > { %6657 = vpow2.f32 %v5622_v0 }
 0xedc   : > { %v4180_v10 = vpop.f32.mrb[104].mxu1  ;;  %6659 = vpow2.f32 %v5623_v9 }
 0xedd   : > { %v6221_v13 = vpop.f32.mrb[105].mxu1  ;;  %6661 = vpow2.f32 %v5624_v14  ;;  %v4181_v29 = vadd.f32 %v7668_v50, %v4180_v10 }
 0xede   : > { %v4183_v15 = vpop.f32.mrb[106].mxu1 }
 0xedf   : > { %v6222_v62 = vpop.f32.mrb[107].mxu1  ;;  %v4184_v39 = vadd.f32 %v7668_v50, %v4183_v15 }
 0xee3   : > { %v6656_v18 = vpop.eup %6655 }
 0xee4   : > { %v4120_v24 = vadd.f32 1.0, %v6656_v18 }
 0xee5   : > { %v6658_v19 = vpop.eup %6657 }
 0xee6   : > { %6663 = vrcp.f32 %v4120_v24  ;;  %v4121_v16 = vadd.f32 1.0, %v6658_v19  ;;  %v6660_v11 = vpop.eup %6659 }
 0xee7   : > { %v6662_v12 = vpop.eup %6661  ;;  %v4138_v17 = vadd.f32 1.0, %v6660_v11 }
 0xee8   : > { %6665 = vrcp.f32 %v4121_v16  ;;  %v4139_v28 = vadd.f32 1.0, %v6662_v12 }
 0xee9   : > { %6667 = vrcp.f32 %v4138_v17 }
 0xeea   : > { %6669 = vrcp.f32 %v4139_v28 }
 0xef0   : > { %v6664_v30 = vpop.eup %6663 }
 0xef1   : > { %v4187_v31 = vmul.f32 %v6664_v30, %v4181_v29  ;;  %v4328_v29 = vld [vmem:[#allocation12 + $0x20] sm:$0xff] }
 0xef2   : > { %v6666_v37 = vpop.eup %6665 }
 0xef3   : > { %v4191_v34 = vadd.f32 %v4189_v33, %v4187_v31  ;;  %v4188_v35 = vmul.f32 %v6666_v37, %v4184_v39  ;;  %v6668_v41 = vpop.eup %6667  ;;  %v4372_v37 = vunpack.c.l.bf16 %v4328_v29 }
 0xef4   : > { %v6670_v42 = vpop.eup %6669  ;;  %v4195_v38 = vsub.f32 1.0, %v6668_v41  ;;  %v4199_v51 = vmul.f32 %v6668_v41, %v7738_v45  ;;  %v4292_v45 = vld [vmem:[#allocation10 + $0x20] sm:$0xff]  ;;  %v4373_v41 = vunpack.c.h.bf16 %v4328_v29 }
 0xef5   : > { %6671 = vtanh.f32 %v4191_v34  ;;  %v4192_v32 = vadd.f32 %v4190_v36, %v4188_v35  ;;  %v4196_v46 = vsub.f32 1.0, %v6670_v42  ;;  %v4200_v26 = vmul.f32 %v6670_v42, %v7740_v52 }
 0xef6   : > { %v4293_v52 = vunpack.c.l.bf16 %v4292_v45  ;;  %v4294_v58 = vunpack.c.h.bf16 %v4292_v45 }
 0xef7   : > { %6673 = vtanh.f32 %v4192_v32 }
 0xeff   : > { %v6672_v43 = vpop.eup %6671 }
 0xf00   : > { %v4197_v25 = vmul.f32 %v6672_v43, %v4195_v38 }
 0xf01   : > { %v6674_v44 = vpop.eup %6673 }
 0xf02   : > { %v4198_v54 = vmul.f32 %v6674_v44, %v4196_v46  ;;  %v7770_v47 = vadd.f32 %v4199_v51, %v4197_v25 }
 0xf04   : > { %v7772_v55 = vadd.f32 %v4200_v26, %v4198_v54 }
 0xf06   : > { %v4203_v56 = vpack.c.bf16 %v7772_v55, %v7770_v47 }
 0xf08   : > { %4205 = vst.msk [vmem:[#allocation13 + $0x18] sm:$0xff] %vm1231_vm2, %v4203_v56  ;;  %6228 = vmatmul.mubr.msk.bf16.vlgmr.msra.gmra.mrb[92].mxu0 %vm1231_vm2, %v4203_v56  ;;  %6236 = vmatmul.mubr.msk.bf16.vlgmr.msra.gmra.mrb[108].mxu1 %vm1231_vm2, %v4203_v56 }
 0xf09   : > { %6240 = vmatpush3.bf16.msra.mxu0 %v7587_v40  ;;  %6243 = vmatprep.mubr.msk.bf16.mxu0 %vm6864_vm6, %v6863_v61 }
 0xf0a   : > { %6241 = vmatprep.subr.bf16.mxu0 %v6863_v61  ;;  %6248 = vmatpush3.bf16.msra.mxu1 %v7513_v63 }
 0xf0b   : > { %6249 = vmatprep.subr.bf16.mxu1 %v6863_v61  ;;  %6251 = vmatprep.mubr.msk.bf16.mxu1 %vm6864_vm6, %v6863_v61 }
 0xf0d   : > { %6242 = vmatpush3.bf16.msra.mxu0 %v7601_v53 }
 0xf0e   : > { %6255 = vmatprep.subr.bf16.mxu0 %v6863_v61  ;;  %6250 = vmatpush3.bf16.msra.mxu1 %v7524_v20 }
 0xf0f   : > { %6263 = vmatprep.subr.bf16.mxu1 %v6863_v61 }
 0xf10   : > { %6244 = vmatmul.mubr.msk.bf16.vlgmr.msra.gmra.mrb[96].mxu0 %vm1231_vm2, %v4203_v56 }
 0xf11   : > { %6256 = vmatpush3.bf16.msra.mxu0 %v7560_v5  ;;  %6259 = vmatprep.mubr.msk.bf16.mxu0 %vm6864_vm6, %v6863_v61 }
 0xf12   : > { %6257 = vmatprep.subr.bf16.mxu0 %v6863_v61 }
 0xf15   : > { %6258 = vmatpush3.bf16.msra.mxu0 %v7564_v6 }
 0xf16   : > { %6271 = vmatprep.subr.bf16.mxu0 %v6863_v61 }
 0xfdb   : > { %v4243_v48 = vpop.f32.mrb[92].mxu0  ;;  %v4284_v49 = vpop.f32.mrb[108].mxu1 }
 0xfdc   : > { %v4295_v60 = vadd.f32 %v4293_v52, %v4243_v48  ;;  %v6229_v1 = vpop.f32.mrb[93].mxu0  ;;  %v6237_v57 = vpop.f32.mrb[109].mxu1  ;;  %v4313_v0 = vadd.f32 %v4311_v2, %v4284_v49  ;;  %v4493_v49 = vld [vmem:[#allocation11 + $0x28] sm:$0xff] }
 0xfdd   : > { %v4246_v3 = vpop.f32.mrb[94].mxu0  ;;  %v4287_v4 = vpop.f32.mrb[110].mxu1 }
 0xfde   : > { %v5628_v7 = vmul.f32 -1.442695, %v4295_v60  ;;  %v4296_v21 = vadd.f32 %v4294_v58, %v4246_v3  ;;  %v6230_v22 = vpop.f32.mrb[95].mxu0  ;;  %v6238_v23 = vpop.f32.mrb[111].mxu1  ;;  %v4314_v10 = vadd.f32 %v4312_v8, %v4287_v4  ;;  %v5630_v13 = vmul.f32 -1.442695, %v4313_v0 }
 0xfdf   : > { %v4494_v4 = vunpack.c.l.bf16 %v4493_v49 }
 0xfe0   : > { %6675 = vpow2.f32 %v5628_v7  ;;  %v5629_v9 = vmul.f32 -1.442695, %v4296_v21  ;;  %v5631_v62 = vmul.f32 -1.442695, %v4314_v10  ;;  %v4495_v10 = vunpack.c.h.bf16 %v4493_v49 }
 0xfe2   : > { %6677 = vpow2.f32 %v5629_v9 }
 0xfe3   : > { %v4363_v14 = vpop.f32.mrb[96].mxu0  ;;  %6679 = vpow2.f32 %v5630_v13 }
 0xfe4   : > { %v6245_v15 = vpop.f32.mrb[97].mxu0  ;;  %6681 = vpow2.f32 %v5631_v62  ;;  %v4364_v31 = vadd.f32 %v7668_v50, %v4363_v14 }
 0xfe5   : > { %v4366_v18 = vpop.f32.mrb[98].mxu0 }
 0xfe6   : > { %v6246_v24 = vpop.f32.mrb[99].mxu0  ;;  %v4367_v34 = vadd.f32 %v7668_v50, %v4366_v18 }
 0xfea   : > { %v6676_v19 = vpop.eup %6675 }
 0xfeb   : > { %v4303_v16 = vadd.f32 1.0, %v6676_v19 }
 0xfec   : > { %v6678_v11 = vpop.eup %6677 }
 0xfed   : > { %6683 = vrcp.f32 %v4303_v16  ;;  %v4304_v12 = vadd.f32 1.0, %v6678_v11  ;;  %v6680_v17 = vpop.eup %6679 }
 0xfee   : > { %v6682_v27 = vpop.eup %6681  ;;  %v4321_v28 = vadd.f32 1.0, %v6680_v17 }
 0xfef   : > { %6685 = vrcp.f32 %v4304_v12  ;;  %v4322_v30 = vadd.f32 1.0, %v6682_v27 }
 0xff0   : > { %6687 = vrcp.f32 %v4321_v28 }
 0xff1   : > { %6689 = vrcp.f32 %v4322_v30 }
 0xff7   : > { %v6684_v33 = vpop.eup %6683 }
 0xff8   : > { %v4370_v39 = vmul.f32 %v6684_v33, %v4364_v31  ;;  %v4511_v31 = vld [vmem:[#allocation12 + $0x28] sm:$0xff] }
 0xff9   : > { %v6686_v35 = vpop.eup %6685 }
 0xffa   : > { %v4374_v36 = vadd.f32 %v4372_v37, %v4370_v39  ;;  %v4371_v32 = vmul.f32 %v6686_v35, %v4367_v34  ;;  %v6688_v38 = vpop.eup %6687  ;;  %v4555_v35 = vunpack.c.l.bf16 %v4511_v31 }
 0xffb   : > { %v6690_v43 = vpop.eup %6689  ;;  %v4378_v46 = vsub.f32 1.0, %v6688_v38  ;;  %v4382_v54 = vmul.f32 %v6688_v38, %v7770_v47  ;;  %v4475_v47 = vld [vmem:[#allocation10 + $0x28] sm:$0xff]  ;;  %v4556_v38 = vunpack.c.h.bf16 %v4511_v31  ;;  %v7870_v31 = vld [vmem:[%s8147_s20] ss:$0 sm:$0xff] }
 0xffc   : > { %6691 = vtanh.f32 %v4374_v36  ;;  %v4375_v42 = vadd.f32 %v4373_v41, %v4371_v32  ;;  %v4379_v51 = vsub.f32 1.0, %v6690_v43  ;;  %v4383_v45 = vmul.f32 %v6690_v43, %v7772_v55 }
 0xffd   : > { %v4476_v55 = vunpack.c.l.bf16 %v4475_v47  ;;  %v4477_v3 = vunpack.c.h.bf16 %v4475_v47 }
 0xffe   : > { %6693 = vtanh.f32 %v4375_v42 }
0x1006   : > { %v6692_v25 = vpop.eup %6691 }
0x1007   : > { %v4380_v44 = vmul.f32 %v6692_v25, %v4378_v46 }
0x1008   : > { %v6694_v26 = vpop.eup %6693 }
0x1009   : > { %v4381_v56 = vmul.f32 %v6694_v26, %v4379_v51  ;;  %v7802_v52 = vadd.f32 %v4382_v54, %v4380_v44 }
0x100b   : > { %v7804_v59 = vadd.f32 %v4383_v45, %v4381_v56 }
0x100d   : > { %v4386_v48 = vpack.c.bf16 %v7804_v59, %v7802_v52 }
0x100f   : > { %4388 = vst.msk [vmem:[#allocation13 + $0x20] sm:$0xff] %vm1231_vm2, %v4386_v48  ;;  %6252 = vmatmul.mubr.msk.bf16.vlgmr.msra.gmra.mrb[112].mxu1 %vm1231_vm2, %v4386_v48  ;;  %6260 = vmatmul.mubr.msk.bf16.vlgmr.msra.gmra.mrb[100].mxu0 %vm1231_vm2, %v4386_v48 }
0x1010   : > { %6264 = vmatpush3.bf16.msra.mxu1 %v7587_v40  ;;  %6267 = vmatprep.mubr.msk.bf16.mxu1 %vm6864_vm6, %v6863_v61 }
0x1011   : > { %6265 = vmatprep.subr.bf16.mxu1 %v6863_v61  ;;  %6272 = vmatpush3.bf16.msra.mxu0 %v7513_v63 }
0x1012   : > { %6273 = vmatprep.subr.bf16.mxu0 %v6863_v61  ;;  %6275 = vmatprep.mubr.msk.bf16.mxu0 %vm6864_vm6, %v6863_v61 }
0x1014   : > { %6266 = vmatpush3.bf16.msra.mxu1 %v7601_v53 }
0x1015   : > { %6279 = vmatprep.subr.bf16.mxu1 %v6863_v61  ;;  %6274 = vmatpush3.bf16.msra.mxu0 %v7524_v20 }
0x1016   : > { %6287 = vmatprep.subr.bf16.mxu0 %v6863_v61 }
0x1017   : > { %6268 = vmatmul.mubr.msk.bf16.vlgmr.msra.gmra.mrb[116].mxu1 %vm1231_vm2, %v4386_v48 }
0x1018   : > { %6280 = vmatpush3.bf16.msra.mxu1 %v7560_v5  ;;  %6283 = vmatprep.mubr.msk.bf16.mxu1 %vm6864_vm6, %v6863_v61 }
0x1019   : > { %6281 = vmatprep.subr.bf16.mxu1 %v6863_v61 }
0x101c   : > { %6282 = vmatpush3.bf16.msra.mxu1 %v7564_v6 }
0x101d   : > { %6295 = vmatprep.subr.bf16.mxu1 %v6863_v61 }
0x10e2   : > { %v4426_v60 = vpop.f32.mrb[112].mxu1  ;;  %v4467_v1 = vpop.f32.mrb[100].mxu0 }
0x10e3   : > { %v4478_v57 = vadd.f32 %v4476_v55, %v4426_v60  ;;  %v6253_v58 = vpop.f32.mrb[113].mxu1  ;;  %v6261_v2 = vpop.f32.mrb[101].mxu0  ;;  %v4496_v9 = vadd.f32 %v4494_v4, %v4467_v1 }
0x10e4   : > { %v4429_v7 = vpop.f32.mrb[114].mxu1  ;;  %v4470_v21 = vpop.f32.mrb[102].mxu0 }
0x10e5   : > { %v5635_v22 = vmul.f32 -1.442695, %v4478_v57  ;;  %v4479_v23 = vadd.f32 %v4477_v3, %v4429_v7  ;;  %v6254_v0 = vpop.f32.mrb[115].mxu1  ;;  %v6262_v8 = vpop.f32.mrb[103].mxu0  ;;  %v4497_v14 = vadd.f32 %v4495_v10, %v4470_v21  ;;  %v5637_v15 = vmul.f32 -1.442695, %v4496_v9 }
0x10e7   : > { %6695 = vpow2.f32 %v5635_v22  ;;  %v5636_v13 = vmul.f32 -1.442695, %v4479_v23  ;;  %v5638_v24 = vmul.f32 -1.442695, %v4497_v14 }
0x10e9   : > { %6697 = vpow2.f32 %v5636_v13 }
0x10ea   : > { %v4546_v62 = vpop.f32.mrb[116].mxu1  ;;  %6699 = vpow2.f32 %v5637_v15 }
0x10eb   : > { %v6269_v18 = vpop.f32.mrb[117].mxu1  ;;  %6701 = vpow2.f32 %v5638_v24  ;;  %v4547_v39 = vadd.f32 %v7668_v50, %v4546_v62 }
0x10ec   : > { %v4549_v19 = vpop.f32.mrb[118].mxu1 }
0x10ed   : > { %v6270_v16 = vpop.f32.mrb[119].mxu1  ;;  %v4550_v36 = vadd.f32 %v7668_v50, %v4549_v19 }
0x10f1   : > { %v6696_v11 = vpop.eup %6695 }
0x10f2   : > { %v4486_v12 = vadd.f32 1.0, %v6696_v11 }
0x10f3   : > { %v6698_v17 = vpop.eup %6697 }
0x10f4   : > { %6703 = vrcp.f32 %v4486_v12  ;;  %v4487_v27 = vadd.f32 1.0, %v6698_v17  ;;  %v6700_v28 = vpop.eup %6699 }
0x10f5   : > { %v6702_v29 = vpop.eup %6701  ;;  %v4504_v30 = vadd.f32 1.0, %v6700_v28 }
0x10f6   : > { %6705 = vrcp.f32 %v4487_v27  ;;  %v4505_v33 = vadd.f32 1.0, %v6702_v29  ;;  %v4694_v29 = vld [vmem:[#allocation12 + $0x30] sm:$0xff] }
0x10f7   : > { %6707 = vrcp.f32 %v4504_v30 }
0x10f8   : > { %6709 = vrcp.f32 %v4505_v33 }
0x10fe   : > { %v6704_v37 = vpop.eup %6703 }
0x10ff   : > { %v4553_v34 = vmul.f32 %v6704_v37, %v4547_v39 }
0x1100   : > { %v6706_v32 = vpop.eup %6705 }
0x1101   : > { %v4557_v41 = vadd.f32 %v4555_v35, %v4553_v34  ;;  %v4554_v42 = vmul.f32 %v6706_v32, %v4550_v36  ;;  %v6708_v46 = vpop.eup %6707  ;;  %v4738_v34 = vunpack.c.l.bf16 %v4694_v29 }
0x1102   : > { %v6710_v25 = vpop.eup %6709  ;;  %v4561_v51 = vsub.f32 1.0, %v6708_v46  ;;  %v4565_v56 = vmul.f32 %v6708_v46, %v7802_v52 }
0x1103   : > { %6711 = vtanh.f32 %v4557_v41  ;;  %v4558_v43 = vadd.f32 %v4556_v38, %v4554_v42  ;;  %v4562_v54 = vsub.f32 1.0, %v6710_v25  ;;  %v4566_v50 = vmul.f32 %v6710_v25, %v7804_v59  ;;  %v4676_v59 = vld [vmem:[#allocation11 + $0x30] sm:$0xff] }
0x1104   : > { %v4677_v3 = vunpack.c.l.bf16 %v4676_v59  ;;  %v4678_v8 = vunpack.c.h.bf16 %v4676_v59  ;;  %v4739_v42 = vunpack.c.h.bf16 %v4694_v29  ;;  %v4942_v59 = vld [vmem:[#allocation13 + $0x20] sm:$0xff] }
0x1105   : > { %6713 = vtanh.f32 %v4558_v43 }
0x110d   : > { %v6712_v44 = vpop.eup %6711 }
0x110e   : > { %v4563_v26 = vmul.f32 %v6712_v44, %v4561_v51 }
0x110f   : > { %v6714_v45 = vpop.eup %6713 }
0x1110   : > { %v4564_v48 = vmul.f32 %v6714_v45, %v4562_v54  ;;  %v7834_v47 = vadd.f32 %v4565_v56, %v4563_v26 }
0x1112   : > { %v7836_v55 = vadd.f32 %v4566_v50, %v4564_v48 }
0x1114   : > { %v4569_v49 = vpack.c.bf16 %v7836_v55, %v7834_v47 }
0x1116   : > { %4571 = vst.msk [vmem:[#allocation13 + $0x28] sm:$0xff] %vm1231_vm2, %v4569_v49  ;;  %6276 = vmatmul.mubr.msk.bf16.vlgmr.msra.gmra.mrb[104].mxu0 %vm1231_vm2, %v4569_v49  ;;  %6284 = vmatmul.mubr.msk.bf16.vlgmr.msra.gmra.mrb[120].mxu1 %vm1231_vm2, %v4569_v49 }
0x1117   : > { %6288 = vmatpush3.bf16.msra.mxu0 %v7587_v40  ;;  %6291 = vmatprep.mubr.msk.bf16.mxu0 %vm6864_vm6, %v6863_v61 }
0x1118   : > { %6289 = vmatprep.subr.bf16.mxu0 %v6863_v61  ;;  %6296 = vmatpush3.bf16.msra.mxu1 %v7513_v63  ;;  %v7864_v63 = vld [vmem:[%s8148_s21] sm:$0xff]  }
0x1119   : > { %6297 = vmatprep.subr.bf16.mxu1 %v6863_v61  ;;  %6299 = vmatprep.mubr.msk.bf16.mxu1 %vm6864_vm6, %v6863_v61 }
0x111b   : > { %6290 = vmatpush3.bf16.msra.mxu0 %v7601_v53 }
0x111c   : > { %6303 = vmatprep.subr.bf16.mxu0 %v6863_v61  ;;  %6298 = vmatpush3.bf16.msra.mxu1 %v7524_v20  ;;  %v4658_v20 = vld [vmem:[#allocation10 + $0x30] sm:$0xff] }
0x111d   : > { %6311 = vmatprep.subr.bf16.mxu1 %v6863_v61  ;;  %v4659_v52 = vunpack.c.l.bf16 %v4658_v20  ;;  %v4660_v2 = vunpack.c.h.bf16 %v4658_v20 }
0x111e   : > { %6292 = vmatmul.mubr.msk.bf16.vlgmr.msra.gmra.mrb[108].mxu0 %vm1231_vm2, %v4569_v49 }
0x111f   : > { %6304 = vmatpush3.bf16.msra.mxu0 %v7560_v5  ;;  %6307 = vmatprep.mubr.msk.bf16.mxu0 %vm6864_vm6, %v6863_v61 }
0x1120   : > { %6305 = vmatprep.subr.bf16.mxu0 %v6863_v61 }
0x1123   : > { %6306 = vmatpush3.bf16.msra.mxu0 %v7564_v6 }
0x1124   : > { %6319 = vmatprep.subr.bf16.mxu0 %v7864_v63 }
0x11e9   : > { %v4609_v60 = vpop.f32.mrb[104].mxu0  ;;  %v4650_v1 = vpop.f32.mrb[120].mxu1 }
0x11ea   : > { %v4661_v5 = vadd.f32 %v4659_v52, %v4609_v60  ;;  %v6277_v57 = vpop.f32.mrb[105].mxu0  ;;  %v6285_v58 = vpop.f32.mrb[121].mxu1  ;;  %v4679_v0 = vadd.f32 %v4677_v3, %v4650_v1  ;;  %v6594_v52 = vld [vmem:[%s8148_s21 + $0x8] sm:$0xff]   ;;  %v4943_v60 = vld [vmem:[#allocation13 + $0x28] sm:$0xff] }
0x11eb   : > { %v4612_v4 = vpop.f32.mrb[106].mxu0  ;;  %v4653_v7 = vpop.f32.mrb[122].mxu1 }
0x11ec   : > { %v5642_v6 = vmul.f32 -1.442695, %v4661_v5  ;;  %v4662_v21 = vadd.f32 %v4660_v2, %v4612_v4  ;;  %v6278_v22 = vpop.f32.mrb[107].mxu0  ;;  %v6286_v23 = vpop.f32.mrb[123].mxu1  ;;  %v4680_v10 = vadd.f32 %v4678_v8, %v4653_v7  ;;  %v5644_v13 = vmul.f32 -1.442695, %v4679_v0 }
0x11ed   : > { %v4859_v5 = vld [vmem:[#allocation11 + $0x38] sm:$0xff] }
0x11ee   : > { %6715 = vpow2.f32 %v5642_v6  ;;  %v5643_v9 = vmul.f32 -1.442695, %v4662_v21  ;;  %v5645_v62 = vmul.f32 -1.442695, %v4680_v10  ;;  %v4860_v6 = vunpack.c.l.bf16 %v4859_v5 }
0x11f0   : > { %6717 = vpow2.f32 %v5643_v9 }
0x11f1   : > { %v4729_v14 = vpop.f32.mrb[108].mxu0  ;;  %6719 = vpow2.f32 %v5644_v13  ;;  %v4861_v13 = vunpack.c.h.bf16 %v4859_v5 }
0x11f2   : > { %v6293_v15 = vpop.f32.mrb[109].mxu0  ;;  %6721 = vpow2.f32 %v5645_v62  ;;  %v4730_v33 = vadd.f32 %v7870_v31, %v4729_v14  ;;  %v7905_v62 = vld [vmem:[%s8201_s1] ss:$0 sm:$0xff] }
0x11f3   : > { %v4732_v18 = vpop.f32.mrb[110].mxu0 }
0x11f4   : > { %v6294_v24 = vpop.f32.mrb[111].mxu0  ;;  %v4733_v35 = vadd.f32 %v7870_v31, %v4732_v18 }
0x11f8   : > { %v6716_v19 = vpop.eup %6715 }
0x11f9   : > { %v4669_v16 = vadd.f32 1.0, %v6716_v19 }
0x11fa   : > { %v6718_v11 = vpop.eup %6717 }
0x11fb   : > { %6723 = vrcp.f32 %v4669_v16  ;;  %v4670_v12 = vadd.f32 1.0, %v6718_v11  ;;  %v6720_v17 = vpop.eup %6719 }
0x11fc   : > { %v6722_v27 = vpop.eup %6721  ;;  %v4687_v28 = vadd.f32 1.0, %v6720_v17 }
0x11fd   : > { %6725 = vrcp.f32 %v4670_v12  ;;  %v4688_v30 = vadd.f32 1.0, %v6722_v27 }
0x11fe   : > { %6727 = vrcp.f32 %v4687_v28 }
0x11ff   : > { %6729 = vrcp.f32 %v4688_v30 }
0x1205   : > { %v6724_v39 = vpop.eup %6723 }
0x1206   : > { %v4736_v37 = vmul.f32 %v6724_v39, %v4730_v33 }
0x1207   : > { %v6726_v36 = vpop.eup %6725 }
0x1208   : > { %v4740_v32 = vadd.f32 %v4738_v34, %v4736_v37  ;;  %v4737_v41 = vmul.f32 %v6726_v36, %v4733_v35  ;;  %v6728_v43 = vpop.eup %6727 }
0x1209   : > { %v6730_v46 = vpop.eup %6729  ;;  %v4744_v25 = vsub.f32 1.0, %v6728_v43  ;;  %v4748_v26 = vmul.f32 %v6728_v43, %v7834_v47  ;;  %v4938_v47 = vld [vmem:[#allocation13] sm:$0xff] }
0x120a   : > { %6731 = vtanh.f32 %v4740_v32  ;;  %v4741_v38 = vadd.f32 %v4739_v42, %v4737_v41  ;;  %v4745_v44 = vsub.f32 1.0, %v6730_v46  ;;  %v4749_v48 = vmul.f32 %v6730_v46, %v7836_v55  ;;  %v4939_v55 = vld [vmem:[#allocation13 + $0x8] sm:$0xff] }
0x120c   : > { %6733 = vtanh.f32 %v4741_v38 }
0x1214   : > { %v6732_v51 = vpop.eup %6731 }
0x1215   : > { %v4746_v54 = vmul.f32 %v6732_v51, %v4744_v25 }
0x1216   : > { %v6734_v56 = vpop.eup %6733 }
0x1217   : > { %v4747_v45 = vmul.f32 %v6734_v56, %v4745_v44  ;;  %v7876_v50 = vadd.f32 %v4748_v26, %v4746_v54 }
0x1219   : > { %v7878_v49 = vadd.f32 %v4749_v48, %v4747_v45  ;;  %v4877_v45 = vld [vmem:[#allocation12 + $0x38] sm:$0xff] }
0x121b   : > { %v4752_v20 = vpack.c.bf16 %v7878_v49, %v7876_v50 }
0x121d   : > { %4754 = vst.msk [vmem:[#allocation13 + $0x30] sm:$0xff] %vm1231_vm2, %v4752_v20  ;;  %6300 = vmatmul.mubr.msk.bf16.vlgmr.msra.gmra.mrb[124].mxu1 %vm1231_vm2, %v4752_v20  ;;  %6308 = vmatmul.mubr.msk.bf16.vlgmr.msra.gmra.mrb[112].mxu0 %vm1231_vm2, %v4752_v20 }
0x121e   : > { %6312 = vmatpush3.bf16.msra.mxu1 %v7587_v40  ;;  %6320 = vmatpush3.bf16.msra.mxu0 %v7864_v63  ;;  %v4940_v40 = vld [vmem:[#allocation13 + $0x10] sm:$0xff]  ;;  %v4941_v63 = vld [vmem:[#allocation13 + $0x18] sm:$0xff] }
0x121f   : > { %6323 = vmatprep.mubr.msk.bf16.mxu0 %vm1231_vm2, %v4938_v47  ;;  %6313 = vmatprep.subr.bf16.mxu1 %v6863_v61 }
0x1220   : > { %6321 = vmatprep.subr.bf16.mxu0 %v6594_v52  ;;  %6315 = vmatprep.mubr.msk.bf16.mxu1 %vm6864_vm6, %v6863_v61 }
0x1222   : > { %6314 = vmatpush3.bf16.msra.mxu1 %v7601_v53  ;;  %6322 = vmatpush3.bf16.msra.mxu0 %v6594_v52  ;;  %v4841_v53 = vld [vmem:[#allocation10 + $0x38] sm:$0xff] }
0x1223   : > { %v4842_v1 = vunpack.c.l.bf16 %v4841_v53  ;;  %v4843_v7 = vunpack.c.h.bf16 %v4841_v53 }
0x1224   : > { %v4944_v61 = vld [vmem:[#allocation13 + $0x30] sm:$0xff] }
0x1225   : > { %6316 = vmatmul.mubr.msk.bf16.vlgmr.msra.gmra.mrb[128].mxu1 %vm1231_vm2, %v4752_v20  ;;  %6324 = vmatmul.mubr.msk.bf16.vlgmr.msra.gmra.mrb[116].mxu0 %vm1231_vm2, %v4939_v55 }
0x1226   : > { %6327 = vmatprep.mubr.msk.bf16.mxu0 %vm1231_vm2, %v4940_v40 }
0x122d   : > { %6328 = vmatmul.mubr.msk.bf16.gmra.mrb[120].mxu0 %vm1231_vm2, %v4941_v63 }
0x122e   : > { %6331 = vmatprep.mubr.msk.bf16.mxu0 %vm1231_vm2, %v4942_v59 }
0x1235   : > { %6332 = vmatmul.mubr.msk.bf16.gmra.mrb[124].mxu0 %vm1231_vm2, %v4943_v60  ;;  %v4921_v60 = vunpack.c.l.bf16 %v4877_v45 }
0x1236   : > { %6335 = vmatprep.mubr.msk.bf16.mxu0 %vm1231_vm2, %v4944_v61 }
0x12f0   : > { %v4792_v57 = vpop.f32.mrb[124].mxu1  ;;  %v4833_v58 = vpop.f32.mrb[112].mxu0 }
0x12f1   : > { %v4844_v2 = vadd.f32 %v4842_v1, %v4792_v57  ;;  %v6301_v3 = vpop.f32.mrb[125].mxu1  ;;  %v6309_v4 = vpop.f32.mrb[113].mxu0  ;;  %v4862_v10 = vadd.f32 %v4860_v6, %v4833_v58 }
0x12f2   : > { %v4795_v21 = vpop.f32.mrb[126].mxu1  ;;  %v4836_v22 = vpop.f32.mrb[114].mxu0  ;;  %v4922_v3 = vunpack.c.h.bf16 %v4877_v45 }
0x12f3   : > { %v5649_v23 = vmul.f32 -1.442695, %v4844_v2  ;;  %v4845_v0 = vadd.f32 %v4843_v7, %v4795_v21  ;;  %v6302_v8 = vpop.f32.mrb[127].mxu1  ;;  %v6310_v9 = vpop.f32.mrb[115].mxu0  ;;  %v4863_v15 = vadd.f32 %v4861_v13, %v4836_v22  ;;  %v5651_v18 = vmul.f32 -1.442695, %v4862_v10 }
0x12f5   : > { %6735 = vpow2.f32 %v5649_v23  ;;  %v5650_v14 = vmul.f32 -1.442695, %v4845_v0  ;;  %v5652_v17 = vmul.f32 -1.442695, %v4863_v15 }
0x12f7   : > { %6737 = vpow2.f32 %v5650_v14 }
0x12f8   : > { %v4912_v24 = vpop.f32.mrb[128].mxu1  ;;  %v6325_v19 = vpop.f32.mrb[116].mxu0  ;;  %6739 = vpow2.f32 %v5651_v18 }
0x12f9   : > { %v7908_v16 = vadd.f32 %v6325_v19, %v7905_v62  ;;  %v6317_v11 = vpop.f32.mrb[129].mxu1  ;;  %v5027_v12 = vpop.f32.mrb[117].mxu0  ;;  %6741 = vpow2.f32 %v5652_v17  ;;  %v4913_v40 = vadd.f32 %v7870_v31, %v4912_v24 }
0x12fa   : > { %v4915_v27 = vpop.f32.mrb[130].mxu1  ;;  %v6326_v28 = vpop.f32.mrb[118].mxu0  ;;  %v7915_v39 = vadd.f32 %v7905_v62, %v5027_v12 }
0x12fb   : > { %5094 = vmax.xlane.f32.xlu0 %v7908_v16  ;;  %v6318_v29 = vpop.f32.mrb[131].mxu1  ;;  %v5030_v30 = vpop.f32.mrb[119].mxu0  ;;  %v7920_v32 = vadd.f32 %v6326_v28, %v7905_v62  ;;  %v4916_v61 = vadd.f32 %v7870_v31, %v4915_v27 }
0x12fc   : > { %v7912_v33 = vadd.f32 %v7905_v62, %v5030_v30 }
0x12fe   : > { %5092 = vmax.xlane.f32.xlu1 %v7912_v33 }
0x12ff   : > { %v6736_v37 = vpop.eup %6735  ;;  %5090 = vmax.xlane.f32.xlu0 %v7915_v39 }
0x1300   : > { %v4852_v34 = vadd.f32 1.0, %v6736_v37  ;;  %v6329_v35 = vpop.f32.mrb[120].mxu0 }
0x1301   : > { %v6738_v36 = vpop.eup %6737  ;;  %v7923_v41 = vadd.f32 %v6329_v35, %v7905_v62  ;;  %v5043_v42 = vpop.f32.mrb[121].mxu0 }
0x1302   : > { %6743 = vrcp.f32 %v4852_v34  ;;  %v4853_v38 = vadd.f32 1.0, %v6738_v36  ;;  %v6330_v43 = vpop.f32.mrb[122].mxu0  ;;  %v7928_v25 = vadd.f32 %v7905_v62, %v5043_v42  ;;  %v6740_v44 = vpop.eup %6739 }
0x1303   : > { %v5046_v46 = vpop.f32.mrb[123].mxu0  ;;  %5102 = vmax.xlane.f32.xlu1 %v7923_v41  ;;  %5096 = vmax.xlane.f32.xlu0 %v7920_v32  ;;  %v7931_v51 = vadd.f32 %v6330_v43, %v7905_v62  ;;  %v6742_v54 = vpop.eup %6741  ;;  %v4870_v56 = vadd.f32 1.0, %v6740_v44 }
0x1304   : > { %6745 = vrcp.f32 %v4853_v38  ;;  %v7936_v48 = vadd.f32 %v7905_v62, %v5046_v46  ;;  %v4871_v55 = vadd.f32 1.0, %v6742_v54 }
0x1305   : > { %6747 = vrcp.f32 %v4870_v56 }
0x1306   : > { %6749 = vrcp.f32 %v4871_v55 }
0x1307   : > { %5098 = vmax.xlane.f32.xlu1 %v7928_v25  ;;  %5104 = vmax.xlane.f32.xlu0 %v7931_v51 }
0x1308   : > { %v6333_v26 = vpop.f32.mrb[124].mxu0 }
0x1309   : > { %v7939_v20 = vadd.f32 %v6333_v26, %v7905_v62  ;;  %v5059_v52 = vpop.f32.mrb[125].mxu0 }
0x130a   : > { %v6334_v47 = vpop.f32.mrb[126].mxu0  ;;  %v7946_v1 = vadd.f32 %v7905_v62, %v5059_v52 }
0x130b   : > { %v5062_v63 = vpop.f32.mrb[127].mxu0  ;;  %5110 = vmax.xlane.f32.xlu1 %v7939_v20  ;;  %5100 = vmax.xlane.f32.xlu0 %v7936_v48  ;;  %v7949_v5 = vadd.f32 %v6334_v47, %v7905_v62 }
0x130c   : > { %v6744_v59 = vpop.eup %6743  ;;  %v7954_v31 = vadd.f32 %v7905_v62, %v5062_v63 }
0x130d   : > { %v4919_v53 = vmul.f32 %v6744_v59, %v4913_v40 }
0x130e   : > { %v6746_v57 = vpop.eup %6745 }
0x130f   : > { %v4923_v58 = vadd.f32 %v4921_v60, %v4919_v53  ;;  %v4920_v2 = vmul.f32 %v6746_v57, %v4916_v61  ;;  %5106 = vmax.xlane.f32.xlu1 %v7946_v1  ;;  %5112 = vmax.xlane.f32.xlu0 %v7949_v5  ;;  %v6748_v7 = vpop.eup %6747 }
0x1310   : > { %v6750_v6 = vpop.eup %6749  ;;  %v4927_v21 = vsub.f32 1.0, %v6748_v7  ;;  %v4931_v23 = vmul.f32 %v6748_v7, %v7876_v50 }
0x1311   : > { %6751 = vtanh.f32 %v4923_v58  ;;  %v4924_v4 = vadd.f32 %v4922_v3, %v4920_v2  ;;  %v4928_v0 = vsub.f32 1.0, %v6750_v6  ;;  %v4932_v10 = vmul.f32 %v6750_v6, %v7878_v49 }
0x1313   : > { %6753 = vtanh.f32 %v4924_v4  ;;  %5108 = vmax.xlane.f32.xlu0 %v7954_v31 }
0x131b   : > { %v6752_v22 = vpop.eup %6751 }
0x131c   : > { %v4929_v8 = vmul.f32 %v6752_v22, %v4927_v21 }
0x131d   : > { %v6754_v9 = vpop.eup %6753 }
0x131e   : > { %v4933_v13 = vadd.f32 %v4931_v23, %v4929_v8  ;;  %v4930_v14 = vmul.f32 %v6754_v9, %v4928_v0 }
0x1320   : > { %v4934_v15 = vadd.f32 %v4932_v10, %v4930_v14 }
0x1322   : > { %v4935_v18 = vpack.c.bf16 %v4934_v15, %v4933_v13 }
0x1324   : > { %4937 = vst.msk [vmem:[#allocation13 + $0x38] sm:$0xff] %vm1231_vm2, %v4935_v18 }
0x132b   : > { %v4945_v24 = vld [vmem:[#allocation13 + $0x38] sm:$0xff] }
0x132c   : > { %6336 = vmatmul.mubr.msk.bf16.gmra.mrb[128].mxu0 %vm1231_vm2, %v4945_v24 }
0x1388   : > { %v7961_v19 = vpop.xlane.xlu0 %5094 }
0x1389   : > { %v5124_v37 = vsub.f32 %v7908_v16, %v7961_v19 }
0x138b   : > { %v7965_v12 = vpop.xlane.xlu1 %5092  ;;  %v5142_v43 = vmul.f32 1.442695, %v5124_v37 }
0x138c   : > { %v7963_v11 = vpop.xlane.xlu0 %5090  ;;  %v5123_v29 = vsub.f32 %v7912_v33, %v7965_v12 }
0x138d   : > { %v5122_v27 = vsub.f32 %v7915_v39, %v7963_v11 }
0x138e   : > { %v5140_v35 = vmul.f32 1.442695, %v5123_v29 }
0x138f   : > { %v5138_v34 = vmul.f32 1.442695, %v5122_v27 }
0x1390   : > { %v7967_v50 = vpop.xlane.xlu0 %5096  ;;  %v7969_v17 = vpop.xlane.xlu1 %5102 }
0x1391   : > { %v5125_v36 = vsub.f32 %v7920_v32, %v7967_v50  ;;  %6755 = vpow2.f32 %v5138_v34  ;;  %v5128_v40 = vsub.f32 %v7923_v41, %v7969_v17 }
0x1392   : > { %6757 = vpow2.f32 %v5140_v35 }
0x1393   : > { %v5144_v45 = vmul.f32 1.442695, %v5125_v36  ;;  %6759 = vpow2.f32 %v5142_v43  ;;  %v5150_v2 = vmul.f32 1.442695, %v5128_v40 }
0x1394   : > { %v7971_v49 = vpop.xlane.xlu0 %5104  ;;  %v7975_v28 = vpop.xlane.xlu1 %5098 }
0x1395   : > { %v5126_v46 = vsub.f32 %v7928_v25, %v7975_v28  ;;  %6761 = vpow2.f32 %v5144_v45  ;;  %v5129_v61 = vsub.f32 %v7931_v51, %v7971_v49 }
0x1397   : > { %v5146_v63 = vmul.f32 1.442695, %v5126_v46  ;;  %v5152_v7 = vmul.f32 1.442695, %v5129_v61 }
0x1398   : > { %v7979_v30 = vpop.xlane.xlu0 %5100  ;;  %v7985_v42 = vpop.xlane.xlu1 %5110 }
0x1399   : > { %v5127_v52 = vsub.f32 %v7936_v48, %v7979_v30  ;;  %6763 = vpow2.f32 %v5146_v63 }
0x139b   : > { %v5148_v53 = vmul.f32 1.442695, %v5127_v52  ;;  %v6756_v4 = vpop.eup %6755 }
0x139c   : > { %v7989_v54 = vpop.xlane.xlu0 %5112  ;;  %v8002_v59 = vpop.xlane.xlu1 %5106 }
0x139d   : > { %v5130_v3 = vsub.f32 %v7946_v1, %v8002_v59  ;;  %6765 = vpow2.f32 %v5148_v53  ;;  %v6758_v21 = vpop.eup %6757  ;;  %v5133_v0 = vsub.f32 %v7949_v5, %v7989_v54 }
0x139e   : > { %6767 = vpow2.f32 %v5150_v2  ;;  %v6760_v23 = vpop.eup %6759 }
0x139f   : > { %v5154_v22 = vmul.f32 1.442695, %v5130_v3  ;;  %6769 = vpow2.f32 %v5152_v7  ;;  %v6762_v9 = vpop.eup %6761  ;;  %v5160_v14 = vmul.f32 1.442695, %v5133_v0 }
0x13a0   : > { %v8010_v57 = vpop.xlane.xlu0 %5108 }
0x13a1   : > { %v5131_v6 = vsub.f32 %v7954_v31, %v8010_v57  ;;  %6771 = vpow2.f32 %v5154_v22 }
0x13a3   : > { %v5156_v8 = vmul.f32 1.442695, %v5131_v6  ;;  %v6764_v13 = vpop.eup %6763 }
0x13a5   : > { %6773 = vpow2.f32 %v5156_v8 }
0x13a7   : > { %v6766_v15 = vpop.eup %6765 }
0x13a8   : > { %v6768_v18 = vpop.eup %6767 }
0x13a9   : > { %v6770_v24 = vpop.eup %6769 }
0x13ab   : > { %v6772_v27 = vpop.eup %6771 }
0x13af   : > { %v6774_v29 = vpop.eup %6773 }
0x13ff   : > { %v6337_v38 = vpop.f32.mrb[128].mxu0 }
0x1400   : > { %v5075_v44 = vpop.f32.mrb[129].mxu0  ;;  %v8005_v60 = vadd.f32 %v6337_v38, %v7905_v62 }
0x1401   : > { %v7992_v26 = vadd.f32 %v7905_v62, %v5075_v44  ;;  %v6338_v56 = vpop.f32.mrb[130].mxu0 }
0x1402   : > { %v5078_v47 = vpop.f32.mrb[131].mxu0  ;;  %v8013_v58 = vadd.f32 %v6338_v56, %v7905_v62 }
0x1403   : > { %v7997_v55 = vadd.f32 %v7905_v62, %v5078_v47  ;;  %5114 = vmax.xlane.f32.xlu1 %v7992_v26  ;;  %v5132_v62 = vsub.f32 %v7939_v20, %v7985_v42 }
0x1405   : > { %5116 = vmax.xlane.f32.xlu0 %v7997_v55  ;;  %v5158_v10 = vmul.f32 1.442695, %v5132_v62 }
0x1407   : > { %5118 = vmax.xlane.f32.xlu1 %v8005_v60  ;;  %6775 = vpow2.f32 %v5158_v10 }
0x1408   : > { %6777 = vpow2.f32 %v5160_v14 }
0x1409   : > { %5120 = vmax.xlane.f32.xlu0 %v8013_v58 }
0x140b   : > { %5170 = vadd.xlane.f32.xlu1 %v6756_v4 }
0x140d   : > { %5172 = vadd.xlane.f32.xlu0 %v6758_v21 }
0x140f   : > { %5174 = vadd.xlane.f32.xlu1 %v6760_v23 }
0x1411   : > { %5176 = vadd.xlane.f32.xlu0 %v6762_v9  ;;  %v6776_v37 = vpop.eup %6775 }
0x1412   : > { %v6778_v34 = vpop.eup %6777 }
0x1413   : > { %5178 = vadd.xlane.f32.xlu1 %v6764_v13 }
0x1415   : > { %5180 = vadd.xlane.f32.xlu0 %v6766_v15 }
0x1417   : > { %5182 = vadd.xlane.f32.xlu1 %v6768_v18 }
0x1419   : > { %5184 = vadd.xlane.f32.xlu0 %v6770_v24 }
0x141b   : > { %5186 = vadd.xlane.f32.xlu1 %v6772_v27 }
0x141d   : > { %5188 = vadd.xlane.f32.xlu0 %v6774_v29 }
0x141f   : > { %5190 = vadd.xlane.f32.xlu1 %v6776_v37 }
0x1421   : > { %5192 = vadd.xlane.f32.xlu0 %v6778_v34 }
0x1490   : > { %v8025_v35 = vpop.xlane.xlu1 %5114 }
0x1491   : > { %v5134_v36 = vsub.f32 %v7992_v26, %v8025_v35 }
0x1492   : > { %v8029_v38 = vpop.xlane.xlu0 %5116 }
0x1493   : > { %v5162_v43 = vmul.f32 1.442695, %v5134_v36  ;;  %v5135_v46 = vsub.f32 %v7997_v55, %v8029_v38 }
0x1494   : > { %v8033_v44 = vpop.xlane.xlu1 %5118 }
0x1495   : > { %6779 = vpow2.f32 %v5162_v43  ;;  %v5164_v56 = vmul.f32 1.442695, %v5135_v46  ;;  %v5136_v45 = vsub.f32 %v8005_v60, %v8033_v44 }
0x1496   : > { %v8037_v52 = vpop.xlane.xlu0 %5120 }
0x1497   : > { %6781 = vpow2.f32 %v5164_v56  ;;  %v5166_v47 = vmul.f32 1.442695, %v5136_v45  ;;  %v5137_v40 = vsub.f32 %v8013_v58, %v8037_v52 }
0x1498   : > { %v5171_v63 = vpop.xlane.xlu1 %5170 }
0x1499   : > { %6783 = vpow2.f32 %v5166_v47  ;;  %v5168_v61 = vmul.f32 1.442695, %v5137_v40 }
0x149a   : > { %6785 = vlog2.f32 %v5171_v63  ;;  %v5173_v53 = vpop.xlane.xlu0 %5172 }
0x149b   : > { %6787 = vpow2.f32 %v5168_v61 }
0x149c   : > { %6789 = vlog2.f32 %v5173_v53  ;;  %v5175_v2 = vpop.xlane.xlu1 %5174 }
0x149d   : > { %6791 = vlog2.f32 %v5175_v2 }
0x149e   : > { %v5177_v3 = vpop.xlane.xlu0 %5176 }
0x149f   : > { %v6780_v4 = vpop.eup %6779  ;;  %6793 = vlog2.f32 %v5177_v3 }
0x14a0   : > { %5194 = vadd.xlane.f32.xlu1 %v6780_v4  ;;  %v5179_v7 = vpop.xlane.xlu1 %5178 }
0x14a1   : > { %v6782_v6 = vpop.eup %6781  ;;  %6795 = vlog2.f32 %v5179_v7 }
0x14a2   : > { %5196 = vadd.xlane.f32.xlu0 %v6782_v6  ;;  %v5181_v21 = vpop.xlane.xlu0 %5180 }
0x14a3   : > { %v6784_v62 = vpop.eup %6783  ;;  %6797 = vlog2.f32 %v5181_v21 }
0x14a4   : > { %v6786_v22 = vpop.eup %6785  ;;  %5198 = vadd.xlane.f32.xlu1 %v6784_v62  ;;  %v5183_v23 = vpop.xlane.xlu1 %5182 }
0x14a5   : > { %v6788_v0 = vpop.eup %6787  ;;  %v5203_v8 = vmul.f32 0.6931472, %v6786_v22  ;;  %6799 = vlog2.f32 %v5183_v23 }
0x14a6   : > { %v6790_v9 = vpop.eup %6789  ;;  %5200 = vadd.xlane.f32.xlu0 %v6788_v0  ;;  %v5185_v10 = vpop.xlane.xlu0 %5184 }
0x14a7   : > { %v6792_v13 = vpop.eup %6791  ;;  %v5234_v14 = vadd.f32 %v5203_v8, %v7963_v11  ;;  %v5205_v15 = vmul.f32 0.6931472, %v6790_v9  ;;  %6801 = vlog2.f32 %v5185_v10 }
0x14a8   : > { %v5207_v18 = vmul.f32 0.6931472, %v6792_v13  ;;  %v5187_v24 = vpop.xlane.xlu1 %5186 }
0x14a9   : > { %v6794_v27 = vpop.eup %6793  ;;  %v5250_v29 = vsub.f32 %v7915_v39, %v5234_v14  ;;  %v5235_v37 = vadd.f32 %v5205_v15, %v7965_v12  ;;  %6803 = vlog2.f32 %v5187_v24 }
0x14aa   : > { %v5236_v34 = vadd.f32 %v5207_v18, %v7961_v19  ;;  %v5209_v36 = vmul.f32 0.6931472, %v6794_v27  ;;  %v5189_v43 = vpop.xlane.xlu0 %5188 }
0x14ab   : > { %v6796_v46 = vpop.eup %6795  ;;  %5266 = vst [vmem:[%s7126_s3] sm:$0xff] %v5250_v29  ;;  %v5251_v11 = vsub.f32 %v7912_v33, %v5235_v37  ;;  %6805 = vlog2.f32 %v5189_v43 }
0x14ac   : > { %v5252_v56 = vsub.f32 %v7908_v16, %v5236_v34  ;;  %v5237_v45 = vadd.f32 %v5209_v36, %v7967_v50  ;;  %v5211_v47 = vmul.f32 0.6931472, %v6796_v46  ;;  %v5191_v39 = vpop.xlane.xlu1 %5190 }
0x14ad   : > { %v6798_v12 = vpop.eup %6797  ;;  %5267 = vst [vmem:[%s7126_s3 + $0x8] sm:$0xff] %v5251_v11  ;;  %6807 = vlog2.f32 %v5191_v39 }
0x14ae   : > { %5268 = vst [vmem:[%s7126_s3 + $0x10] sm:$0xff] %v5252_v56  ;;  %v5253_v19 = vsub.f32 %v7920_v32, %v5237_v45  ;;  %v5238_v40 = vadd.f32 %v5211_v47, %v7975_v28  ;;  %v5213_v63 = vmul.f32 0.6931472, %v6798_v12  ;;  %v5193_v33 = vpop.xlane.xlu0 %5192 }
0x14af   : > { %v6800_v61 = vpop.eup %6799  ;;  %6809 = vlog2.f32 %v5193_v33 }
0x14b0   : > { %5269 = vst [vmem:[%s7126_s3 + $0x18] sm:$0xff] %v5253_v19  ;;  %v5254_v16 = vsub.f32 %v7928_v25, %v5238_v40  ;;  %v5239_v50 = vadd.f32 %v5213_v63, %v7979_v30  ;;  %v5215_v53 = vmul.f32 0.6931472, %v6800_v61 }
0x14b1   : > { %v6802_v2 = vpop.eup %6801 }
0x14b2   : > { %5270 = vst [vmem:[%s7126_s3 + $0x20] sm:$0xff] %v5254_v16  ;;  %v5255_v3 = vsub.f32 %v7936_v48, %v5239_v50  ;;  %v5240_v32 = vadd.f32 %v5215_v53, %v7969_v17  ;;  %v5217_v4 = vmul.f32 0.6931472, %v6802_v2 }
0x14b3   : > { %v6804_v28 = vpop.eup %6803 }
0x14b4   : > { %5271 = vst [vmem:[%s7126_s3 + $0x28] sm:$0xff] %v5255_v3  ;;  %v5256_v7 = vsub.f32 %v7923_v41, %v5240_v32  ;;  %v5241_v6 = vadd.f32 %v5217_v4, %v7971_v49  ;;  %v5219_v21 = vmul.f32 0.6931472, %v6804_v28 }
0x14b5   : > { %v6806_v25 = vpop.eup %6805 }
0x14b6   : > { %5272 = vst [vmem:[%s7126_s3 + $0x30] sm:$0xff] %v5256_v7  ;;  %v5257_v30 = vsub.f32 %v7931_v51, %v5241_v6  ;;  %v5242_v62 = vadd.f32 %v5219_v21, %v8002_v59  ;;  %v5221_v48 = vmul.f32 0.6931472, %v6806_v25 }
0x14b7   : > { %v6808_v17 = vpop.eup %6807 }
0x14b8   : > { %5273 = vst [vmem:[%s7126_s3 + $0x38] sm:$0xff] %v5257_v30  ;;  %v5258_v22 = vsub.f32 %v7946_v1, %v5242_v62  ;;  %v5243_v23 = vadd.f32 %v5221_v48, %v8010_v57  ;;  %v5223_v41 = vmul.f32 0.6931472, %v6808_v17 }
0x14b9   : > { %v6810_v0 = vpop.eup %6809 }
0x14ba   : > { %5274 = vst [vmem:[%s7126_s3 + $0x40] sm:$0xff] %v5258_v22  ;;  %v5259_v49 = vsub.f32 %v7954_v31, %v5243_v23  ;;  %v5244_v8 = vadd.f32 %v5223_v41, %v7985_v42  ;;  %v5225_v9 = vmul.f32 0.6931472, %v6810_v0 }
0x14bc   : > { %5275 = vst [vmem:[%s7126_s3 + $0x48] sm:$0xff] %v5259_v49  ;;  %v5260_v51 = vsub.f32 %v7939_v20, %v5244_v8  ;;  %v5245_v59 = vadd.f32 %v5225_v9, %v7989_v54 }
0x14be   : > { %5276 = vst [vmem:[%s7126_s3 + $0x50] sm:$0xff] %v5260_v51  ;;  %v5261_v10 = vsub.f32 %v7949_v5, %v5245_v59 }
0x14c0   : > { %5277 = vst [vmem:[%s7126_s3 + $0x58] sm:$0xff] %v5261_v10 }
0x152d   : > { %v5195_v1 = vpop.xlane.xlu1 %5194 }
0x152e   : > { %6811 = vlog2.f32 %v5195_v1 }
0x152f   : > { %v5197_v57 = vpop.xlane.xlu0 %5196 }
0x1530   : > { %6813 = vlog2.f32 %v5197_v57 }
0x1531   : > { %v5199_v13 = vpop.xlane.xlu1 %5198 }
0x1532   : > { %6815 = vlog2.f32 %v5199_v13 }
0x1533   : > { %v5201_v31 = vpop.xlane.xlu0 %5200 }
0x1534   : > { %6817 = vlog2.f32 %v5201_v31 }
0x1538   : > { %v6812_v42 = vpop.eup %6811 }
0x1539   : > { %v5227_v14 = vmul.f32 0.6931472, %v6812_v42 }
0x153a   : > { %v6814_v20 = vpop.eup %6813 }
0x153b   : > { %v5246_v54 = vadd.f32 %v5227_v14, %v8025_v35  ;;  %v5229_v15 = vmul.f32 0.6931472, %v6814_v20 }
0x153c   : > { %v6816_v5 = vpop.eup %6815 }
0x153d   : > { %v5262_v18 = vsub.f32 %v7992_v26, %v5246_v54  ;;  %v5247_v24 = vadd.f32 %v5229_v15, %v8029_v38  ;;  %v5231_v27 = vmul.f32 0.6931472, %v6816_v5 }
0x153e   : > { %v6818_v29 = vpop.eup %6817 }
0x153f   : > { %5278 = vst [vmem:[%s7126_s3 + $0x60] sm:$0xff] %v5262_v18  ;;  %v5263_v37 = vsub.f32 %v7997_v55, %v5247_v24  ;;  %v5248_v34 = vadd.f32 %v5231_v27, %v8033_v44  ;;  %v5233_v36 = vmul.f32 0.6931472, %v6818_v29 }
0x1541   : > { %5279 = vst [vmem:[%s7126_s3 + $0x68] sm:$0xff] %v5263_v37  ;;  %v5264_v43 = vsub.f32 %v8005_v60, %v5248_v34  ;;  %v5249_v35 = vadd.f32 %v5233_v36, %v8037_v52 }
0x1543   : > { %5280 = vst [vmem:[%s7126_s3 + $0x70] sm:$0xff] %v5264_v43  ;;  %v5265_v46 = vsub.f32 %v8013_v58, %v5249_v35 }
0x1545   : > { %5281 = vst [vmem:[%s7126_s3 + $0x78] sm:$0xff] %v5265_v46 }
0x1546   : > { %s8203_s4 = sld [smem:[#allocation21_spill]]  ;;  %s5321_s29 = sshll.u32 %s7126_s3, 4  ;;  %s5322_s29 = int_to_ptr.vmem [resolvable:$true] %s5321_s29 }
0x1547   : > { %s8205_s30 = sld [smem:[#allocation37_spill]]  ;;  %s6867_s27 = smov 256  }
0x1548   : > { %6341 = sst [smem:[#allocation15]] (%p7042_p6), %s6867_s27  ;;  %s6868_s28 = smov 512  }
0x1549   : > { %6342 = sst [smem:[#allocation15 + $0x1]] (%p7042_p6), %s6868_s28  ;;  %s6869_s2 = smov 2  }
0x154a   : > { %6343 = sst [smem:[#allocation15 + $0x2]] (%p7042_p6), %s6869_s2  ;;  %s6870_s1 = smov 128  }
0x154b   : > { %6344 = sst [smem:[#allocation15 + $0x3]] (%p7042_p6), %s6870_s1  ;;  %s6871_s3 = smov 8  }
0x154c   : > { %s5672_s7 = sshll.u32 %s8203_s4, 8  ;;  %6345 = sst [smem:[#allocation15 + $0x4]] (%p7042_p6), %s6870_s1 }
0x154d   : > { %s5304_s5 = scalar_lea.hbm %s8205_s30, %s5672_s7  ;;  %6346 = sst [smem:[#allocation15 + $0x5]] (%p7042_p6), %s6871_s3 }
0x154e   : > { %s6872_s6 = smov [#allocation14]   ;;  %s6873_s4 = smov 0  }
0x154f   : > { %6347 = dma.general (%p7042_p6), %s5322_s29, 2048, %s5304_s5, %s5288_s25, %s6872_s6, [#allocation15], %s6873_s4, 0  }
0x1550 PF: > { %s8206_s7 = sld [smem:[#allocation17_spill]]  ;;  %p6350_p0 = pnand %p5471_p9, %p7046_p8 }
0x1556   : > { %s5357_s30 = sand.u32 1, %s8206_s7  }
0x1557   : > { %s5358_s27 = scalar_lea.sflag [#allocation6], %s5357_s30 }
0x1558   : > { %6837 = dma.done.wait (!%p6350_p0), %s5358_s27, 2048  }
0x1559   : > { %6839 = vsyncadd (!%p6350_p0), %s5358_s27, 4294965248  ;;  %s8209_s28 = sld [smem:[#allocation22_spill]]  ;;  %s8210_s5 = sld [smem:[#allocation18_spill]] }
0x155a   : > { %s8211_s26 = sld [smem:[#allocation19_spill]]  ;;  %s8212_s27 = sld [smem:[#allocation23_spill]] }
0x155f   : > { %p35_p1 = scmp.ge.s32.totalorder %s8209_s28, 4  }
0x1561   :  { %37 = sbr.rel (!%p35_p1) target bundleno = 15 (0xf), region = 316 }
0x1568   :  { %5363 = vsyncpa [#allocation6], 1 }
0x1569   :  { %5365 = vsyncpa [#allocation6 + $0x1], 1 }

</bundles_post_ra>
